<compile_context>
chip_gen: v7x
topology: tpu7x:2x2x1
jax: 0.10.0
libtpu: 0.0.40
codegen_flags: <defaults>
</compile_context>

<pallas_src>
import jax
import jax.numpy as jnp
from jax import lax
from jax.experimental import pallas as pl
from jax.experimental.pallas import tpu as pltpu


# ----------------------------------------------------------------------------
# Fused Scorer kernel (num_layers = 2, bidirectional, batch = 1).
#
#   x:         [T, D_in]
#   wih{l}:    [D_in_l, 8H]  columns = [fwd gates (i,f,o,g) | bwd gates (i,f,o,g)]
#   whhf{l}:   [H, 4H]       forward  recurrent weights, gate order (i,f,o,g)
#   whhb{l}:   [H, 4H]       backward recurrent weights, gate order (i,f,o,g)
#   b{l}:      [1, 8H]       combined b_ih + b_hh, [fwd | bwd]
#   wout:      [1, 2H], bout: [1, 1]
#   out:       [1, T]        (lane-dense; wrapper reshapes to [T, 1])
#
# Scratch:
#   g_sc:   [T, 8H]  precomputed input projections for the current layer
#   act_sc: [T, 2H]  layer output: fwd hidden in [:, :H], bwd hidden in [:, H:]
# ----------------------------------------------------------------------------
def _scorer_kernel(x_ref, wih0_ref, whhf0_ref, whhb0_ref, b0_ref,
                   wih1_ref, whhf1_ref, whhb1_ref, b1_ref,
                   wout_ref, bout_ref,
                   out_ref,
                   g_sc, act_sc):
    T = x_ref.shape[0]
    H = act_sc.shape[1] // 2
    H2, H3, H4 = 2 * H, 3 * H, 4 * H

    def run_layer(whhf_ref, whhb_ref):
        """One bidirectional LSTM layer; reads g_sc, writes act_sc."""

        def step(t, carry):
            h_f, h_b, c_f, c_b = carry                   # each [1, H]
            tb = T - 1 - t

            # Two exact [1,H]@[H,4H] matmuls (no block-diagonal zero padding).
            rec_f = jnp.dot(h_f, whhf_ref[...],
                            preferred_element_type=jnp.float32)   # [1, 4H]
            rec_b = jnp.dot(h_b, whhb_ref[...],
                            preferred_element_type=jnp.float32)   # [1, 4H]

            gates_f = g_sc[pl.ds(t, 1), :H4] + rec_f      # [1, 4H] fwd gates
            gates_b = g_sc[pl.ds(tb, 1), H4:] + rec_b     # [1, 4H] bwd gates

            # Gate order (i, f, o, g): one sigmoid over [i|f|o], one tanh over [g].
            sig_f = jax.nn.sigmoid(gates_f[:, :H3])
            g_f = jnp.tanh(gates_f[:, H3:])
            sig_b = jax.nn.sigmoid(gates_b[:, :H3])
            g_b = jnp.tanh(gates_b[:, H3:])

            c_f_new = sig_f[:, H:H2] * c_f + sig_f[:, :H] * g_f
            h_f_new = sig_f[:, H2:H3] * jnp.tanh(c_f_new)
            c_b_new = sig_b[:, H:H2] * c_b + sig_b[:, :H] * g_b
            h_b_new = sig_b[:, H2:H3] * jnp.tanh(c_b_new)

            # NOTE: sub-128-lane stores for H < 128 — accepted cost at this size.
            act_sc[pl.ds(t, 1), :H] = h_f_new             # fwd output at time t
            act_sc[pl.ds(tb, 1), H:] = h_b_new            # bwd output at time T-1-t

            return (h_f_new, h_b_new, c_f_new, c_b_new)

        zero = jnp.zeros((1, H), jnp.float32)
        lax.fori_loop(0, T, step, (zero, zero, zero, zero), unroll=min(T, 8))

    # ---- Layer 0: input projection for the whole sequence, then recurrence ----
    g_sc[...] = (jnp.dot(x_ref[...], wih0_ref[...],
                         preferred_element_type=jnp.float32) + b0_ref[...])
    run_layer(whhf0_ref, whhb0_ref)

    # ---- Layer 1: fed directly by the [T, 2H] activation scratch (no concat).
    # g_sc is fully written before run_layer overwrites act_sc -> ordering is safe.
    g_sc[...] = (jnp.dot(act_sc[...], wih1_ref[...],
                         preferred_element_type=jnp.float32) + b1_ref[...])
    run_layer(whhf1_ref, whhb1_ref)

    # ---- Output head: lane-dense [1, T] logits = wout @ act^T + b, then sigmoid ----
    logits = jnp.dot(wout_ref[...], act_sc[...].T,
                     preferred_element_type=jnp.float32)          # [1, T]
    out_ref[...] = jax.nn.sigmoid(logits + bout_ref[...])


def scorer_forward(features, fused_params):
    """features: [T, 1, input_size] -> scores [T, 1].  Single fused pallas_call."""
    x = features[:, 0, :].astype(jnp.float32)
    T, D_in = x.shape
    (wih0, whhf0, whhb0, b0), (wih1, whhf1, whhb1, b1), (wout, bout) = fused_params
    H = whhf0.shape[0]

    # Explicit VMEM budget (f32 everywhere), with headroom; clamp to a safe range.
    est_bytes = 4 * (T * D_in + D_in * 8 * H + 2 * H * 8 * H
                     + 4 * H * 4 * H + 2 * 8 * H + 2 * H + 1
                     + T * 8 * H + T * 2 * H + T)
    vmem_limit = int(min(48 * 1024 * 1024, max(8 * 1024 * 1024, 2 * est_bytes)))

    out = pl.pallas_call(
        _scorer_kernel,
        out_shape=jax.ShapeDtypeStruct((1, T), jnp.float32),
        in_specs=[pl.BlockSpec(memory_space=pltpu.MemorySpace.VMEM)] * 11,
        out_specs=pl.BlockSpec(memory_space=pltpu.MemorySpace.VMEM),
        scratch_shapes=[pltpu.VMEM((T, 8 * H), jnp.float32),    # per-layer gate slab
                        pltpu.VMEM((T, 2 * H), jnp.float32)],   # [fwd|bwd] hidden states
        compiler_params=pltpu.CompilerParams(vmem_limit_bytes=vmem_limit),
    )(x, wih0, whhf0, whhb0, b0, wih1, whhf1, whhb1, b1, wout, bout)
    return out.reshape(T, 1)


# ----------------------------------------------------------------------------
# Parameters (deterministic, PyTorch-style uniform(-1/sqrt(H), 1/sqrt(H)) init)
# ----------------------------------------------------------------------------
def init_params(key, input_size, hidden_size, num_layers):
    lstm_params = []
    bound = 1.0 / jnp.sqrt(jnp.float32(hidden_size))
    for layer in range(num_layers):
        d_in = input_size if layer == 0 else 2 * hidden_size
        layer_p = {}
        for direction in ("fwd", "bwd"):
            key, k1, k2, k3, k4 = jax.random.split(key, 5)
            w_ih = jax.random.uniform(k1, (4 * hidden_size, d_in),
                                      minval=-bound, maxval=bound, dtype=jnp.float32)
            w_hh = jax.random.uniform(k2, (4 * hidden_size, hidden_size),
                                      minval=-bound, maxval=bound, dtype=jnp.float32)
            b_ih = jax.random.uniform(k3, (4 * hidden_size,),
                                      minval=-bound, maxval=bound, dtype=jnp.float32)
            b_hh = jax.random.uniform(k4, (4 * hidden_size,),
                                      minval=-bound, maxval=bound, dtype=jnp.float32)
            layer_p[direction] = (w_ih.T, w_hh.T, (b_ih + b_hh)[None, :])
        lstm_params.append(layer_p)
    key, k1, k2 = jax.random.split(key, 3)
    ob = 1.0 / jnp.sqrt(jnp.float32(2 * hidden_size))
    w_out = jax.random.uniform(k1, (1, 2 * hidden_size), minval=-ob, maxval=ob,
                               dtype=jnp.float32)
    b_out = jax.random.uniform(k2, (1,), minval=-ob, maxval=ob, dtype=jnp.float32)
    return lstm_params, (w_out.T, b_out[None, :])


def _reorder_ifgo_to_ifog(w, H):
    """Reorder gate columns (i, f, g, o) -> (i, f, o, g).  w: [*, 4H]."""
    return jnp.concatenate([w[:, :2 * H], w[:, 3 * H:4 * H], w[:, 2 * H:3 * H]], axis=1)


def fuse_params(lstm_params, out_params, hidden_size):
    """Build the fused-layout weights consumed by the kernel."""
    # TODO(synk): kernel hardcodes num_layers=2 (the module's default); generalize if needed.
    assert len(lstm_params) == 2
    H = hidden_size
    fused_layers = []
    for layer_p in lstm_params:
        wih_f_t, whh_f_t, b_f = layer_p["fwd"]   # [D_in,4H], [H,4H], [1,4H] in (i,f,g,o)
        wih_b_t, whh_b_t, b_b = layer_p["bwd"]
        wih_f_t = _reorder_ifgo_to_ifog(wih_f_t, H)
        wih_b_t = _reorder_ifgo_to_ifog(wih_b_t, H)
        whh_f_t = _reorder_ifgo_to_ifog(whh_f_t, H)
        whh_b_t = _reorder_ifgo_to_ifog(whh_b_t, H)
        b_f = _reorder_ifgo_to_ifog(b_f, H)
        b_b = _reorder_ifgo_to_ifog(b_b, H)
        wih_cat = jnp.concatenate([wih_f_t, wih_b_t], axis=1)      # [D_in, 8H]
        b_cat = jnp.concatenate([b_f, b_b], axis=1)                # [1, 8H]
        fused_layers.append((wih_cat, whh_f_t, whh_b_t, b_cat))
    w_out_t, b_out = out_params                                    # [2H,1], [1,1]
    return fused_layers[0], fused_layers[1], (w_out_t.T, b_out)    # wout -> [1, 2H]


# ----------------------------------------------------------------------------
# Pure-JAX reference (same math, PyTorch layout) for a correctness check.
# ----------------------------------------------------------------------------
def _ref_lstm_dir(x, w_ih_t, w_hh_t, bias):
    H = w_hh_t.shape[0]

    def step(carry, x_t):
        h, c = carry
        gates = x_t[None, :] @ w_ih_t + h @ w_hh_t + bias
        i = jax.nn.sigmoid(gates[:, :H])
        f = jax.nn.sigmoid(gates[:, H:2 * H])
        g = jnp.tanh(gates[:, 2 * H:3 * H])
        o = jax.nn.sigmoid(gates[:, 3 * H:])
        c = f * c + i * g
        h = o * jnp.tanh(c)
        return (h, c), h[0]

    init = (jnp.zeros((1, H), jnp.float32), jnp.zeros((1, H), jnp.float32))
    _, ys = lax.scan(step, init, x)
    return ys


def _ref_forward(features, lstm_params, out_params):
    x = features[:, 0, :].astype(jnp.float32)
    for layer_p in lstm_params:
        h_fwd = _ref_lstm_dir(x, *layer_p["fwd"])
        h_bwd = jnp.flip(_ref_lstm_dir(jnp.flip(x, 0), *layer_p["bwd"]), 0)
        x = jnp.concatenate([h_fwd, h_bwd], axis=-1)
    w_out_t, b_out = out_params
    return jax.nn.sigmoid(x @ w_out_t + b_out)


if __name__ == "__main__":
    SEQ_LEN, INPUT_SIZE, HIDDEN_SIZE, NUM_LAYERS = 8, 32, 32, 2

    key = jax.random.PRNGKey(0)
    key, pkey, xkey = jax.random.split(key, 3)
    lstm_params, out_params = init_params(pkey, INPUT_SIZE, HIDDEN_SIZE, NUM_LAYERS)
    fused_params = fuse_params(lstm_params, out_params, HIDDEN_SIZE)
    features = jax.random.normal(xkey, (SEQ_LEN, 1, INPUT_SIZE), dtype=jnp.float32)

    scores = scorer_forward(features, fused_params)
    scores = jax.block_until_ready(scores)

    assert scores.shape == (SEQ_LEN, 1), scores.shape

    ref = _ref_forward(features, lstm_params, out_params)
    max_err = float(jnp.max(jnp.abs(scores - ref)))
    assert max_err < 2e-3, f"mismatch vs reference: {max_err}"

    print("KERNEL_OK")
</pallas_src>

<mosaic_0001>
module attributes {stable_mosaic.version = 11 : i64} {
  func.func @_scorer_kernel(%arg0: memref<8x32xf32, #tpu.memory_space<vmem>>, %arg1: memref<32x256xf32, #tpu.memory_space<vmem>>, %arg2: memref<32x128xf32, #tpu.memory_space<vmem>>, %arg3: memref<32x128xf32, #tpu.memory_space<vmem>>, %arg4: memref<1x256xf32, #tpu.memory_space<vmem>>, %arg5: memref<64x256xf32, #tpu.memory_space<vmem>>, %arg6: memref<32x128xf32, #tpu.memory_space<vmem>>, %arg7: memref<32x128xf32, #tpu.memory_space<vmem>>, %arg8: memref<1x256xf32, #tpu.memory_space<vmem>>, %arg9: memref<1x64xf32, #tpu.memory_space<vmem>>, %arg10: memref<1x1xf32, #tpu.memory_space<vmem>>, %arg11: memref<1x8xf32, #tpu.memory_space<vmem>>, %arg12: memref<8x256xf32, #tpu.memory_space<vmem>>, %arg13: memref<8x64xf32, #tpu.memory_space<vmem>>) attributes {dimension_semantics = [], scalar_prefetch = 0 : i64, scratch_operands = 2 : i64, tpu.core_type = #tpu.core_type<tc>} {
    %c0 = arith.constant 0 : index
    %c0_0 = arith.constant 0 : index
    %0 = vector.load %arg0[%c0, %c0_0] : memref<8x32xf32, #tpu.memory_space<vmem>>, vector<8x32xf32>
    %c0_1 = arith.constant 0 : index
    %c0_2 = arith.constant 0 : index
    %1 = vector.load %arg1[%c0_1, %c0_2] : memref<32x256xf32, #tpu.memory_space<vmem>>, vector<32x256xf32>
    %cst = arith.constant dense<0.000000e+00> : vector<8x256xf32>
    %2 = tpu.matmul %0, %1, %cst {dimension_numbers = #tpu.dot_dimension_numbers<[1], [0], [0], [1], [0, 0, 1, 1], [], []>} : vector<8x32xf32>, vector<32x256xf32>, vector<8x256xf32> -> vector<8x256xf32>
    %c0_3 = arith.constant 0 : index
    %c0_4 = arith.constant 0 : index
    %3 = vector.load %arg4[%c0_3, %c0_4] : memref<1x256xf32, #tpu.memory_space<vmem>>, vector<1x256xf32>
    %4 = vector.broadcast %3 : vector<1x256xf32> to vector<8x256xf32>
    %5 = arith.addf %2, %4 : vector<8x256xf32>
    %c0_5 = arith.constant 0 : index
    %c0_6 = arith.constant 0 : index
    %6 = vector.load %arg12[%c0_5, %c0_6] : memref<8x256xf32, #tpu.memory_space<vmem>>, vector<8x256xf32>
    tpu.vector_store %arg12[%c0_5, %c0_6], %5 {strides = array<i32>} : memref<8x256xf32, #tpu.memory_space<vmem>>, vector<8x256xf32>,
    %cst_7 = arith.constant 0.000000e+00 : f32
    %7 = vector.broadcast %cst_7 : f32 to vector<1x32xf32>
    %c0_i32 = arith.constant 0 : i32
    %c7_i32 = arith.constant 7 : i32
    %8 = arith.subi %c7_i32, %c0_i32 : i32
    %c0_8 = arith.constant 0 : index
    %c0_9 = arith.constant 0 : index
    %9 = vector.load %arg2[%c0_8, %c0_9] : memref<32x128xf32, #tpu.memory_space<vmem>>, vector<32x128xf32>
    %cst_10 = arith.constant dense<0.000000e+00> : vector<1x128xf32>
    %10 = tpu.matmul %7, %9, %cst_10 {dimension_numbers = #tpu.dot_dimension_numbers<[1], [0], [0], [1], [0, 0, 1, 1], [], []>} : vector<1x32xf32>, vector<32x128xf32>, vector<1x128xf32> -> vector<1x128xf32>
    %c0_11 = arith.constant 0 : index
    %c0_12 = arith.constant 0 : index
    %11 = vector.load %arg3[%c0_11, %c0_12] : memref<32x128xf32, #tpu.memory_space<vmem>>, vector<32x128xf32>
    %cst_13 = arith.constant dense<0.000000e+00> : vector<1x128xf32>
    %12 = tpu.matmul %7, %11, %cst_13 {dimension_numbers = #tpu.dot_dimension_numbers<[1], [0], [0], [1], [0, 0, 1, 1], [], []>} : vector<1x32xf32>, vector<32x128xf32>, vector<1x128xf32> -> vector<1x128xf32>
    %13 = arith.index_cast %c0_i32 : i32 to index
    %c0_14 = arith.constant 0 : index
    %14 = vector.load %arg12[%13, %c0_14] : memref<8x256xf32, #tpu.memory_space<vmem>>, vector<1x128xf32>
    %15 = arith.addf %14, %10 : vector<1x128xf32>
    %16 = arith.index_cast %8 : i32 to index
    %c128 = arith.constant 128 : index
    %17 = vector.load %arg12[%16, %c128] : memref<8x256xf32, #tpu.memory_space<vmem>>, vector<1x128xf32>
    %18 = arith.addf %17, %12 : vector<1x128xf32>
    %19 = vector.extract_strided_slice %15 {offsets = [0, 0], sizes = [1, 96], strides = [1, 1]} : vector<1x128xf32> to vector<1x96xf32>
    %20 = arith.negf %19 : vector<1x96xf32>
    %21 = math.exp %20 : vector<1x96xf32>
    %cst_15 = arith.constant 1.000000e+00 : f32
    %22 = vector.broadcast %cst_15 : f32 to vector<1x96xf32>
    %23 = arith.addf %22, %21 : vector<1x96xf32>
    %24 = arith.divf %22, %23 : vector<1x96xf32>
    %25 = vector.extract_strided_slice %15 {offsets = [0, 96], sizes = [1, 32], strides = [1, 1]} : vector<1x128xf32> to vector<1x32xf32>
    %26 = math.tanh %25 : vector<1x32xf32>
    %27 = vector.extract_strided_slice %18 {offsets = [0, 0], sizes = [1, 96], strides = [1, 1]} : vector<1x128xf32> to vector<1x96xf32>
    %28 = arith.negf %27 : vector<1x96xf32>
    %29 = math.exp %28 : vector<1x96xf32>
    %cst_16 = arith.constant 1.000000e+00 : f32
    %30 = vector.broadcast %cst_16 : f32 to vector<1x96xf32>
    %31 = arith.addf %30, %29 : vector<1x96xf32>
    %32 = arith.divf %30, %31 : vector<1x96xf32>
    %33 = vector.extract_strided_slice %18 {offsets = [0, 96], sizes = [1, 32], strides = [1, 1]} : vector<1x128xf32> to vector<1x32xf32>
    %34 = math.tanh %33 : vector<1x32xf32>
    %35 = vector.extract_strided_slice %24 {offsets = [0, 32], sizes = [1, 32], strides = [1, 1]} : vector<1x96xf32> to vector<1x32xf32>
    %36 = arith.mulf %35, %7 : vector<1x32xf32>
    %37 = vector.extract_strided_slice %24 {offsets = [0, 0], sizes = [1, 32], strides = [1, 1]} : vector<1x96xf32> to vector<1x32xf32>
    %38 = arith.mulf %37, %26 : vector<1x32xf32>
    %39 = arith.addf %36, %38 : vector<1x32xf32>
    %40 = vector.extract_strided_slice %24 {offsets = [0, 64], sizes = [1, 32], strides = [1, 1]} : vector<1x96xf32> to vector<1x32xf32>
    %41 = math.tanh %39 : vector<1x32xf32>
    %42 = arith.mulf %40, %41 : vector<1x32xf32>
    %43 = vector.extract_strided_slice %32 {offsets = [0, 32], sizes = [1, 32], strides = [1, 1]} : vector<1x96xf32> to vector<1x32xf32>
    %44 = arith.mulf %43, %7 : vector<1x32xf32>
    %45 = vector.extract_strided_slice %32 {offsets = [0, 0], sizes = [1, 32], strides = [1, 1]} : vector<1x96xf32> to vector<1x32xf32>
    %46 = arith.mulf %45, %34 : vector<1x32xf32>
    %47 = arith.addf %44, %46 : vector<1x32xf32>
    %48 = vector.extract_strided_slice %32 {offsets = [0, 64], sizes = [1, 32], strides = [1, 1]} : vector<1x96xf32> to vector<1x32xf32>
    %49 = math.tanh %47 : vector<1x32xf32>
    %50 = arith.mulf %48, %49 : vector<1x32xf32>
    %51 = arith.index_cast %c0_i32 : i32 to index
    %c0_17 = arith.constant 0 : index
    %52 = vector.load %arg13[%51, %c0_17] : memref<8x64xf32, #tpu.memory_space<vmem>>, vector<1x32xf32>
    tpu.vector_store %arg13[%51, %c0_17], %42 {strides = array<i32>} : memref<8x64xf32, #tpu.memory_space<vmem>>, vector<1x32xf32>,
    %53 = arith.index_cast %8 : i32 to index
    %c32 = arith.constant 32 : index
    %54 = vector.load %arg13[%53, %c32] : memref<8x64xf32, #tpu.memory_space<vmem>>, vector<1x32xf32>
    tpu.vector_store %arg13[%53, %c32], %50 {strides = array<i32>} : memref<8x64xf32, #tpu.memory_space<vmem>>, vector<1x32xf32>,
    %c1_i32 = arith.constant 1 : i32
    %c7_i32_18 = arith.constant 7 : i32
    %55 = arith.subi %c7_i32_18, %c1_i32 : i32
    %c0_19 = arith.constant 0 : index
    %c0_20 = arith.constant 0 : index
    %56 = vector.load %arg2[%c0_19, %c0_20] : memref<32x128xf32, #tpu.memory_space<vmem>>, vector<32x128xf32>
    %cst_21 = arith.constant dense<0.000000e+00> : vector<1x128xf32>
    %57 = tpu.matmul %42, %56, %cst_21 {dimension_numbers = #tpu.dot_dimension_numbers<[1], [0], [0], [1], [0, 0, 1, 1], [], []>} : vector<1x32xf32>, vector<32x128xf32>, vector<1x128xf32> -> vector<1x128xf32>
    %c0_22 = arith.constant 0 : index
    %c0_23 = arith.constant 0 : index
    %58 = vector.load %arg3[%c0_22, %c0_23] : memref<32x128xf32, #tpu.memory_space<vmem>>, vector<32x128xf32>
    %cst_24 = arith.constant dense<0.000000e+00> : vector<1x128xf32>
    %59 = tpu.matmul %50, %58, %cst_24 {dimension_numbers = #tpu.dot_dimension_numbers<[1], [0], [0], [1], [0, 0, 1, 1], [], []>} : vector<1x32xf32>, vector<32x128xf32>, vector<1x128xf32> -> vector<1x128xf32>
    %60 = arith.index_cast %c1_i32 : i32 to index
    %c0_25 = arith.constant 0 : index
    %61 = vector.load %arg12[%60, %c0_25] : memref<8x256xf32, #tpu.memory_space<vmem>>, vector<1x128xf32>
    %62 = arith.addf %61, %57 : vector<1x128xf32>
    %63 = arith.index_cast %55 : i32 to index
    %c128_26 = arith.constant 128 : index
    %64 = vector.load %arg12[%63, %c128_26] : memref<8x256xf32, #tpu.memory_space<vmem>>, vector<1x128xf32>
    %65 = arith.addf %64, %59 : vector<1x128xf32>
    %66 = vector.extract_strided_slice %62 {offsets = [0, 0], sizes = [1, 96], strides = [1, 1]} : vector<1x128xf32> to vector<1x96xf32>
    %67 = arith.negf %66 : vector<1x96xf32>
    %68 = math.exp %67 : vector<1x96xf32>
    %cst_27 = arith.constant 1.000000e+00 : f32
    %69 = vector.broadcast %cst_27 : f32 to vector<1x96xf32>
    %70 = arith.addf %69, %68 : vector<1x96xf32>
    %71 = arith.divf %69, %70 : vector<1x96xf32>
    %72 = vector.extract_strided_slice %62 {offsets = [0, 96], sizes = [1, 32], strides = [1, 1]} : vector<1x128xf32> to vector<1x32xf32>
    %73 = math.tanh %72 : vector<1x32xf32>
    %74 = vector.extract_strided_slice %65 {offsets = [0, 0], sizes = [1, 96], strides = [1, 1]} : vector<1x128xf32> to vector<1x96xf32>
    %75 = arith.negf %74 : vector<1x96xf32>
    %76 = math.exp %75 : vector<1x96xf32>
    %cst_28 = arith.constant 1.000000e+00 : f32
    %77 = vector.broadcast %cst_28 : f32 to vector<1x96xf32>
    %78 = arith.addf %77, %76 : vector<1x96xf32>
    %79 = arith.divf %77, %78 : vector<1x96xf32>
    %80 = vector.extract_strided_slice %65 {offsets = [0, 96], sizes = [1, 32], strides = [1, 1]} : vector<1x128xf32> to vector<1x32xf32>
    %81 = math.tanh %80 : vector<1x32xf32>
    %82 = vector.extract_strided_slice %71 {offsets = [0, 32], sizes = [1, 32], strides = [1, 1]} : vector<1x96xf32> to vector<1x32xf32>
    %83 = arith.mulf %82, %39 : vector<1x32xf32>
    %84 = vector.extract_strided_slice %71 {offsets = [0, 0], sizes = [1, 32], strides = [1, 1]} : vector<1x96xf32> to vector<1x32xf32>
    %85 = arith.mulf %84, %73 : vector<1x32xf32>
    %86 = arith.addf %83, %85 : vector<1x32xf32>
    %87 = vector.extract_strided_slice %71 {offsets = [0, 64], sizes = [1, 32], strides = [1, 1]} : vector<1x96xf32> to vector<1x32xf32>
    %88 = math.tanh %86 : vector<1x32xf32>
    %89 = arith.mulf %87, %88 : vector<1x32xf32>
    %90 = vector.extract_strided_slice %79 {offsets = [0, 32], sizes = [1, 32], strides = [1, 1]} : vector<1x96xf32> to vector<1x32xf32>
    %91 = arith.mulf %90, %47 : vector<1x32xf32>
    %92 = vector.extract_strided_slice %79 {offsets = [0, 0], sizes = [1, 32], strides = [1, 1]} : vector<1x96xf32> to vector<1x32xf32>
    %93 = arith.mulf %92, %81 : vector<1x32xf32>
    %94 = arith.addf %91, %93 : vector<1x32xf32>
    %95 = vector.extract_strided_slice %79 {offsets = [0, 64], sizes = [1, 32], strides = [1, 1]} : vector<1x96xf32> to vector<1x32xf32>
    %96 = math.tanh %94 : vector<1x32xf32>
    %97 = arith.mulf %95, %96 : vector<1x32xf32>
    %98 = arith.index_cast %c1_i32 : i32 to index
    %c0_29 = arith.constant 0 : index
    %99 = vector.load %arg13[%98, %c0_29] : memref<8x64xf32, #tpu.memory_space<vmem>>, vector<1x32xf32>
    tpu.vector_store %arg13[%98, %c0_29], %89 {strides = array<i32>} : memref<8x64xf32, #tpu.memory_space<vmem>>, vector<1x32xf32>,
    %100 = arith.index_cast %55 : i32 to index
    %c32_30 = arith.constant 32 : index
    %101 = vector.load %arg13[%100, %c32_30] : memref<8x64xf32, #tpu.memory_space<vmem>>, vector<1x32xf32>
    tpu.vector_store %arg13[%100, %c32_30], %97 {strides = array<i32>} : memref<8x64xf32, #tpu.memory_space<vmem>>, vector<1x32xf32>,
    %c2_i32 = arith.constant 2 : i32
    %c7_i32_31 = arith.constant 7 : i32
    %102 = arith.subi %c7_i32_31, %c2_i32 : i32
    %c0_32 = arith.constant 0 : index
    %c0_33 = arith.constant 0 : index
    %103 = vector.load %arg2[%c0_32, %c0_33] : memref<32x128xf32, #tpu.memory_space<vmem>>, vector<32x128xf32>
    %cst_34 = arith.constant dense<0.000000e+00> : vector<1x128xf32>
    %104 = tpu.matmul %89, %103, %cst_34 {dimension_numbers = #tpu.dot_dimension_numbers<[1], [0], [0], [1], [0, 0, 1, 1], [], []>} : vector<1x32xf32>, vector<32x128xf32>, vector<1x128xf32> -> vector<1x128xf32>
    %c0_35 = arith.constant 0 : index
    %c0_36 = arith.constant 0 : index
    %105 = vector.load %arg3[%c0_35, %c0_36] : memref<32x128xf32, #tpu.memory_space<vmem>>, vector<32x128xf32>
    %cst_37 = arith.constant dense<0.000000e+00> : vector<1x128xf32>
    %106 = tpu.matmul %97, %105, %cst_37 {dimension_numbers = #tpu.dot_dimension_numbers<[1], [0], [0], [1], [0, 0, 1, 1], [], []>} : vector<1x32xf32>, vector<32x128xf32>, vector<1x128xf32> -> vector<1x128xf32>
    %107 = arith.index_cast %c2_i32 : i32 to index
    %c0_38 = arith.constant 0 : index
    %108 = vector.load %arg12[%107, %c0_38] : memref<8x256xf32, #tpu.memory_space<vmem>>, vector<1x128xf32>
    %109 = arith.addf %108, %104 : vector<1x128xf32>
    %110 = arith.index_cast %102 : i32 to index
    %c128_39 = arith.constant 128 : index
    %111 = vector.load %arg12[%110, %c128_39] : memref<8x256xf32, #tpu.memory_space<vmem>>, vector<1x128xf32>
    %112 = arith.addf %111, %106 : vector<1x128xf32>
    %113 = vector.extract_strided_slice %109 {offsets = [0, 0], sizes = [1, 96], strides = [1, 1]} : vector<1x128xf32> to vector<1x96xf32>
    %114 = arith.negf %113 : vector<1x96xf32>
    %115 = math.exp %114 : vector<1x96xf32>
    %cst_40 = arith.constant 1.000000e+00 : f32
    %116 = vector.broadcast %cst_40 : f32 to vector<1x96xf32>
    %117 = arith.addf %116, %115 : vector<1x96xf32>
    %118 = arith.divf %116, %117 : vector<1x96xf32>
    %119 = vector.extract_strided_slice %109 {offsets = [0, 96], sizes = [1, 32], strides = [1, 1]} : vector<1x128xf32> to vector<1x32xf32>
    %120 = math.tanh %119 : vector<1x32xf32>
    %121 = vector.extract_strided_slice %112 {offsets = [0, 0], sizes = [1, 96], strides = [1, 1]} : vector<1x128xf32> to vector<1x96xf32>
    %122 = arith.negf %121 : vector<1x96xf32>
    %123 = math.exp %122 : vector<1x96xf32>
    %cst_41 = arith.constant 1.000000e+00 : f32
    %124 = vector.broadcast %cst_41 : f32 to vector<1x96xf32>
    %125 = arith.addf %124, %123 : vector<1x96xf32>
    %126 = arith.divf %124, %125 : vector<1x96xf32>
    %127 = vector.extract_strided_slice %112 {offsets = [0, 96], sizes = [1, 32], strides = [1, 1]} : vector<1x128xf32> to vector<1x32xf32>
    %128 = math.tanh %127 : vector<1x32xf32>
    %129 = vector.extract_strided_slice %118 {offsets = [0, 32], sizes = [1, 32], strides = [1, 1]} : vector<1x96xf32> to vector<1x32xf32>
    %130 = arith.mulf %129, %86 : vector<1x32xf32>
    %131 = vector.extract_strided_slice %118 {offsets = [0, 0], sizes = [1, 32], strides = [1, 1]} : vector<1x96xf32> to vector<1x32xf32>
    %132 = arith.mulf %131, %120 : vector<1x32xf32>
    %133 = arith.addf %130, %132 : vector<1x32xf32>
    %134 = vector.extract_strided_slice %118 {offsets = [0, 64], sizes = [1, 32], strides = [1, 1]} : vector<1x96xf32> to vector<1x32xf32>
    %135 = math.tanh %133 : vector<1x32xf32>
    %136 = arith.mulf %134, %135 : vector<1x32xf32>
    %137 = vector.extract_strided_slice %126 {offsets = [0, 32], sizes = [1, 32], strides = [1, 1]} : vector<1x96xf32> to vector<1x32xf32>
    %138 = arith.mulf %137, %94 : vector<1x32xf32>
    %139 = vector.extract_strided_slice %126 {offsets = [0, 0], sizes = [1, 32], strides = [1, 1]} : vector<1x96xf32> to vector<1x32xf32>
    %140 = arith.mulf %139, %128 : vector<1x32xf32>
    %141 = arith.addf %138, %140 : vector<1x32xf32>
    %142 = vector.extract_strided_slice %126 {offsets = [0, 64], sizes = [1, 32], strides = [1, 1]} : vector<1x96xf32> to vector<1x32xf32>
    %143 = math.tanh %141 : vector<1x32xf32>
    %144 = arith.mulf %142, %143 : vector<1x32xf32>
    %145 = arith.index_cast %c2_i32 : i32 to index
    %c0_42 = arith.constant 0 : index
    %146 = vector.load %arg13[%145, %c0_42] : memref<8x64xf32, #tpu.memory_space<vmem>>, vector<1x32xf32>
    tpu.vector_store %arg13[%145, %c0_42], %136 {strides = array<i32>} : memref<8x64xf32, #tpu.memory_space<vmem>>, vector<1x32xf32>,
    %147 = arith.index_cast %102 : i32 to index
    %c32_43 = arith.constant 32 : index
    %148 = vector.load %arg13[%147, %c32_43] : memref<8x64xf32, #tpu.memory_space<vmem>>, vector<1x32xf32>
    tpu.vector_store %arg13[%147, %c32_43], %144 {strides = array<i32>} : memref<8x64xf32, #tpu.memory_space<vmem>>, vector<1x32xf32>,
    %c3_i32 = arith.constant 3 : i32
    %c7_i32_44 = arith.constant 7 : i32
    %149 = arith.subi %c7_i32_44, %c3_i32 : i32
    %c0_45 = arith.constant 0 : index
    %c0_46 = arith.constant 0 : index
    %150 = vector.load %arg2[%c0_45, %c0_46] : memref<32x128xf32, #tpu.memory_space<vmem>>, vector<32x128xf32>
    %cst_47 = arith.constant dense<0.000000e+00> : vector<1x128xf32>
    %151 = tpu.matmul %136, %150, %cst_47 {dimension_numbers = #tpu.dot_dimension_numbers<[1], [0], [0], [1], [0, 0, 1, 1], [], []>} : vector<1x32xf32>, vector<32x128xf32>, vector<1x128xf32> -> vector<1x128xf32>
    %c0_48 = arith.constant 0 : index
    %c0_49 = arith.constant 0 : index
    %152 = vector.load %arg3[%c0_48, %c0_49] : memref<32x128xf32, #tpu.memory_space<vmem>>, vector<32x128xf32>
    %cst_50 = arith.constant dense<0.000000e+00> : vector<1x128xf32>
    %153 = tpu.matmul %144, %152, %cst_50 {dimension_numbers = #tpu.dot_dimension_numbers<[1], [0], [0], [1], [0, 0, 1, 1], [], []>} : vector<1x32xf32>, vector<32x128xf32>, vector<1x128xf32> -> vector<1x128xf32>
    %154 = arith.index_cast %c3_i32 : i32 to index
    %c0_51 = arith.constant 0 : index
    %155 = vector.load %arg12[%154, %c0_51] : memref<8x256xf32, #tpu.memory_space<vmem>>, vector<1x128xf32>
    %156 = arith.addf %155, %151 : vector<1x128xf32>
    %157 = arith.index_cast %149 : i32 to index
    %c128_52 = arith.constant 128 : index
    %158 = vector.load %arg12[%157, %c128_52] : memref<8x256xf32, #tpu.memory_space<vmem>>, vector<1x128xf32>
    %159 = arith.addf %158, %153 : vector<1x128xf32>
    %160 = vector.extract_strided_slice %156 {offsets = [0, 0], sizes = [1, 96], strides = [1, 1]} : vector<1x128xf32> to vector<1x96xf32>
    %161 = arith.negf %160 : vector<1x96xf32>
    %162 = math.exp %161 : vector<1x96xf32>
    %cst_53 = arith.constant 1.000000e+00 : f32
    %163 = vector.broadcast %cst_53 : f32 to vector<1x96xf32>
    %164 = arith.addf %163, %162 : vector<1x96xf32>
    %165 = arith.divf %163, %164 : vector<1x96xf32>
    %166 = vector.extract_strided_slice %156 {offsets = [0, 96], sizes = [1, 32], strides = [1, 1]} : vector<1x128xf32> to vector<1x32xf32>
    %167 = math.tanh %166 : vector<1x32xf32>
    %168 = vector.extract_strided_slice %159 {offsets = [0, 0], sizes = [1, 96], strides = [1, 1]} : vector<1x128xf32> to vector<1x96xf32>
    %169 = arith.negf %168 : vector<1x96xf32>
    %170 = math.exp %169 : vector<1x96xf32>
    %cst_54 = arith.constant 1.000000e+00 : f32
    %171 = vector.broadcast %cst_54 : f32 to vector<1x96xf32>
    %172 = arith.addf %171, %170 : vector<1x96xf32>
    %173 = arith.divf %171, %172 : vector<1x96xf32>
    %174 = vector.extract_strided_slice %159 {offsets = [0, 96], sizes = [1, 32], strides = [1, 1]} : vector<1x128xf32> to vector<1x32xf32>
    %175 = math.tanh %174 : vector<1x32xf32>
    %176 = vector.extract_strided_slice %165 {offsets = [0, 32], sizes = [1, 32], strides = [1, 1]} : vector<1x96xf32> to vector<1x32xf32>
    %177 = arith.mulf %176, %133 : vector<1x32xf32>
    %178 = vector.extract_strided_slice %165 {offsets = [0, 0], sizes = [1, 32], strides = [1, 1]} : vector<1x96xf32> to vector<1x32xf32>
    %179 = arith.mulf %178, %167 : vector<1x32xf32>
    %180 = arith.addf %177, %179 : vector<1x32xf32>
    %181 = vector.extract_strided_slice %165 {offsets = [0, 64], sizes = [1, 32], strides = [1, 1]} : vector<1x96xf32> to vector<1x32xf32>
    %182 = math.tanh %180 : vector<1x32xf32>
    %183 = arith.mulf %181, %182 : vector<1x32xf32>
    %184 = vector.extract_strided_slice %173 {offsets = [0, 32], sizes = [1, 32], strides = [1, 1]} : vector<1x96xf32> to vector<1x32xf32>
    %185 = arith.mulf %184, %141 : vector<1x32xf32>
    %186 = vector.extract_strided_slice %173 {offsets = [0, 0], sizes = [1, 32], strides = [1, 1]} : vector<1x96xf32> to vector<1x32xf32>
    %187 = arith.mulf %186, %175 : vector<1x32xf32>
    %188 = arith.addf %185, %187 : vector<1x32xf32>
    %189 = vector.extract_strided_slice %173 {offsets = [0, 64], sizes = [1, 32], strides = [1, 1]} : vector<1x96xf32> to vector<1x32xf32>
    %190 = math.tanh %188 : vector<1x32xf32>
    %191 = arith.mulf %189, %190 : vector<1x32xf32>
    %192 = arith.index_cast %c3_i32 : i32 to index
    %c0_55 = arith.constant 0 : index
    %193 = vector.load %arg13[%192, %c0_55] : memref<8x64xf32, #tpu.memory_space<vmem>>, vector<1x32xf32>
    tpu.vector_store %arg13[%192, %c0_55], %183 {strides = array<i32>} : memref<8x64xf32, #tpu.memory_space<vmem>>, vector<1x32xf32>,
    %194 = arith.index_cast %149 : i32 to index
    %c32_56 = arith.constant 32 : index
    %195 = vector.load %arg13[%194, %c32_56] : memref<8x64xf32, #tpu.memory_space<vmem>>, vector<1x32xf32>
    tpu.vector_store %arg13[%194, %c32_56], %191 {strides = array<i32>} : memref<8x64xf32, #tpu.memory_space<vmem>>, vector<1x32xf32>,
    %c4_i32 = arith.constant 4 : i32
    %c7_i32_57 = arith.constant 7 : i32
    %196 = arith.subi %c7_i32_57, %c4_i32 : i32
    %c0_58 = arith.constant 0 : index
    %c0_59 = arith.constant 0 : index
    %197 = vector.load %arg2[%c0_58, %c0_59] : memref<32x128xf32, #tpu.memory_space<vmem>>, vector<32x128xf32>
    %cst_60 = arith.constant dense<0.000000e+00> : vector<1x128xf32>
    %198 = tpu.matmul %183, %197, %cst_60 {dimension_numbers = #tpu.dot_dimension_numbers<[1], [0], [0], [1], [0, 0, 1, 1], [], []>} : vector<1x32xf32>, vector<32x128xf32>, vector<1x128xf32> -> vector<1x128xf32>
    %c0_61 = arith.constant 0 : index
    %c0_62 = arith.constant 0 : index
    %199 = vector.load %arg3[%c0_61, %c0_62] : memref<32x128xf32, #tpu.memory_space<vmem>>, vector<32x128xf32>
    %cst_63 = arith.constant dense<0.000000e+00> : vector<1x128xf32>
    %200 = tpu.matmul %191, %199, %cst_63 {dimension_numbers = #tpu.dot_dimension_numbers<[1], [0], [0], [1], [0, 0, 1, 1], [], []>} : vector<1x32xf32>, vector<32x128xf32>, vector<1x128xf32> -> vector<1x128xf32>
    %201 = arith.index_cast %c4_i32 : i32 to index
    %c0_64 = arith.constant 0 : index
    %202 = vector.load %arg12[%201, %c0_64] : memref<8x256xf32, #tpu.memory_space<vmem>>, vector<1x128xf32>
    %203 = arith.addf %202, %198 : vector<1x128xf32>
    %204 = arith.index_cast %196 : i32 to index
    %c128_65 = arith.constant 128 : index
    %205 = vector.load %arg12[%204, %c128_65] : memref<8x256xf32, #tpu.memory_space<vmem>>, vector<1x128xf32>
    %206 = arith.addf %205, %200 : vector<1x128xf32>
    %207 = vector.extract_strided_slice %203 {offsets = [0, 0], sizes = [1, 96], strides = [1, 1]} : vector<1x128xf32> to vector<1x96xf32>
    %208 = arith.negf %207 : vector<1x96xf32>
    %209 = math.exp %208 : vector<1x96xf32>
    %cst_66 = arith.constant 1.000000e+00 : f32
    %210 = vector.broadcast %cst_66 : f32 to vector<1x96xf32>
    %211 = arith.addf %210, %209 : vector<1x96xf32>
    %212 = arith.divf %210, %211 : vector<1x96xf32>
    %213 = vector.extract_strided_slice %203 {offsets = [0, 96], sizes = [1, 32], strides = [1, 1]} : vector<1x128xf32> to vector<1x32xf32>
    %214 = math.tanh %213 : vector<1x32xf32>
    %215 = vector.extract_strided_slice %206 {offsets = [0, 0], sizes = [1, 96], strides = [1, 1]} : vector<1x128xf32> to vector<1x96xf32>
    %216 = arith.negf %215 : vector<1x96xf32>
    %217 = math.exp %216 : vector<1x96xf32>
    %cst_67 = arith.constant 1.000000e+00 : f32
    %218 = vector.broadcast %cst_67 : f32 to vector<1x96xf32>
    %219 = arith.addf %218, %217 : vector<1x96xf32>
    %220 = arith.divf %218, %219 : vector<1x96xf32>
    %221 = vector.extract_strided_slice %206 {offsets = [0, 96], sizes = [1, 32], strides = [1, 1]} : vector<1x128xf32> to vector<1x32xf32>
    %222 = math.tanh %221 : vector<1x32xf32>
    %223 = vector.extract_strided_slice %212 {offsets = [0, 32], sizes = [1, 32], strides = [1, 1]} : vector<1x96xf32> to vector<1x32xf32>
    %224 = arith.mulf %223, %180 : vector<1x32xf32>
    %225 = vector.extract_strided_slice %212 {offsets = [0, 0], sizes = [1, 32], strides = [1, 1]} : vector<1x96xf32> to vector<1x32xf32>
    %226 = arith.mulf %225, %214 : vector<1x32xf32>
    %227 = arith.addf %224, %226 : vector<1x32xf32>
    %228 = vector.extract_strided_slice %212 {offsets = [0, 64], sizes = [1, 32], strides = [1, 1]} : vector<1x96xf32> to vector<1x32xf32>
    %229 = math.tanh %227 : vector<1x32xf32>
    %230 = arith.mulf %228, %229 : vector<1x32xf32>
    %231 = vector.extract_strided_slice %220 {offsets = [0, 32], sizes = [1, 32], strides = [1, 1]} : vector<1x96xf32> to vector<1x32xf32>
    %232 = arith.mulf %231, %188 : vector<1x32xf32>
    %233 = vector.extract_strided_slice %220 {offsets = [0, 0], sizes = [1, 32], strides = [1, 1]} : vector<1x96xf32> to vector<1x32xf32>
    %234 = arith.mulf %233, %222 : vector<1x32xf32>
    %235 = arith.addf %232, %234 : vector<1x32xf32>
    %236 = vector.extract_strided_slice %220 {offsets = [0, 64], sizes = [1, 32], strides = [1, 1]} : vector<1x96xf32> to vector<1x32xf32>
    %237 = math.tanh %235 : vector<1x32xf32>
    %238 = arith.mulf %236, %237 : vector<1x32xf32>
    %239 = arith.index_cast %c4_i32 : i32 to index
    %c0_68 = arith.constant 0 : index
    %240 = vector.load %arg13[%239, %c0_68] : memref<8x64xf32, #tpu.memory_space<vmem>>, vector<1x32xf32>
    tpu.vector_store %arg13[%239, %c0_68], %230 {strides = array<i32>} : memref<8x64xf32, #tpu.memory_space<vmem>>, vector<1x32xf32>,
    %241 = arith.index_cast %196 : i32 to index
    %c32_69 = arith.constant 32 : index
    %242 = vector.load %arg13[%241, %c32_69] : memref<8x64xf32, #tpu.memory_space<vmem>>, vector<1x32xf32>
    tpu.vector_store %arg13[%241, %c32_69], %238 {strides = array<i32>} : memref<8x64xf32, #tpu.memory_space<vmem>>, vector<1x32xf32>,
    %c5_i32 = arith.constant 5 : i32
    %c7_i32_70 = arith.constant 7 : i32
    %243 = arith.subi %c7_i32_70, %c5_i32 : i32
    %c0_71 = arith.constant 0 : index
    %c0_72 = arith.constant 0 : index
    %244 = vector.load %arg2[%c0_71, %c0_72] : memref<32x128xf32, #tpu.memory_space<vmem>>, vector<32x128xf32>
    %cst_73 = arith.constant dense<0.000000e+00> : vector<1x128xf32>
    %245 = tpu.matmul %230, %244, %cst_73 {dimension_numbers = #tpu.dot_dimension_numbers<[1], [0], [0], [1], [0, 0, 1, 1], [], []>} : vector<1x32xf32>, vector<32x128xf32>, vector<1x128xf32> -> vector<1x128xf32>
    %c0_74 = arith.constant 0 : index
    %c0_75 = arith.constant 0 : index
    %246 = vector.load %arg3[%c0_74, %c0_75] : memref<32x128xf32, #tpu.memory_space<vmem>>, vector<32x128xf32>
    %cst_76 = arith.constant dense<0.000000e+00> : vector<1x128xf32>
    %247 = tpu.matmul %238, %246, %cst_76 {dimension_numbers = #tpu.dot_dimension_numbers<[1], [0], [0], [1], [0, 0, 1, 1], [], []>} : vector<1x32xf32>, vector<32x128xf32>, vector<1x128xf32> -> vector<1x128xf32>
    %248 = arith.index_cast %c5_i32 : i32 to index
    %c0_77 = arith.constant 0 : index
    %249 = vector.load %arg12[%248, %c0_77] : memref<8x256xf32, #tpu.memory_space<vmem>>, vector<1x128xf32>
    %250 = arith.addf %249, %245 : vector<1x128xf32>
    %251 = arith.index_cast %243 : i32 to index
    %c128_78 = arith.constant 128 : index
    %252 = vector.load %arg12[%251, %c128_78] : memref<8x256xf32, #tpu.memory_space<vmem>>, vector<1x128xf32>
    %253 = arith.addf %252, %247 : vector<1x128xf32>
    %254 = vector.extract_strided_slice %250 {offsets = [0, 0], sizes = [1, 96], strides = [1, 1]} : vector<1x128xf32> to vector<1x96xf32>
    %255 = arith.negf %254 : vector<1x96xf32>
    %256 = math.exp %255 : vector<1x96xf32>
    %cst_79 = arith.constant 1.000000e+00 : f32
    %257 = vector.broadcast %cst_79 : f32 to vector<1x96xf32>
    %258 = arith.addf %257, %256 : vector<1x96xf32>
    %259 = arith.divf %257, %258 : vector<1x96xf32>
    %260 = vector.extract_strided_slice %250 {offsets = [0, 96], sizes = [1, 32], strides = [1, 1]} : vector<1x128xf32> to vector<1x32xf32>
    %261 = math.tanh %260 : vector<1x32xf32>
    %262 = vector.extract_strided_slice %253 {offsets = [0, 0], sizes = [1, 96], strides = [1, 1]} : vector<1x128xf32> to vector<1x96xf32>
    %263 = arith.negf %262 : vector<1x96xf32>
    %264 = math.exp %263 : vector<1x96xf32>
    %cst_80 = arith.constant 1.000000e+00 : f32
    %265 = vector.broadcast %cst_80 : f32 to vector<1x96xf32>
    %266 = arith.addf %265, %264 : vector<1x96xf32>
    %267 = arith.divf %265, %266 : vector<1x96xf32>
    %268 = vector.extract_strided_slice %253 {offsets = [0, 96], sizes = [1, 32], strides = [1, 1]} : vector<1x128xf32> to vector<1x32xf32>
    %269 = math.tanh %268 : vector<1x32xf32>
    %270 = vector.extract_strided_slice %259 {offsets = [0, 32], sizes = [1, 32], strides = [1, 1]} : vector<1x96xf32> to vector<1x32xf32>
    %271 = arith.mulf %270, %227 : vector<1x32xf32>
    %272 = vector.extract_strided_slice %259 {offsets = [0, 0], sizes = [1, 32], strides = [1, 1]} : vector<1x96xf32> to vector<1x32xf32>
    %273 = arith.mulf %272, %261 : vector<1x32xf32>
    %274 = arith.addf %271, %273 : vector<1x32xf32>
    %275 = vector.extract_strided_slice %259 {offsets = [0, 64], sizes = [1, 32], strides = [1, 1]} : vector<1x96xf32> to vector<1x32xf32>
    %276 = math.tanh %274 : vector<1x32xf32>
    %277 = arith.mulf %275, %276 : vector<1x32xf32>
    %278 = vector.extract_strided_slice %267 {offsets = [0, 32], sizes = [1, 32], strides = [1, 1]} : vector<1x96xf32> to vector<1x32xf32>
    %279 = arith.mulf %278, %235 : vector<1x32xf32>
    %280 = vector.extract_strided_slice %267 {offsets = [0, 0], sizes = [1, 32], strides = [1, 1]} : vector<1x96xf32> to vector<1x32xf32>
    %281 = arith.mulf %280, %269 : vector<1x32xf32>
    %282 = arith.addf %279, %281 : vector<1x32xf32>
    %283 = vector.extract_strided_slice %267 {offsets = [0, 64], sizes = [1, 32], strides = [1, 1]} : vector<1x96xf32> to vector<1x32xf32>
    %284 = math.tanh %282 : vector<1x32xf32>
    %285 = arith.mulf %283, %284 : vector<1x32xf32>
    %286 = arith.index_cast %c5_i32 : i32 to index
    %c0_81 = arith.constant 0 : index
    %287 = vector.load %arg13[%286, %c0_81] : memref<8x64xf32, #tpu.memory_space<vmem>>, vector<1x32xf32>
    tpu.vector_store %arg13[%286, %c0_81], %277 {strides = array<i32>} : memref<8x64xf32, #tpu.memory_space<vmem>>, vector<1x32xf32>,
    %288 = arith.index_cast %243 : i32 to index
    %c32_82 = arith.constant 32 : index
    %289 = vector.load %arg13[%288, %c32_82] : memref<8x64xf32, #tpu.memory_space<vmem>>, vector<1x32xf32>
    tpu.vector_store %arg13[%288, %c32_82], %285 {strides = array<i32>} : memref<8x64xf32, #tpu.memory_space<vmem>>, vector<1x32xf32>,
    %c6_i32 = arith.constant 6 : i32
    %c7_i32_83 = arith.constant 7 : i32
    %290 = arith.subi %c7_i32_83, %c6_i32 : i32
    %c0_84 = arith.constant 0 : index
    %c0_85 = arith.constant 0 : index
    %291 = vector.load %arg2[%c0_84, %c0_85] : memref<32x128xf32, #tpu.memory_space<vmem>>, vector<32x128xf32>
    %cst_86 = arith.constant dense<0.000000e+00> : vector<1x128xf32>
    %292 = tpu.matmul %277, %291, %cst_86 {dimension_numbers = #tpu.dot_dimension_numbers<[1], [0], [0], [1], [0, 0, 1, 1], [], []>} : vector<1x32xf32>, vector<32x128xf32>, vector<1x128xf32> -> vector<1x128xf32>
    %c0_87 = arith.constant 0 : index
    %c0_88 = arith.constant 0 : index
    %293 = vector.load %arg3[%c0_87, %c0_88] : memref<32x128xf32, #tpu.memory_space<vmem>>, vector<32x128xf32>
    %cst_89 = arith.constant dense<0.000000e+00> : vector<1x128xf32>
    %294 = tpu.matmul %285, %293, %cst_89 {dimension_numbers = #tpu.dot_dimension_numbers<[1], [0], [0], [1], [0, 0, 1, 1], [], []>} : vector<1x32xf32>, vector<32x128xf32>, vector<1x128xf32> -> vector<1x128xf32>
    %295 = arith.index_cast %c6_i32 : i32 to index
    %c0_90 = arith.constant 0 : index
    %296 = vector.load %arg12[%295, %c0_90] : memref<8x256xf32, #tpu.memory_space<vmem>>, vector<1x128xf32>
    %297 = arith.addf %296, %292 : vector<1x128xf32>
    %298 = arith.index_cast %290 : i32 to index
    %c128_91 = arith.constant 128 : index
    %299 = vector.load %arg12[%298, %c128_91] : memref<8x256xf32, #tpu.memory_space<vmem>>, vector<1x128xf32>
    %300 = arith.addf %299, %294 : vector<1x128xf32>
    %301 = vector.extract_strided_slice %297 {offsets = [0, 0], sizes = [1, 96], strides = [1, 1]} : vector<1x128xf32> to vector<1x96xf32>
    %302 = arith.negf %301 : vector<1x96xf32>
    %303 = math.exp %302 : vector<1x96xf32>
    %cst_92 = arith.constant 1.000000e+00 : f32
    %304 = vector.broadcast %cst_92 : f32 to vector<1x96xf32>
    %305 = arith.addf %304, %303 : vector<1x96xf32>
    %306 = arith.divf %304, %305 : vector<1x96xf32>
    %307 = vector.extract_strided_slice %297 {offsets = [0, 96], sizes = [1, 32], strides = [1, 1]} : vector<1x128xf32> to vector<1x32xf32>
    %308 = math.tanh %307 : vector<1x32xf32>
    %309 = vector.extract_strided_slice %300 {offsets = [0, 0], sizes = [1, 96], strides = [1, 1]} : vector<1x128xf32> to vector<1x96xf32>
    %310 = arith.negf %309 : vector<1x96xf32>
    %311 = math.exp %310 : vector<1x96xf32>
    %cst_93 = arith.constant 1.000000e+00 : f32
    %312 = vector.broadcast %cst_93 : f32 to vector<1x96xf32>
    %313 = arith.addf %312, %311 : vector<1x96xf32>
    %314 = arith.divf %312, %313 : vector<1x96xf32>
    %315 = vector.extract_strided_slice %300 {offsets = [0, 96], sizes = [1, 32], strides = [1, 1]} : vector<1x128xf32> to vector<1x32xf32>
    %316 = math.tanh %315 : vector<1x32xf32>
    %317 = vector.extract_strided_slice %306 {offsets = [0, 32], sizes = [1, 32], strides = [1, 1]} : vector<1x96xf32> to vector<1x32xf32>
    %318 = arith.mulf %317, %274 : vector<1x32xf32>
    %319 = vector.extract_strided_slice %306 {offsets = [0, 0], sizes = [1, 32], strides = [1, 1]} : vector<1x96xf32> to vector<1x32xf32>
    %320 = arith.mulf %319, %308 : vector<1x32xf32>
    %321 = arith.addf %318, %320 : vector<1x32xf32>
    %322 = vector.extract_strided_slice %306 {offsets = [0, 64], sizes = [1, 32], strides = [1, 1]} : vector<1x96xf32> to vector<1x32xf32>
    %323 = math.tanh %321 : vector<1x32xf32>
    %324 = arith.mulf %322, %323 : vector<1x32xf32>
    %325 = vector.extract_strided_slice %314 {offsets = [0, 32], sizes = [1, 32], strides = [1, 1]} : vector<1x96xf32> to vector<1x32xf32>
    %326 = arith.mulf %325, %282 : vector<1x32xf32>
    %327 = vector.extract_strided_slice %314 {offsets = [0, 0], sizes = [1, 32], strides = [1, 1]} : vector<1x96xf32> to vector<1x32xf32>
    %328 = arith.mulf %327, %316 : vector<1x32xf32>
    %329 = arith.addf %326, %328 : vector<1x32xf32>
    %330 = vector.extract_strided_slice %314 {offsets = [0, 64], sizes = [1, 32], strides = [1, 1]} : vector<1x96xf32> to vector<1x32xf32>
    %331 = math.tanh %329 : vector<1x32xf32>
    %332 = arith.mulf %330, %331 : vector<1x32xf32>
    %333 = arith.index_cast %c6_i32 : i32 to index
    %c0_94 = arith.constant 0 : index
    %334 = vector.load %arg13[%333, %c0_94] : memref<8x64xf32, #tpu.memory_space<vmem>>, vector<1x32xf32>
    tpu.vector_store %arg13[%333, %c0_94], %324 {strides = array<i32>} : memref<8x64xf32, #tpu.memory_space<vmem>>, vector<1x32xf32>,
    %335 = arith.index_cast %290 : i32 to index
    %c32_95 = arith.constant 32 : index
    %336 = vector.load %arg13[%335, %c32_95] : memref<8x64xf32, #tpu.memory_space<vmem>>, vector<1x32xf32>
    tpu.vector_store %arg13[%335, %c32_95], %332 {strides = array<i32>} : memref<8x64xf32, #tpu.memory_space<vmem>>, vector<1x32xf32>,
    %c7_i32_96 = arith.constant 7 : i32
    %c7_i32_97 = arith.constant 7 : i32
    %337 = arith.subi %c7_i32_97, %c7_i32_96 : i32
    %c0_98 = arith.constant 0 : index
    %c0_99 = arith.constant 0 : index
    %338 = vector.load %arg2[%c0_98, %c0_99] : memref<32x128xf32, #tpu.memory_space<vmem>>, vector<32x128xf32>
    %cst_100 = arith.constant dense<0.000000e+00> : vector<1x128xf32>
    %339 = tpu.matmul %324, %338, %cst_100 {dimension_numbers = #tpu.dot_dimension_numbers<[1], [0], [0], [1], [0, 0, 1, 1], [], []>} : vector<1x32xf32>, vector<32x128xf32>, vector<1x128xf32> -> vector<1x128xf32>
    %c0_101 = arith.constant 0 : index
    %c0_102 = arith.constant 0 : index
    %340 = vector.load %arg3[%c0_101, %c0_102] : memref<32x128xf32, #tpu.memory_space<vmem>>, vector<32x128xf32>
    %cst_103 = arith.constant dense<0.000000e+00> : vector<1x128xf32>
    %341 = tpu.matmul %332, %340, %cst_103 {dimension_numbers = #tpu.dot_dimension_numbers<[1], [0], [0], [1], [0, 0, 1, 1], [], []>} : vector<1x32xf32>, vector<32x128xf32>, vector<1x128xf32> -> vector<1x128xf32>
    %342 = arith.index_cast %c7_i32_96 : i32 to index
    %c0_104 = arith.constant 0 : index
    %343 = vector.load %arg12[%342, %c0_104] : memref<8x256xf32, #tpu.memory_space<vmem>>, vector<1x128xf32>
    %344 = arith.addf %343, %339 : vector<1x128xf32>
    %345 = arith.index_cast %337 : i32 to index
    %c128_105 = arith.constant 128 : index
    %346 = vector.load %arg12[%345, %c128_105] : memref<8x256xf32, #tpu.memory_space<vmem>>, vector<1x128xf32>
    %347 = arith.addf %346, %341 : vector<1x128xf32>
    %348 = vector.extract_strided_slice %344 {offsets = [0, 0], sizes = [1, 96], strides = [1, 1]} : vector<1x128xf32> to vector<1x96xf32>
    %349 = arith.negf %348 : vector<1x96xf32>
    %350 = math.exp %349 : vector<1x96xf32>
    %cst_106 = arith.constant 1.000000e+00 : f32
    %351 = vector.broadcast %cst_106 : f32 to vector<1x96xf32>
    %352 = arith.addf %351, %350 : vector<1x96xf32>
    %353 = arith.divf %351, %352 : vector<1x96xf32>
    %354 = vector.extract_strided_slice %344 {offsets = [0, 96], sizes = [1, 32], strides = [1, 1]} : vector<1x128xf32> to vector<1x32xf32>
    %355 = math.tanh %354 : vector<1x32xf32>
    %356 = vector.extract_strided_slice %347 {offsets = [0, 0], sizes = [1, 96], strides = [1, 1]} : vector<1x128xf32> to vector<1x96xf32>
    %357 = arith.negf %356 : vector<1x96xf32>
    %358 = math.exp %357 : vector<1x96xf32>
    %cst_107 = arith.constant 1.000000e+00 : f32
    %359 = vector.broadcast %cst_107 : f32 to vector<1x96xf32>
    %360 = arith.addf %359, %358 : vector<1x96xf32>
    %361 = arith.divf %359, %360 : vector<1x96xf32>
    %362 = vector.extract_strided_slice %347 {offsets = [0, 96], sizes = [1, 32], strides = [1, 1]} : vector<1x128xf32> to vector<1x32xf32>
    %363 = math.tanh %362 : vector<1x32xf32>
    %364 = vector.extract_strided_slice %353 {offsets = [0, 32], sizes = [1, 32], strides = [1, 1]} : vector<1x96xf32> to vector<1x32xf32>
    %365 = arith.mulf %364, %321 : vector<1x32xf32>
    %366 = vector.extract_strided_slice %353 {offsets = [0, 0], sizes = [1, 32], strides = [1, 1]} : vector<1x96xf32> to vector<1x32xf32>
    %367 = arith.mulf %366, %355 : vector<1x32xf32>
    %368 = arith.addf %365, %367 : vector<1x32xf32>
    %369 = vector.extract_strided_slice %353 {offsets = [0, 64], sizes = [1, 32], strides = [1, 1]} : vector<1x96xf32> to vector<1x32xf32>
    %370 = math.tanh %368 : vector<1x32xf32>
    %371 = arith.mulf %369, %370 : vector<1x32xf32>
    %372 = vector.extract_strided_slice %361 {offsets = [0, 32], sizes = [1, 32], strides = [1, 1]} : vector<1x96xf32> to vector<1x32xf32>
    %373 = arith.mulf %372, %329 : vector<1x32xf32>
    %374 = vector.extract_strided_slice %361 {offsets = [0, 0], sizes = [1, 32], strides = [1, 1]} : vector<1x96xf32> to vector<1x32xf32>
    %375 = arith.mulf %374, %363 : vector<1x32xf32>
    %376 = arith.addf %373, %375 : vector<1x32xf32>
    %377 = vector.extract_strided_slice %361 {offsets = [0, 64], sizes = [1, 32], strides = [1, 1]} : vector<1x96xf32> to vector<1x32xf32>
    %378 = math.tanh %376 : vector<1x32xf32>
    %379 = arith.mulf %377, %378 : vector<1x32xf32>
    %380 = arith.index_cast %c7_i32_96 : i32 to index
    %c0_108 = arith.constant 0 : index
    %381 = vector.load %arg13[%380, %c0_108] : memref<8x64xf32, #tpu.memory_space<vmem>>, vector<1x32xf32>
    tpu.vector_store %arg13[%380, %c0_108], %371 {strides = array<i32>} : memref<8x64xf32, #tpu.memory_space<vmem>>, vector<1x32xf32>,
    %382 = arith.index_cast %337 : i32 to index
    %c32_109 = arith.constant 32 : index
    %383 = vector.load %arg13[%382, %c32_109] : memref<8x64xf32, #tpu.memory_space<vmem>>, vector<1x32xf32>
    tpu.vector_store %arg13[%382, %c32_109], %379 {strides = array<i32>} : memref<8x64xf32, #tpu.memory_space<vmem>>, vector<1x32xf32>,
    %c8_i32 = arith.constant 8 : i32
    %c0_110 = arith.constant 0 : index
    %c0_111 = arith.constant 0 : index
    %384 = vector.load %arg13[%c0_110, %c0_111] : memref<8x64xf32, #tpu.memory_space<vmem>>, vector<8x64xf32>
    %c0_112 = arith.constant 0 : index
    %c0_113 = arith.constant 0 : index
    %385 = vector.load %arg5[%c0_112, %c0_113] : memref<64x256xf32, #tpu.memory_space<vmem>>, vector<64x256xf32>
    %cst_114 = arith.constant dense<0.000000e+00> : vector<8x256xf32>
    %386 = tpu.matmul %384, %385, %cst_114 {dimension_numbers = #tpu.dot_dimension_numbers<[1], [0], [0], [1], [0, 0, 1, 1], [], []>} : vector<8x64xf32>, vector<64x256xf32>, vector<8x256xf32> -> vector<8x256xf32>
    %c0_115 = arith.constant 0 : index
    %c0_116 = arith.constant 0 : index
    %387 = vector.load %arg8[%c0_115, %c0_116] : memref<1x256xf32, #tpu.memory_space<vmem>>, vector<1x256xf32>
    %388 = vector.broadcast %387 : vector<1x256xf32> to vector<8x256xf32>
    %389 = arith.addf %386, %388 : vector<8x256xf32>
    %c0_117 = arith.constant 0 : index
    %c0_118 = arith.constant 0 : index
    %390 = vector.load %arg12[%c0_117, %c0_118] : memref<8x256xf32, #tpu.memory_space<vmem>>, vector<8x256xf32>
    tpu.vector_store %arg12[%c0_117, %c0_118], %389 {strides = array<i32>} : memref<8x256xf32, #tpu.memory_space<vmem>>, vector<8x256xf32>,
    %cst_119 = arith.constant 0.000000e+00 : f32
    %391 = vector.broadcast %cst_119 : f32 to vector<1x32xf32>
    %c0_i32_120 = arith.constant 0 : i32
    %c7_i32_121 = arith.constant 7 : i32
    %392 = arith.subi %c7_i32_121, %c0_i32_120 : i32
    %c0_122 = arith.constant 0 : index
    %c0_123 = arith.constant 0 : index
    %393 = vector.load %arg6[%c0_122, %c0_123] : memref<32x128xf32, #tpu.memory_space<vmem>>, vector<32x128xf32>
    %cst_124 = arith.constant dense<0.000000e+00> : vector<1x128xf32>
    %394 = tpu.matmul %391, %393, %cst_124 {dimension_numbers = #tpu.dot_dimension_numbers<[1], [0], [0], [1], [0, 0, 1, 1], [], []>} : vector<1x32xf32>, vector<32x128xf32>, vector<1x128xf32> -> vector<1x128xf32>
    %c0_125 = arith.constant 0 : index
    %c0_126 = arith.constant 0 : index
    %395 = vector.load %arg7[%c0_125, %c0_126] : memref<32x128xf32, #tpu.memory_space<vmem>>, vector<32x128xf32>
    %cst_127 = arith.constant dense<0.000000e+00> : vector<1x128xf32>
    %396 = tpu.matmul %391, %395, %cst_127 {dimension_numbers = #tpu.dot_dimension_numbers<[1], [0], [0], [1], [0, 0, 1, 1], [], []>} : vector<1x32xf32>, vector<32x128xf32>, vector<1x128xf32> -> vector<1x128xf32>
    %397 = arith.index_cast %c0_i32_120 : i32 to index
    %c0_128 = arith.constant 0 : index
    %398 = vector.load %arg12[%397, %c0_128] : memref<8x256xf32, #tpu.memory_space<vmem>>, vector<1x128xf32>
    %399 = arith.addf %398, %394 : vector<1x128xf32>
    %400 = arith.index_cast %392 : i32 to index
    %c128_129 = arith.constant 128 : index
    %401 = vector.load %arg12[%400, %c128_129] : memref<8x256xf32, #tpu.memory_space<vmem>>, vector<1x128xf32>
    %402 = arith.addf %401, %396 : vector<1x128xf32>
    %403 = vector.extract_strided_slice %399 {offsets = [0, 0], sizes = [1, 96], strides = [1, 1]} : vector<1x128xf32> to vector<1x96xf32>
    %404 = arith.negf %403 : vector<1x96xf32>
    %405 = math.exp %404 : vector<1x96xf32>
    %cst_130 = arith.constant 1.000000e+00 : f32
    %406 = vector.broadcast %cst_130 : f32 to vector<1x96xf32>
    %407 = arith.addf %406, %405 : vector<1x96xf32>
    %408 = arith.divf %406, %407 : vector<1x96xf32>
    %409 = vector.extract_strided_slice %399 {offsets = [0, 96], sizes = [1, 32], strides = [1, 1]} : vector<1x128xf32> to vector<1x32xf32>
    %410 = math.tanh %409 : vector<1x32xf32>
    %411 = vector.extract_strided_slice %402 {offsets = [0, 0], sizes = [1, 96], strides = [1, 1]} : vector<1x128xf32> to vector<1x96xf32>
    %412 = arith.negf %411 : vector<1x96xf32>
    %413 = math.exp %412 : vector<1x96xf32>
    %cst_131 = arith.constant 1.000000e+00 : f32
    %414 = vector.broadcast %cst_131 : f32 to vector<1x96xf32>
    %415 = arith.addf %414, %413 : vector<1x96xf32>
    %416 = arith.divf %414, %415 : vector<1x96xf32>
    %417 = vector.extract_strided_slice %402 {offsets = [0, 96], sizes = [1, 32], strides = [1, 1]} : vector<1x128xf32> to vector<1x32xf32>
    %418 = math.tanh %417 : vector<1x32xf32>
    %419 = vector.extract_strided_slice %408 {offsets = [0, 32], sizes = [1, 32], strides = [1, 1]} : vector<1x96xf32> to vector<1x32xf32>
    %420 = arith.mulf %419, %391 : vector<1x32xf32>
    %421 = vector.extract_strided_slice %408 {offsets = [0, 0], sizes = [1, 32], strides = [1, 1]} : vector<1x96xf32> to vector<1x32xf32>
    %422 = arith.mulf %421, %410 : vector<1x32xf32>
    %423 = arith.addf %420, %422 : vector<1x32xf32>
    %424 = vector.extract_strided_slice %408 {offsets = [0, 64], sizes = [1, 32], strides = [1, 1]} : vector<1x96xf32> to vector<1x32xf32>
    %425 = math.tanh %423 : vector<1x32xf32>
    %426 = arith.mulf %424, %425 : vector<1x32xf32>
    %427 = vector.extract_strided_slice %416 {offsets = [0, 32], sizes = [1, 32], strides = [1, 1]} : vector<1x96xf32> to vector<1x32xf32>
    %428 = arith.mulf %427, %391 : vector<1x32xf32>
    %429 = vector.extract_strided_slice %416 {offsets = [0, 0], sizes = [1, 32], strides = [1, 1]} : vector<1x96xf32> to vector<1x32xf32>
    %430 = arith.mulf %429, %418 : vector<1x32xf32>
    %431 = arith.addf %428, %430 : vector<1x32xf32>
    %432 = vector.extract_strided_slice %416 {offsets = [0, 64], sizes = [1, 32], strides = [1, 1]} : vector<1x96xf32> to vector<1x32xf32>
    %433 = math.tanh %431 : vector<1x32xf32>
    %434 = arith.mulf %432, %433 : vector<1x32xf32>
    %435 = arith.index_cast %c0_i32_120 : i32 to index
    %c0_132 = arith.constant 0 : index
    %436 = vector.load %arg13[%435, %c0_132] : memref<8x64xf32, #tpu.memory_space<vmem>>, vector<1x32xf32>
    tpu.vector_store %arg13[%435, %c0_132], %426 {strides = array<i32>} : memref<8x64xf32, #tpu.memory_space<vmem>>, vector<1x32xf32>,
    %437 = arith.index_cast %392 : i32 to index
    %c32_133 = arith.constant 32 : index
    %438 = vector.load %arg13[%437, %c32_133] : memref<8x64xf32, #tpu.memory_space<vmem>>, vector<1x32xf32>
    tpu.vector_store %arg13[%437, %c32_133], %434 {strides = array<i32>} : memref<8x64xf32, #tpu.memory_space<vmem>>, vector<1x32xf32>,
    %c1_i32_134 = arith.constant 1 : i32
    %c7_i32_135 = arith.constant 7 : i32
    %439 = arith.subi %c7_i32_135, %c1_i32_134 : i32
    %c0_136 = arith.constant 0 : index
    %c0_137 = arith.constant 0 : index
    %440 = vector.load %arg6[%c0_136, %c0_137] : memref<32x128xf32, #tpu.memory_space<vmem>>, vector<32x128xf32>
    %cst_138 = arith.constant dense<0.000000e+00> : vector<1x128xf32>
    %441 = tpu.matmul %426, %440, %cst_138 {dimension_numbers = #tpu.dot_dimension_numbers<[1], [0], [0], [1], [0, 0, 1, 1], [], []>} : vector<1x32xf32>, vector<32x128xf32>, vector<1x128xf32> -> vector<1x128xf32>
    %c0_139 = arith.constant 0 : index
    %c0_140 = arith.constant 0 : index
    %442 = vector.load %arg7[%c0_139, %c0_140] : memref<32x128xf32, #tpu.memory_space<vmem>>, vector<32x128xf32>
    %cst_141 = arith.constant dense<0.000000e+00> : vector<1x128xf32>
    %443 = tpu.matmul %434, %442, %cst_141 {dimension_numbers = #tpu.dot_dimension_numbers<[1], [0], [0], [1], [0, 0, 1, 1], [], []>} : vector<1x32xf32>, vector<32x128xf32>, vector<1x128xf32> -> vector<1x128xf32>
    %444 = arith.index_cast %c1_i32_134 : i32 to index
    %c0_142 = arith.constant 0 : index
    %445 = vector.load %arg12[%444, %c0_142] : memref<8x256xf32, #tpu.memory_space<vmem>>, vector<1x128xf32>
    %446 = arith.addf %445, %441 : vector<1x128xf32>
    %447 = arith.index_cast %439 : i32 to index
    %c128_143 = arith.constant 128 : index
    %448 = vector.load %arg12[%447, %c128_143] : memref<8x256xf32, #tpu.memory_space<vmem>>, vector<1x128xf32>
    %449 = arith.addf %448, %443 : vector<1x128xf32>
    %450 = vector.extract_strided_slice %446 {offsets = [0, 0], sizes = [1, 96], strides = [1, 1]} : vector<1x128xf32> to vector<1x96xf32>
    %451 = arith.negf %450 : vector<1x96xf32>
    %452 = math.exp %451 : vector<1x96xf32>
    %cst_144 = arith.constant 1.000000e+00 : f32
    %453 = vector.broadcast %cst_144 : f32 to vector<1x96xf32>
    %454 = arith.addf %453, %452 : vector<1x96xf32>
    %455 = arith.divf %453, %454 : vector<1x96xf32>
    %456 = vector.extract_strided_slice %446 {offsets = [0, 96], sizes = [1, 32], strides = [1, 1]} : vector<1x128xf32> to vector<1x32xf32>
    %457 = math.tanh %456 : vector<1x32xf32>
    %458 = vector.extract_strided_slice %449 {offsets = [0, 0], sizes = [1, 96], strides = [1, 1]} : vector<1x128xf32> to vector<1x96xf32>
    %459 = arith.negf %458 : vector<1x96xf32>
    %460 = math.exp %459 : vector<1x96xf32>
    %cst_145 = arith.constant 1.000000e+00 : f32
    %461 = vector.broadcast %cst_145 : f32 to vector<1x96xf32>
    %462 = arith.addf %461, %460 : vector<1x96xf32>
    %463 = arith.divf %461, %462 : vector<1x96xf32>
    %464 = vector.extract_strided_slice %449 {offsets = [0, 96], sizes = [1, 32], strides = [1, 1]} : vector<1x128xf32> to vector<1x32xf32>
    %465 = math.tanh %464 : vector<1x32xf32>
    %466 = vector.extract_strided_slice %455 {offsets = [0, 32], sizes = [1, 32], strides = [1, 1]} : vector<1x96xf32> to vector<1x32xf32>
    %467 = arith.mulf %466, %423 : vector<1x32xf32>
    %468 = vector.extract_strided_slice %455 {offsets = [0, 0], sizes = [1, 32], strides = [1, 1]} : vector<1x96xf32> to vector<1x32xf32>
    %469 = arith.mulf %468, %457 : vector<1x32xf32>
    %470 = arith.addf %467, %469 : vector<1x32xf32>
    %471 = vector.extract_strided_slice %455 {offsets = [0, 64], sizes = [1, 32], strides = [1, 1]} : vector<1x96xf32> to vector<1x32xf32>
    %472 = math.tanh %470 : vector<1x32xf32>
    %473 = arith.mulf %471, %472 : vector<1x32xf32>
    %474 = vector.extract_strided_slice %463 {offsets = [0, 32], sizes = [1, 32], strides = [1, 1]} : vector<1x96xf32> to vector<1x32xf32>
    %475 = arith.mulf %474, %431 : vector<1x32xf32>
    %476 = vector.extract_strided_slice %463 {offsets = [0, 0], sizes = [1, 32], strides = [1, 1]} : vector<1x96xf32> to vector<1x32xf32>
    %477 = arith.mulf %476, %465 : vector<1x32xf32>
    %478 = arith.addf %475, %477 : vector<1x32xf32>
    %479 = vector.extract_strided_slice %463 {offsets = [0, 64], sizes = [1, 32], strides = [1, 1]} : vector<1x96xf32> to vector<1x32xf32>
    %480 = math.tanh %478 : vector<1x32xf32>
    %481 = arith.mulf %479, %480 : vector<1x32xf32>
    %482 = arith.index_cast %c1_i32_134 : i32 to index
    %c0_146 = arith.constant 0 : index
    %483 = vector.load %arg13[%482, %c0_146] : memref<8x64xf32, #tpu.memory_space<vmem>>, vector<1x32xf32>
    tpu.vector_store %arg13[%482, %c0_146], %473 {strides = array<i32>} : memref<8x64xf32, #tpu.memory_space<vmem>>, vector<1x32xf32>,
    %484 = arith.index_cast %439 : i32 to index
    %c32_147 = arith.constant 32 : index
    %485 = vector.load %arg13[%484, %c32_147] : memref<8x64xf32, #tpu.memory_space<vmem>>, vector<1x32xf32>
    tpu.vector_store %arg13[%484, %c32_147], %481 {strides = array<i32>} : memref<8x64xf32, #tpu.memory_space<vmem>>, vector<1x32xf32>,
    %c2_i32_148 = arith.constant 2 : i32
    %c7_i32_149 = arith.constant 7 : i32
    %486 = arith.subi %c7_i32_149, %c2_i32_148 : i32
    %c0_150 = arith.constant 0 : index
    %c0_151 = arith.constant 0 : index
    %487 = vector.load %arg6[%c0_150, %c0_151] : memref<32x128xf32, #tpu.memory_space<vmem>>, vector<32x128xf32>
    %cst_152 = arith.constant dense<0.000000e+00> : vector<1x128xf32>
    %488 = tpu.matmul %473, %487, %cst_152 {dimension_numbers = #tpu.dot_dimension_numbers<[1], [0], [0], [1], [0, 0, 1, 1], [], []>} : vector<1x32xf32>, vector<32x128xf32>, vector<1x128xf32> -> vector<1x128xf32>
    %c0_153 = arith.constant 0 : index
    %c0_154 = arith.constant 0 : index
    %489 = vector.load %arg7[%c0_153, %c0_154] : memref<32x128xf32, #tpu.memory_space<vmem>>, vector<32x128xf32>
    %cst_155 = arith.constant dense<0.000000e+00> : vector<1x128xf32>
    %490 = tpu.matmul %481, %489, %cst_155 {dimension_numbers = #tpu.dot_dimension_numbers<[1], [0], [0], [1], [0, 0, 1, 1], [], []>} : vector<1x32xf32>, vector<32x128xf32>, vector<1x128xf32> -> vector<1x128xf32>
    %491 = arith.index_cast %c2_i32_148 : i32 to index
    %c0_156 = arith.constant 0 : index
    %492 = vector.load %arg12[%491, %c0_156] : memref<8x256xf32, #tpu.memory_space<vmem>>, vector<1x128xf32>
    %493 = arith.addf %492, %488 : vector<1x128xf32>
    %494 = arith.index_cast %486 : i32 to index
    %c128_157 = arith.constant 128 : index
    %495 = vector.load %arg12[%494, %c128_157] : memref<8x256xf32, #tpu.memory_space<vmem>>, vector<1x128xf32>
    %496 = arith.addf %495, %490 : vector<1x128xf32>
    %497 = vector.extract_strided_slice %493 {offsets = [0, 0], sizes = [1, 96], strides = [1, 1]} : vector<1x128xf32> to vector<1x96xf32>
    %498 = arith.negf %497 : vector<1x96xf32>
    %499 = math.exp %498 : vector<1x96xf32>
    %cst_158 = arith.constant 1.000000e+00 : f32
    %500 = vector.broadcast %cst_158 : f32 to vector<1x96xf32>
    %501 = arith.addf %500, %499 : vector<1x96xf32>
    %502 = arith.divf %500, %501 : vector<1x96xf32>
    %503 = vector.extract_strided_slice %493 {offsets = [0, 96], sizes = [1, 32], strides = [1, 1]} : vector<1x128xf32> to vector<1x32xf32>
    %504 = math.tanh %503 : vector<1x32xf32>
    %505 = vector.extract_strided_slice %496 {offsets = [0, 0], sizes = [1, 96], strides = [1, 1]} : vector<1x128xf32> to vector<1x96xf32>
    %506 = arith.negf %505 : vector<1x96xf32>
    %507 = math.exp %506 : vector<1x96xf32>
    %cst_159 = arith.constant 1.000000e+00 : f32
    %508 = vector.broadcast %cst_159 : f32 to vector<1x96xf32>
    %509 = arith.addf %508, %507 : vector<1x96xf32>
    %510 = arith.divf %508, %509 : vector<1x96xf32>
    %511 = vector.extract_strided_slice %496 {offsets = [0, 96], sizes = [1, 32], strides = [1, 1]} : vector<1x128xf32> to vector<1x32xf32>
    %512 = math.tanh %511 : vector<1x32xf32>
    %513 = vector.extract_strided_slice %502 {offsets = [0, 32], sizes = [1, 32], strides = [1, 1]} : vector<1x96xf32> to vector<1x32xf32>
    %514 = arith.mulf %513, %470 : vector<1x32xf32>
    %515 = vector.extract_strided_slice %502 {offsets = [0, 0], sizes = [1, 32], strides = [1, 1]} : vector<1x96xf32> to vector<1x32xf32>
    %516 = arith.mulf %515, %504 : vector<1x32xf32>
    %517 = arith.addf %514, %516 : vector<1x32xf32>
    %518 = vector.extract_strided_slice %502 {offsets = [0, 64], sizes = [1, 32], strides = [1, 1]} : vector<1x96xf32> to vector<1x32xf32>
    %519 = math.tanh %517 : vector<1x32xf32>
    %520 = arith.mulf %518, %519 : vector<1x32xf32>
    %521 = vector.extract_strided_slice %510 {offsets = [0, 32], sizes = [1, 32], strides = [1, 1]} : vector<1x96xf32> to vector<1x32xf32>
    %522 = arith.mulf %521, %478 : vector<1x32xf32>
    %523 = vector.extract_strided_slice %510 {offsets = [0, 0], sizes = [1, 32], strides = [1, 1]} : vector<1x96xf32> to vector<1x32xf32>
    %524 = arith.mulf %523, %512 : vector<1x32xf32>
    %525 = arith.addf %522, %524 : vector<1x32xf32>
    %526 = vector.extract_strided_slice %510 {offsets = [0, 64], sizes = [1, 32], strides = [1, 1]} : vector<1x96xf32> to vector<1x32xf32>
    %527 = math.tanh %525 : vector<1x32xf32>
    %528 = arith.mulf %526, %527 : vector<1x32xf32>
    %529 = arith.index_cast %c2_i32_148 : i32 to index
    %c0_160 = arith.constant 0 : index
    %530 = vector.load %arg13[%529, %c0_160] : memref<8x64xf32, #tpu.memory_space<vmem>>, vector<1x32xf32>
    tpu.vector_store %arg13[%529, %c0_160], %520 {strides = array<i32>} : memref<8x64xf32, #tpu.memory_space<vmem>>, vector<1x32xf32>,
    %531 = arith.index_cast %486 : i32 to index
    %c32_161 = arith.constant 32 : index
    %532 = vector.load %arg13[%531, %c32_161] : memref<8x64xf32, #tpu.memory_space<vmem>>, vector<1x32xf32>
    tpu.vector_store %arg13[%531, %c32_161], %528 {strides = array<i32>} : memref<8x64xf32, #tpu.memory_space<vmem>>, vector<1x32xf32>,
    %c3_i32_162 = arith.constant 3 : i32
    %c7_i32_163 = arith.constant 7 : i32
    %533 = arith.subi %c7_i32_163, %c3_i32_162 : i32
    %c0_164 = arith.constant 0 : index
    %c0_165 = arith.constant 0 : index
    %534 = vector.load %arg6[%c0_164, %c0_165] : memref<32x128xf32, #tpu.memory_space<vmem>>, vector<32x128xf32>
    %cst_166 = arith.constant dense<0.000000e+00> : vector<1x128xf32>
    %535 = tpu.matmul %520, %534, %cst_166 {dimension_numbers = #tpu.dot_dimension_numbers<[1], [0], [0], [1], [0, 0, 1, 1], [], []>} : vector<1x32xf32>, vector<32x128xf32>, vector<1x128xf32> -> vector<1x128xf32>
    %c0_167 = arith.constant 0 : index
    %c0_168 = arith.constant 0 : index
    %536 = vector.load %arg7[%c0_167, %c0_168] : memref<32x128xf32, #tpu.memory_space<vmem>>, vector<32x128xf32>
    %cst_169 = arith.constant dense<0.000000e+00> : vector<1x128xf32>
    %537 = tpu.matmul %528, %536, %cst_169 {dimension_numbers = #tpu.dot_dimension_numbers<[1], [0], [0], [1], [0, 0, 1, 1], [], []>} : vector<1x32xf32>, vector<32x128xf32>, vector<1x128xf32> -> vector<1x128xf32>
    %538 = arith.index_cast %c3_i32_162 : i32 to index
    %c0_170 = arith.constant 0 : index
    %539 = vector.load %arg12[%538, %c0_170] : memref<8x256xf32, #tpu.memory_space<vmem>>, vector<1x128xf32>
    %540 = arith.addf %539, %535 : vector<1x128xf32>
    %541 = arith.index_cast %533 : i32 to index
    %c128_171 = arith.constant 128 : index
    %542 = vector.load %arg12[%541, %c128_171] : memref<8x256xf32, #tpu.memory_space<vmem>>, vector<1x128xf32>
    %543 = arith.addf %542, %537 : vector<1x128xf32>
    %544 = vector.extract_strided_slice %540 {offsets = [0, 0], sizes = [1, 96], strides = [1, 1]} : vector<1x128xf32> to vector<1x96xf32>
    %545 = arith.negf %544 : vector<1x96xf32>
    %546 = math.exp %545 : vector<1x96xf32>
    %cst_172 = arith.constant 1.000000e+00 : f32
    %547 = vector.broadcast %cst_172 : f32 to vector<1x96xf32>
    %548 = arith.addf %547, %546 : vector<1x96xf32>
    %549 = arith.divf %547, %548 : vector<1x96xf32>
    %550 = vector.extract_strided_slice %540 {offsets = [0, 96], sizes = [1, 32], strides = [1, 1]} : vector<1x128xf32> to vector<1x32xf32>
    %551 = math.tanh %550 : vector<1x32xf32>
    %552 = vector.extract_strided_slice %543 {offsets = [0, 0], sizes = [1, 96], strides = [1, 1]} : vector<1x128xf32> to vector<1x96xf32>
    %553 = arith.negf %552 : vector<1x96xf32>
    %554 = math.exp %553 : vector<1x96xf32>
    %cst_173 = arith.constant 1.000000e+00 : f32
    %555 = vector.broadcast %cst_173 : f32 to vector<1x96xf32>
    %556 = arith.addf %555, %554 : vector<1x96xf32>
    %557 = arith.divf %555, %556 : vector<1x96xf32>
    %558 = vector.extract_strided_slice %543 {offsets = [0, 96], sizes = [1, 32], strides = [1, 1]} : vector<1x128xf32> to vector<1x32xf32>
    %559 = math.tanh %558 : vector<1x32xf32>
    %560 = vector.extract_strided_slice %549 {offsets = [0, 32], sizes = [1, 32], strides = [1, 1]} : vector<1x96xf32> to vector<1x32xf32>
    %561 = arith.mulf %560, %517 : vector<1x32xf32>
    %562 = vector.extract_strided_slice %549 {offsets = [0, 0], sizes = [1, 32], strides = [1, 1]} : vector<1x96xf32> to vector<1x32xf32>
    %563 = arith.mulf %562, %551 : vector<1x32xf32>
    %564 = arith.addf %561, %563 : vector<1x32xf32>
    %565 = vector.extract_strided_slice %549 {offsets = [0, 64], sizes = [1, 32], strides = [1, 1]} : vector<1x96xf32> to vector<1x32xf32>
    %566 = math.tanh %564 : vector<1x32xf32>
    %567 = arith.mulf %565, %566 : vector<1x32xf32>
    %568 = vector.extract_strided_slice %557 {offsets = [0, 32], sizes = [1, 32], strides = [1, 1]} : vector<1x96xf32> to vector<1x32xf32>
    %569 = arith.mulf %568, %525 : vector<1x32xf32>
    %570 = vector.extract_strided_slice %557 {offsets = [0, 0], sizes = [1, 32], strides = [1, 1]} : vector<1x96xf32> to vector<1x32xf32>
    %571 = arith.mulf %570, %559 : vector<1x32xf32>
    %572 = arith.addf %569, %571 : vector<1x32xf32>
    %573 = vector.extract_strided_slice %557 {offsets = [0, 64], sizes = [1, 32], strides = [1, 1]} : vector<1x96xf32> to vector<1x32xf32>
    %574 = math.tanh %572 : vector<1x32xf32>
    %575 = arith.mulf %573, %574 : vector<1x32xf32>
    %576 = arith.index_cast %c3_i32_162 : i32 to index
    %c0_174 = arith.constant 0 : index
    %577 = vector.load %arg13[%576, %c0_174] : memref<8x64xf32, #tpu.memory_space<vmem>>, vector<1x32xf32>
    tpu.vector_store %arg13[%576, %c0_174], %567 {strides = array<i32>} : memref<8x64xf32, #tpu.memory_space<vmem>>, vector<1x32xf32>,
    %578 = arith.index_cast %533 : i32 to index
    %c32_175 = arith.constant 32 : index
    %579 = vector.load %arg13[%578, %c32_175] : memref<8x64xf32, #tpu.memory_space<vmem>>, vector<1x32xf32>
    tpu.vector_store %arg13[%578, %c32_175], %575 {strides = array<i32>} : memref<8x64xf32, #tpu.memory_space<vmem>>, vector<1x32xf32>,
    %c4_i32_176 = arith.constant 4 : i32
    %c7_i32_177 = arith.constant 7 : i32
    %580 = arith.subi %c7_i32_177, %c4_i32_176 : i32
    %c0_178 = arith.constant 0 : index
    %c0_179 = arith.constant 0 : index
    %581 = vector.load %arg6[%c0_178, %c0_179] : memref<32x128xf32, #tpu.memory_space<vmem>>, vector<32x128xf32>
    %cst_180 = arith.constant dense<0.000000e+00> : vector<1x128xf32>
    %582 = tpu.matmul %567, %581, %cst_180 {dimension_numbers = #tpu.dot_dimension_numbers<[1], [0], [0], [1], [0, 0, 1, 1], [], []>} : vector<1x32xf32>, vector<32x128xf32>, vector<1x128xf32> -> vector<1x128xf32>
    %c0_181 = arith.constant 0 : index
    %c0_182 = arith.constant 0 : index
    %583 = vector.load %arg7[%c0_181, %c0_182] : memref<32x128xf32, #tpu.memory_space<vmem>>, vector<32x128xf32>
    %cst_183 = arith.constant dense<0.000000e+00> : vector<1x128xf32>
    %584 = tpu.matmul %575, %583, %cst_183 {dimension_numbers = #tpu.dot_dimension_numbers<[1], [0], [0], [1], [0, 0, 1, 1], [], []>} : vector<1x32xf32>, vector<32x128xf32>, vector<1x128xf32> -> vector<1x128xf32>
    %585 = arith.index_cast %c4_i32_176 : i32 to index
    %c0_184 = arith.constant 0 : index
    %586 = vector.load %arg12[%585, %c0_184] : memref<8x256xf32, #tpu.memory_space<vmem>>, vector<1x128xf32>
    %587 = arith.addf %586, %582 : vector<1x128xf32>
    %588 = arith.index_cast %580 : i32 to index
    %c128_185 = arith.constant 128 : index
    %589 = vector.load %arg12[%588, %c128_185] : memref<8x256xf32, #tpu.memory_space<vmem>>, vector<1x128xf32>
    %590 = arith.addf %589, %584 : vector<1x128xf32>
    %591 = vector.extract_strided_slice %587 {offsets = [0, 0], sizes = [1, 96], strides = [1, 1]} : vector<1x128xf32> to vector<1x96xf32>
    %592 = arith.negf %591 : vector<1x96xf32>
    %593 = math.exp %592 : vector<1x96xf32>
    %cst_186 = arith.constant 1.000000e+00 : f32
    %594 = vector.broadcast %cst_186 : f32 to vector<1x96xf32>
    %595 = arith.addf %594, %593 : vector<1x96xf32>
    %596 = arith.divf %594, %595 : vector<1x96xf32>
    %597 = vector.extract_strided_slice %587 {offsets = [0, 96], sizes = [1, 32], strides = [1, 1]} : vector<1x128xf32> to vector<1x32xf32>
    %598 = math.tanh %597 : vector<1x32xf32>
    %599 = vector.extract_strided_slice %590 {offsets = [0, 0], sizes = [1, 96], strides = [1, 1]} : vector<1x128xf32> to vector<1x96xf32>
    %600 = arith.negf %599 : vector<1x96xf32>
    %601 = math.exp %600 : vector<1x96xf32>
    %cst_187 = arith.constant 1.000000e+00 : f32
    %602 = vector.broadcast %cst_187 : f32 to vector<1x96xf32>
    %603 = arith.addf %602, %601 : vector<1x96xf32>
    %604 = arith.divf %602, %603 : vector<1x96xf32>
    %605 = vector.extract_strided_slice %590 {offsets = [0, 96], sizes = [1, 32], strides = [1, 1]} : vector<1x128xf32> to vector<1x32xf32>
    %606 = math.tanh %605 : vector<1x32xf32>
    %607 = vector.extract_strided_slice %596 {offsets = [0, 32], sizes = [1, 32], strides = [1, 1]} : vector<1x96xf32> to vector<1x32xf32>
    %608 = arith.mulf %607, %564 : vector<1x32xf32>
    %609 = vector.extract_strided_slice %596 {offsets = [0, 0], sizes = [1, 32], strides = [1, 1]} : vector<1x96xf32> to vector<1x32xf32>
    %610 = arith.mulf %609, %598 : vector<1x32xf32>
    %611 = arith.addf %608, %610 : vector<1x32xf32>
    %612 = vector.extract_strided_slice %596 {offsets = [0, 64], sizes = [1, 32], strides = [1, 1]} : vector<1x96xf32> to vector<1x32xf32>
    %613 = math.tanh %611 : vector<1x32xf32>
    %614 = arith.mulf %612, %613 : vector<1x32xf32>
    %615 = vector.extract_strided_slice %604 {offsets = [0, 32], sizes = [1, 32], strides = [1, 1]} : vector<1x96xf32> to vector<1x32xf32>
    %616 = arith.mulf %615, %572 : vector<1x32xf32>
    %617 = vector.extract_strided_slice %604 {offsets = [0, 0], sizes = [1, 32], strides = [1, 1]} : vector<1x96xf32> to vector<1x32xf32>
    %618 = arith.mulf %617, %606 : vector<1x32xf32>
    %619 = arith.addf %616, %618 : vector<1x32xf32>
    %620 = vector.extract_strided_slice %604 {offsets = [0, 64], sizes = [1, 32], strides = [1, 1]} : vector<1x96xf32> to vector<1x32xf32>
    %621 = math.tanh %619 : vector<1x32xf32>
    %622 = arith.mulf %620, %621 : vector<1x32xf32>
    %623 = arith.index_cast %c4_i32_176 : i32 to index
    %c0_188 = arith.constant 0 : index
    %624 = vector.load %arg13[%623, %c0_188] : memref<8x64xf32, #tpu.memory_space<vmem>>, vector<1x32xf32>
    tpu.vector_store %arg13[%623, %c0_188], %614 {strides = array<i32>} : memref<8x64xf32, #tpu.memory_space<vmem>>, vector<1x32xf32>,
    %625 = arith.index_cast %580 : i32 to index
    %c32_189 = arith.constant 32 : index
    %626 = vector.load %arg13[%625, %c32_189] : memref<8x64xf32, #tpu.memory_space<vmem>>, vector<1x32xf32>
    tpu.vector_store %arg13[%625, %c32_189], %622 {strides = array<i32>} : memref<8x64xf32, #tpu.memory_space<vmem>>, vector<1x32xf32>,
    %c5_i32_190 = arith.constant 5 : i32
    %c7_i32_191 = arith.constant 7 : i32
    %627 = arith.subi %c7_i32_191, %c5_i32_190 : i32
    %c0_192 = arith.constant 0 : index
    %c0_193 = arith.constant 0 : index
    %628 = vector.load %arg6[%c0_192, %c0_193] : memref<32x128xf32, #tpu.memory_space<vmem>>, vector<32x128xf32>
    %cst_194 = arith.constant dense<0.000000e+00> : vector<1x128xf32>
    %629 = tpu.matmul %614, %628, %cst_194 {dimension_numbers = #tpu.dot_dimension_numbers<[1], [0], [0], [1], [0, 0, 1, 1], [], []>} : vector<1x32xf32>, vector<32x128xf32>, vector<1x128xf32> -> vector<1x128xf32>
    %c0_195 = arith.constant 0 : index
    %c0_196 = arith.constant 0 : index
    %630 = vector.load %arg7[%c0_195, %c0_196] : memref<32x128xf32, #tpu.memory_space<vmem>>, vector<32x128xf32>
    %cst_197 = arith.constant dense<0.000000e+00> : vector<1x128xf32>
    %631 = tpu.matmul %622, %630, %cst_197 {dimension_numbers = #tpu.dot_dimension_numbers<[1], [0], [0], [1], [0, 0, 1, 1], [], []>} : vector<1x32xf32>, vector<32x128xf32>, vector<1x128xf32> -> vector<1x128xf32>
    %632 = arith.index_cast %c5_i32_190 : i32 to index
    %c0_198 = arith.constant 0 : index
    %633 = vector.load %arg12[%632, %c0_198] : memref<8x256xf32, #tpu.memory_space<vmem>>, vector<1x128xf32>
    %634 = arith.addf %633, %629 : vector<1x128xf32>
    %635 = arith.index_cast %627 : i32 to index
    %c128_199 = arith.constant 128 : index
    %636 = vector.load %arg12[%635, %c128_199] : memref<8x256xf32, #tpu.memory_space<vmem>>, vector<1x128xf32>
    %637 = arith.addf %636, %631 : vector<1x128xf32>
    %638 = vector.extract_strided_slice %634 {offsets = [0, 0], sizes = [1, 96], strides = [1, 1]} : vector<1x128xf32> to vector<1x96xf32>
    %639 = arith.negf %638 : vector<1x96xf32>
    %640 = math.exp %639 : vector<1x96xf32>
    %cst_200 = arith.constant 1.000000e+00 : f32
    %641 = vector.broadcast %cst_200 : f32 to vector<1x96xf32>
    %642 = arith.addf %641, %640 : vector<1x96xf32>
    %643 = arith.divf %641, %642 : vector<1x96xf32>
    %644 = vector.extract_strided_slice %634 {offsets = [0, 96], sizes = [1, 32], strides = [1, 1]} : vector<1x128xf32> to vector<1x32xf32>
    %645 = math.tanh %644 : vector<1x32xf32>
    %646 = vector.extract_strided_slice %637 {offsets = [0, 0], sizes = [1, 96], strides = [1, 1]} : vector<1x128xf32> to vector<1x96xf32>
    %647 = arith.negf %646 : vector<1x96xf32>
    %648 = math.exp %647 : vector<1x96xf32>
    %cst_201 = arith.constant 1.000000e+00 : f32
    %649 = vector.broadcast %cst_201 : f32 to vector<1x96xf32>
    %650 = arith.addf %649, %648 : vector<1x96xf32>
    %651 = arith.divf %649, %650 : vector<1x96xf32>
    %652 = vector.extract_strided_slice %637 {offsets = [0, 96], sizes = [1, 32], strides = [1, 1]} : vector<1x128xf32> to vector<1x32xf32>
    %653 = math.tanh %652 : vector<1x32xf32>
    %654 = vector.extract_strided_slice %643 {offsets = [0, 32], sizes = [1, 32], strides = [1, 1]} : vector<1x96xf32> to vector<1x32xf32>
    %655 = arith.mulf %654, %611 : vector<1x32xf32>
    %656 = vector.extract_strided_slice %643 {offsets = [0, 0], sizes = [1, 32], strides = [1, 1]} : vector<1x96xf32> to vector<1x32xf32>
    %657 = arith.mulf %656, %645 : vector<1x32xf32>
    %658 = arith.addf %655, %657 : vector<1x32xf32>
    %659 = vector.extract_strided_slice %643 {offsets = [0, 64], sizes = [1, 32], strides = [1, 1]} : vector<1x96xf32> to vector<1x32xf32>
    %660 = math.tanh %658 : vector<1x32xf32>
    %661 = arith.mulf %659, %660 : vector<1x32xf32>
    %662 = vector.extract_strided_slice %651 {offsets = [0, 32], sizes = [1, 32], strides = [1, 1]} : vector<1x96xf32> to vector<1x32xf32>
    %663 = arith.mulf %662, %619 : vector<1x32xf32>
    %664 = vector.extract_strided_slice %651 {offsets = [0, 0], sizes = [1, 32], strides = [1, 1]} : vector<1x96xf32> to vector<1x32xf32>
    %665 = arith.mulf %664, %653 : vector<1x32xf32>
    %666 = arith.addf %663, %665 : vector<1x32xf32>
    %667 = vector.extract_strided_slice %651 {offsets = [0, 64], sizes = [1, 32], strides = [1, 1]} : vector<1x96xf32> to vector<1x32xf32>
    %668 = math.tanh %666 : vector<1x32xf32>
    %669 = arith.mulf %667, %668 : vector<1x32xf32>
    %670 = arith.index_cast %c5_i32_190 : i32 to index
    %c0_202 = arith.constant 0 : index
    %671 = vector.load %arg13[%670, %c0_202] : memref<8x64xf32, #tpu.memory_space<vmem>>, vector<1x32xf32>
    tpu.vector_store %arg13[%670, %c0_202], %661 {strides = array<i32>} : memref<8x64xf32, #tpu.memory_space<vmem>>, vector<1x32xf32>,
    %672 = arith.index_cast %627 : i32 to index
    %c32_203 = arith.constant 32 : index
    %673 = vector.load %arg13[%672, %c32_203] : memref<8x64xf32, #tpu.memory_space<vmem>>, vector<1x32xf32>
    tpu.vector_store %arg13[%672, %c32_203], %669 {strides = array<i32>} : memref<8x64xf32, #tpu.memory_space<vmem>>, vector<1x32xf32>,
    %c6_i32_204 = arith.constant 6 : i32
    %c7_i32_205 = arith.constant 7 : i32
    %674 = arith.subi %c7_i32_205, %c6_i32_204 : i32
    %c0_206 = arith.constant 0 : index
    %c0_207 = arith.constant 0 : index
    %675 = vector.load %arg6[%c0_206, %c0_207] : memref<32x128xf32, #tpu.memory_space<vmem>>, vector<32x128xf32>
    %cst_208 = arith.constant dense<0.000000e+00> : vector<1x128xf32>
    %676 = tpu.matmul %661, %675, %cst_208 {dimension_numbers = #tpu.dot_dimension_numbers<[1], [0], [0], [1], [0, 0, 1, 1], [], []>} : vector<1x32xf32>, vector<32x128xf32>, vector<1x128xf32> -> vector<1x128xf32>
    %c0_209 = arith.constant 0 : index
    %c0_210 = arith.constant 0 : index
    %677 = vector.load %arg7[%c0_209, %c0_210] : memref<32x128xf32, #tpu.memory_space<vmem>>, vector<32x128xf32>
    %cst_211 = arith.constant dense<0.000000e+00> : vector<1x128xf32>
    %678 = tpu.matmul %669, %677, %cst_211 {dimension_numbers = #tpu.dot_dimension_numbers<[1], [0], [0], [1], [0, 0, 1, 1], [], []>} : vector<1x32xf32>, vector<32x128xf32>, vector<1x128xf32> -> vector<1x128xf32>
    %679 = arith.index_cast %c6_i32_204 : i32 to index
    %c0_212 = arith.constant 0 : index
    %680 = vector.load %arg12[%679, %c0_212] : memref<8x256xf32, #tpu.memory_space<vmem>>, vector<1x128xf32>
    %681 = arith.addf %680, %676 : vector<1x128xf32>
    %682 = arith.index_cast %674 : i32 to index
    %c128_213 = arith.constant 128 : index
    %683 = vector.load %arg12[%682, %c128_213] : memref<8x256xf32, #tpu.memory_space<vmem>>, vector<1x128xf32>
    %684 = arith.addf %683, %678 : vector<1x128xf32>
    %685 = vector.extract_strided_slice %681 {offsets = [0, 0], sizes = [1, 96], strides = [1, 1]} : vector<1x128xf32> to vector<1x96xf32>
    %686 = arith.negf %685 : vector<1x96xf32>
    %687 = math.exp %686 : vector<1x96xf32>
    %cst_214 = arith.constant 1.000000e+00 : f32
    %688 = vector.broadcast %cst_214 : f32 to vector<1x96xf32>
    %689 = arith.addf %688, %687 : vector<1x96xf32>
    %690 = arith.divf %688, %689 : vector<1x96xf32>
    %691 = vector.extract_strided_slice %681 {offsets = [0, 96], sizes = [1, 32], strides = [1, 1]} : vector<1x128xf32> to vector<1x32xf32>
    %692 = math.tanh %691 : vector<1x32xf32>
    %693 = vector.extract_strided_slice %684 {offsets = [0, 0], sizes = [1, 96], strides = [1, 1]} : vector<1x128xf32> to vector<1x96xf32>
    %694 = arith.negf %693 : vector<1x96xf32>
    %695 = math.exp %694 : vector<1x96xf32>
    %cst_215 = arith.constant 1.000000e+00 : f32
    %696 = vector.broadcast %cst_215 : f32 to vector<1x96xf32>
    %697 = arith.addf %696, %695 : vector<1x96xf32>
    %698 = arith.divf %696, %697 : vector<1x96xf32>
    %699 = vector.extract_strided_slice %684 {offsets = [0, 96], sizes = [1, 32], strides = [1, 1]} : vector<1x128xf32> to vector<1x32xf32>
    %700 = math.tanh %699 : vector<1x32xf32>
    %701 = vector.extract_strided_slice %690 {offsets = [0, 32], sizes = [1, 32], strides = [1, 1]} : vector<1x96xf32> to vector<1x32xf32>
    %702 = arith.mulf %701, %658 : vector<1x32xf32>
    %703 = vector.extract_strided_slice %690 {offsets = [0, 0], sizes = [1, 32], strides = [1, 1]} : vector<1x96xf32> to vector<1x32xf32>
    %704 = arith.mulf %703, %692 : vector<1x32xf32>
    %705 = arith.addf %702, %704 : vector<1x32xf32>
    %706 = vector.extract_strided_slice %690 {offsets = [0, 64], sizes = [1, 32], strides = [1, 1]} : vector<1x96xf32> to vector<1x32xf32>
    %707 = math.tanh %705 : vector<1x32xf32>
    %708 = arith.mulf %706, %707 : vector<1x32xf32>
    %709 = vector.extract_strided_slice %698 {offsets = [0, 32], sizes = [1, 32], strides = [1, 1]} : vector<1x96xf32> to vector<1x32xf32>
    %710 = arith.mulf %709, %666 : vector<1x32xf32>
    %711 = vector.extract_strided_slice %698 {offsets = [0, 0], sizes = [1, 32], strides = [1, 1]} : vector<1x96xf32> to vector<1x32xf32>
    %712 = arith.mulf %711, %700 : vector<1x32xf32>
    %713 = arith.addf %710, %712 : vector<1x32xf32>
    %714 = vector.extract_strided_slice %698 {offsets = [0, 64], sizes = [1, 32], strides = [1, 1]} : vector<1x96xf32> to vector<1x32xf32>
    %715 = math.tanh %713 : vector<1x32xf32>
    %716 = arith.mulf %714, %715 : vector<1x32xf32>
    %717 = arith.index_cast %c6_i32_204 : i32 to index
    %c0_216 = arith.constant 0 : index
    %718 = vector.load %arg13[%717, %c0_216] : memref<8x64xf32, #tpu.memory_space<vmem>>, vector<1x32xf32>
    tpu.vector_store %arg13[%717, %c0_216], %708 {strides = array<i32>} : memref<8x64xf32, #tpu.memory_space<vmem>>, vector<1x32xf32>,
    %719 = arith.index_cast %674 : i32 to index
    %c32_217 = arith.constant 32 : index
    %720 = vector.load %arg13[%719, %c32_217] : memref<8x64xf32, #tpu.memory_space<vmem>>, vector<1x32xf32>
    tpu.vector_store %arg13[%719, %c32_217], %716 {strides = array<i32>} : memref<8x64xf32, #tpu.memory_space<vmem>>, vector<1x32xf32>,
    %c7_i32_218 = arith.constant 7 : i32
    %c7_i32_219 = arith.constant 7 : i32
    %721 = arith.subi %c7_i32_219, %c7_i32_218 : i32
    %c0_220 = arith.constant 0 : index
    %c0_221 = arith.constant 0 : index
    %722 = vector.load %arg6[%c0_220, %c0_221] : memref<32x128xf32, #tpu.memory_space<vmem>>, vector<32x128xf32>
    %cst_222 = arith.constant dense<0.000000e+00> : vector<1x128xf32>
    %723 = tpu.matmul %708, %722, %cst_222 {dimension_numbers = #tpu.dot_dimension_numbers<[1], [0], [0], [1], [0, 0, 1, 1], [], []>} : vector<1x32xf32>, vector<32x128xf32>, vector<1x128xf32> -> vector<1x128xf32>
    %c0_223 = arith.constant 0 : index
    %c0_224 = arith.constant 0 : index
    %724 = vector.load %arg7[%c0_223, %c0_224] : memref<32x128xf32, #tpu.memory_space<vmem>>, vector<32x128xf32>
    %cst_225 = arith.constant dense<0.000000e+00> : vector<1x128xf32>
    %725 = tpu.matmul %716, %724, %cst_225 {dimension_numbers = #tpu.dot_dimension_numbers<[1], [0], [0], [1], [0, 0, 1, 1], [], []>} : vector<1x32xf32>, vector<32x128xf32>, vector<1x128xf32> -> vector<1x128xf32>
    %726 = arith.index_cast %c7_i32_218 : i32 to index
    %c0_226 = arith.constant 0 : index
    %727 = vector.load %arg12[%726, %c0_226] : memref<8x256xf32, #tpu.memory_space<vmem>>, vector<1x128xf32>
    %728 = arith.addf %727, %723 : vector<1x128xf32>
    %729 = arith.index_cast %721 : i32 to index
    %c128_227 = arith.constant 128 : index
    %730 = vector.load %arg12[%729, %c128_227] : memref<8x256xf32, #tpu.memory_space<vmem>>, vector<1x128xf32>
    %731 = arith.addf %730, %725 : vector<1x128xf32>
    %732 = vector.extract_strided_slice %728 {offsets = [0, 0], sizes = [1, 96], strides = [1, 1]} : vector<1x128xf32> to vector<1x96xf32>
    %733 = arith.negf %732 : vector<1x96xf32>
    %734 = math.exp %733 : vector<1x96xf32>
    %cst_228 = arith.constant 1.000000e+00 : f32
    %735 = vector.broadcast %cst_228 : f32 to vector<1x96xf32>
    %736 = arith.addf %735, %734 : vector<1x96xf32>
    %737 = arith.divf %735, %736 : vector<1x96xf32>
    %738 = vector.extract_strided_slice %728 {offsets = [0, 96], sizes = [1, 32], strides = [1, 1]} : vector<1x128xf32> to vector<1x32xf32>
    %739 = math.tanh %738 : vector<1x32xf32>
    %740 = vector.extract_strided_slice %731 {offsets = [0, 0], sizes = [1, 96], strides = [1, 1]} : vector<1x128xf32> to vector<1x96xf32>
    %741 = arith.negf %740 : vector<1x96xf32>
    %742 = math.exp %741 : vector<1x96xf32>
    %cst_229 = arith.constant 1.000000e+00 : f32
    %743 = vector.broadcast %cst_229 : f32 to vector<1x96xf32>
    %744 = arith.addf %743, %742 : vector<1x96xf32>
    %745 = arith.divf %743, %744 : vector<1x96xf32>
    %746 = vector.extract_strided_slice %731 {offsets = [0, 96], sizes = [1, 32], strides = [1, 1]} : vector<1x128xf32> to vector<1x32xf32>
    %747 = math.tanh %746 : vector<1x32xf32>
    %748 = vector.extract_strided_slice %737 {offsets = [0, 32], sizes = [1, 32], strides = [1, 1]} : vector<1x96xf32> to vector<1x32xf32>
    %749 = arith.mulf %748, %705 : vector<1x32xf32>
    %750 = vector.extract_strided_slice %737 {offsets = [0, 0], sizes = [1, 32], strides = [1, 1]} : vector<1x96xf32> to vector<1x32xf32>
    %751 = arith.mulf %750, %739 : vector<1x32xf32>
    %752 = arith.addf %749, %751 : vector<1x32xf32>
    %753 = vector.extract_strided_slice %737 {offsets = [0, 64], sizes = [1, 32], strides = [1, 1]} : vector<1x96xf32> to vector<1x32xf32>
    %754 = math.tanh %752 : vector<1x32xf32>
    %755 = arith.mulf %753, %754 : vector<1x32xf32>
    %756 = vector.extract_strided_slice %745 {offsets = [0, 32], sizes = [1, 32], strides = [1, 1]} : vector<1x96xf32> to vector<1x32xf32>
    %757 = arith.mulf %756, %713 : vector<1x32xf32>
    %758 = vector.extract_strided_slice %745 {offsets = [0, 0], sizes = [1, 32], strides = [1, 1]} : vector<1x96xf32> to vector<1x32xf32>
    %759 = arith.mulf %758, %747 : vector<1x32xf32>
    %760 = arith.addf %757, %759 : vector<1x32xf32>
    %761 = vector.extract_strided_slice %745 {offsets = [0, 64], sizes = [1, 32], strides = [1, 1]} : vector<1x96xf32> to vector<1x32xf32>
    %762 = math.tanh %760 : vector<1x32xf32>
    %763 = arith.mulf %761, %762 : vector<1x32xf32>
    %764 = arith.index_cast %c7_i32_218 : i32 to index
    %c0_230 = arith.constant 0 : index
    %765 = vector.load %arg13[%764, %c0_230] : memref<8x64xf32, #tpu.memory_space<vmem>>, vector<1x32xf32>
    tpu.vector_store %arg13[%764, %c0_230], %755 {strides = array<i32>} : memref<8x64xf32, #tpu.memory_space<vmem>>, vector<1x32xf32>,
    %766 = arith.index_cast %721 : i32 to index
    %c32_231 = arith.constant 32 : index
    %767 = vector.load %arg13[%766, %c32_231] : memref<8x64xf32, #tpu.memory_space<vmem>>, vector<1x32xf32>
    tpu.vector_store %arg13[%766, %c32_231], %763 {strides = array<i32>} : memref<8x64xf32, #tpu.memory_space<vmem>>, vector<1x32xf32>,
    %c8_i32_232 = arith.constant 8 : i32
    %c0_233 = arith.constant 0 : index
    %c0_234 = arith.constant 0 : index
    %768 = vector.load %arg9[%c0_233, %c0_234] : memref<1x64xf32, #tpu.memory_space<vmem>>, vector<1x64xf32>
    %c0_235 = arith.constant 0 : index
    %c0_236 = arith.constant 0 : index
    %769 = vector.load %arg13[%c0_235, %c0_236] : memref<8x64xf32, #tpu.memory_space<vmem>>, vector<8x64xf32>
    %770 = tpu.transpose %769, [1, 0] : vector<8x64xf32> -> vector<64x8xf32>
    %cst_237 = arith.constant dense<0.000000e+00> : vector<1x8xf32>
    %771 = tpu.matmul %768, %770, %cst_237 {dimension_numbers = #tpu.dot_dimension_numbers<[1], [0], [0], [1], [0, 0, 1, 1], [], []>} : vector<1x64xf32>, vector<64x8xf32>, vector<1x8xf32> -> vector<1x8xf32>
    %c0_238 = arith.constant 0 : index
    %c0_239 = arith.constant 0 : index
    %772 = vector.load %arg10[%c0_238, %c0_239] : memref<1x1xf32, #tpu.memory_space<vmem>>, vector<1x1xf32>
    %773 = vector.broadcast %772 : vector<1x1xf32> to vector<1x8xf32>
    %774 = arith.addf %771, %773 : vector<1x8xf32>
    %775 = arith.negf %774 : vector<1x8xf32>
    %776 = math.exp %775 : vector<1x8xf32>
    %cst_240 = arith.constant 1.000000e+00 : f32
    %777 = vector.broadcast %cst_240 : f32 to vector<1x8xf32>
    %778 = arith.addf %777, %776 : vector<1x8xf32>
    %779 = arith.divf %777, %778 : vector<1x8xf32>
    %c0_241 = arith.constant 0 : index
    %c0_242 = arith.constant 0 : index
    %780 = vector.load %arg11[%c0_241, %c0_242] : memref<1x8xf32, #tpu.memory_space<vmem>>, vector<1x8xf32>
    tpu.vector_store %arg11[%c0_241, %c0_242], %779 {strides = array<i32>} : memref<1x8xf32, #tpu.memory_space<vmem>>, vector<1x8xf32>,
    return
  }
}

</mosaic_0001>

<bundles_post_ra>
// kernel: tpu_custom_call.1
= control target key start
LH: loop header
LB: loop body
LE: loop exit
PB: predicated region body
PF: predicated region fallthrough
CT: control target
= control target key end

     0   :  { %s5921_s0 = inlined_call_operand.hbm [shape: f32[8,32], index: 0, kind: input, shape index: {}]   ;;  %s5922_s1 = inlined_call_operand.hbm [shape: f32[32,256], index: 1, kind: input, shape index: {}]   ;;  %s5923_s2 = inlined_call_operand.hbm [shape: f32[32,128], index: 2, kind: input, shape index: {}]   ;;  %s5924_s3 = inlined_call_operand.hbm [shape: f32[32,128], index: 3, kind: input, shape index: {}]   ;;  %s5925_s4 = inlined_call_operand.vmem [shape: f32[1,256], index: 4, kind: input, shape index: {}]   ;;  %s5926_s5 = inlined_call_operand.hbm [shape: f32[64,256], index: 5, kind: input, shape index: {}]   ;;  %s5927_s6 = inlined_call_operand.hbm [shape: f32[32,128], index: 6, kind: input, shape index: {}]   ;;  %s5928_s7 = inlined_call_operand.hbm [shape: f32[32,128], index: 7, kind: input, shape index: {}]   ;;  %s5929_s8 = inlined_call_operand.vmem [shape: f32[1,256], index: 8, kind: input, shape index: {}]   ;;  %s5930_s9 = inlined_call_operand.vmem [shape: f32[1,64], index: 9, kind: input, shape index: {}]   ;;  %s5931_s10 = inlined_call_operand.<no memory space> [shape: f32[1,1], index: 10, kind: input, shape index: {}]   ;;  %s5932_s11 = inlined_call_operand.hbm [shape: f32[1,8], index: 11, kind: output, shape index: {}]  }
   0x1   :  { %v16_v0 = vstv %s5931_s10 }
   0x2   :  { %17 = vst [vmem:[#allocation4] sm:$0x1] %v16_v0 }
   0x3   :  { %18 = vsyncpa [#allocation6], 0 }
   0x4   :  { %19 = vsyncpa [#allocation9], 0 }
   0x5   :  { %20 = vsyncpa [#allocation12], 0 }
   0x6   :  { %21 = vsyncpa [#allocation15], 0 }
   0x7   :  { %22 = vsyncpa [#allocation7], 0  ;;  %s5167_s19 = smov [#allocation8]   ;;  %s4981_s23 = scalar_lea.hbm %s5922_s1, 1024 }
   0x8   :  { %s38_s20 = sshll.u32 %s5167_s19, 4  ;;  %p4982_p0 = scmp.ne.s32.totalorder %s5922_s1, %s4981_s23  ;;  %s39_s20 = int_to_ptr.vmem [resolvable:$true] %s38_s20 }
   0x9   :  { %p4985_p1 = scmp.lt.u32.totalorder %s4981_s23, %s5922_s1 }
   0xb   :  { %p4987_p2 = pnand %p4985_p1, %p4982_p0 }
   0xd   :  { %4990 = shalt.err (!%p4987_p2)
}
   0xe   :  { %s4991_s10 = scalar_lea.vmem %s39_s20, 1024  ;;  %p4996_p4 = scmp.lt.s32.totalorder %s39_s20, %s39_s20 }
   0xf   :  { %p4992_p3 = scmp.ne.s32.totalorder %s39_s20, %s4991_s10  ;;  %p4997_p5 = scmp.lt.s32.totalorder %s4991_s10, %s4991_s10 }
  0x11   :  { %p4998_p6 = por %p4997_p5, %p4996_p4 }
  0x13   :  { %p4999_p7 = pnand %p4998_p6, %p4992_p3 }
  0x15   :  { %5002 = shalt.err (!%p4999_p7)
}
  0x16   :  { %s5168_s28 = smov 256   ;;  %s5169_s29 = smov 16  }
  0x17   :  { %44 = dma.hbm_to_vmem [thread:$0]  %s5922_s1, 1024, %s39_s20, [#allocation9], %s5168_s28, %s5168_s28, %s5169_s29  }
  0x18   :  { %s5170_s13 = smov [#allocation11]   ;;  %s5171_s15 = smov [#allocation14]  }
  0x19   :  { %s62_s14 = sshll.u32 %s5170_s13, 4  ;;  %s88_s16 = sshll.u32 %s5171_s15, 4  ;;  %s63_s14 = int_to_ptr.vmem [resolvable:$true] %s62_s14  ;;  %s89_s16 = int_to_ptr.vmem [resolvable:$true] %s88_s16 }
  0x1a   :  { %s5003_s19 = scalar_lea.hbm %s5924_s3, 512 }
  0x1b   :  { %p5004_p8 = scmp.ne.s32.totalorder %s5924_s3, %s5003_s19  ;;  %p5007_p9 = scmp.lt.u32.totalorder %s5003_s19, %s5924_s3 }
  0x1d   :  { %p5009_p10 = pnand %p5007_p9, %p5004_p8 }
  0x1f   :  { %5012 = shalt.err (!%p5009_p10)
}
  0x20   :  { %s5013_s1 = scalar_lea.vmem %s63_s14, 512  ;;  %p5018_p12 = scmp.lt.s32.totalorder %s63_s14, %s63_s14 }
  0x21   :  { %p5014_p11 = scmp.ne.s32.totalorder %s63_s14, %s5013_s1  ;;  %p5019_p13 = scmp.lt.s32.totalorder %s5013_s1, %s5013_s1 }
  0x23   :  { %p5020_p0 = por %p5019_p13, %p5018_p12 }
  0x25   :  { %p5021_p1 = pnand %p5020_p0, %p5014_p11 }
  0x27   :  { %5024 = shalt.err (!%p5021_p1)
}
  0x28   :  { %s5172_s20 = smov 128   ;;  %s5173_s25 = smov 8  }
  0x29   :  { %68 = dma.hbm_to_vmem [thread:$0]  %s5924_s3, 512, %s63_s14, [#allocation12], %s5172_s20, %s5172_s20, %s5173_s25  }
  0x2a   :  { %s5025_s12 = scalar_lea.hbm %s5927_s6, 512 }
  0x2b   :  { %p5026_p2 = scmp.ne.s32.totalorder %s5927_s6, %s5025_s12  ;;  %p5029_p3 = scmp.lt.u32.totalorder %s5025_s12, %s5927_s6 }
  0x2d   :  { %p5031_p4 = pnand %p5029_p3, %p5026_p2 }
  0x2f   :  { %5034 = shalt.err (!%p5031_p4)
}
  0x30   :  { %s5035_s19 = scalar_lea.vmem %s89_s16, 512  ;;  %p5040_p6 = scmp.lt.s32.totalorder %s89_s16, %s89_s16 }
  0x31   :  { %p5036_p5 = scmp.ne.s32.totalorder %s89_s16, %s5035_s19  ;;  %p5041_p7 = scmp.lt.s32.totalorder %s5035_s19, %s5035_s19 }
  0x33   :  { %p5042_p8 = por %p5041_p7, %p5040_p6 }
  0x35   :  { %p5043_p9 = pnand %p5042_p8, %p5036_p5 }
  0x37   :  { %5046 = shalt.err (!%p5043_p9)
}
  0x38   :  { %94 = dma.hbm_to_vmem [thread:$0]  %s5927_s6, 512, %s89_s16, [#allocation15], %s5172_s20, %s5172_s20, %s5173_s25  }
  0x39   :  { %s5174_s21 = smov [#allocation5]   ;;  %s5175_s23 = smov [#allocation10]  }
  0x3a   :  { %s29_s22 = sshll.u32 %s5174_s21, 4  ;;  %s50_s24 = sshll.u32 %s5175_s23, 4  ;;  %s30_s22 = int_to_ptr.vmem [resolvable:$true] %s29_s22  ;;  %s51_s24 = int_to_ptr.vmem [resolvable:$true] %s50_s24 }
  0x3b   :  { %s5047_s27 = scalar_lea.hbm %s5921_s0, 128 }
  0x3c   :  { %p5048_p10 = scmp.ne.s32.totalorder %s5921_s0, %s5047_s27  ;;  %p5051_p11 = scmp.lt.u32.totalorder %s5047_s27, %s5921_s0 }
  0x3e   :  { %p5053_p12 = pnand %p5051_p11, %p5048_p10 }
  0x40   :  { %5056 = shalt.err (!%p5053_p12)
}
  0x41   :  { %s5057_s6 = scalar_lea.vmem %s30_s22, 128  ;;  %p5062_p0 = scmp.lt.s32.totalorder %s30_s22, %s30_s22 }
  0x42   :  { %p5058_p13 = scmp.ne.s32.totalorder %s30_s22, %s5057_s6  ;;  %p5063_p1 = scmp.lt.s32.totalorder %s5057_s6, %s5057_s6 }
  0x44   :  { %p5064_p2 = por %p5063_p1, %p5062_p0 }
  0x46   :  { %p5065_p3 = pnand %p5064_p2, %p5058_p13 }
  0x48   :  { %5068 = shalt.err (!%p5065_p3)
}
  0x49   :  { %32 = dma.hbm_to_vmem [thread:$0]  %s5921_s0, 128, %s30_s22, [#allocation6]  }
  0x4a   :  { %s5069_s19 = scalar_lea.hbm %s5923_s2, 512 }
  0x4b   :  { %p5070_p4 = scmp.ne.s32.totalorder %s5923_s2, %s5069_s19  ;;  %p5073_p5 = scmp.lt.u32.totalorder %s5069_s19, %s5923_s2 }
  0x4d   :  { %p5075_p6 = pnand %p5073_p5, %p5070_p4 }
  0x4f   :  { %5078 = shalt.err (!%p5075_p6)
}
  0x50   :  { %s5079_s1 = scalar_lea.vmem %s51_s24, 512  ;;  %p5084_p8 = scmp.lt.s32.totalorder %s51_s24, %s51_s24 }
  0x51   :  { %p5080_p7 = scmp.ne.s32.totalorder %s51_s24, %s5079_s1  ;;  %p5085_p9 = scmp.lt.s32.totalorder %s5079_s1, %s5079_s1 }
  0x53   :  { %p5086_p10 = por %p5085_p9, %p5084_p8 }
  0x55   :  { %p5087_p11 = pnand %p5086_p10, %p5080_p7 }
  0x57   :  { %5090 = shalt.err (!%p5087_p11)
}
  0x58   :  { %56 = dma.hbm_to_vmem [thread:$0]  %s5923_s2, 512, %s51_s24, [#allocation9], %s5172_s20, %s5172_s20, %s5173_s25  }
  0x59   :  { %s5176_s26 = smov [#allocation13]   ;;  %s5177_s10 = smov [#allocation16]  }
  0x5a   :  { %s76_s27 = sshll.u32 %s5176_s26, 4  ;;  %s100_s30 = sshll.u32 %s5177_s10, 4  ;;  %s77_s27 = int_to_ptr.vmem [resolvable:$true] %s76_s27  ;;  %s101_s30 = int_to_ptr.vmem [resolvable:$true] %s100_s30 }
  0x5b   :  { %s5091_s6 = scalar_lea.hbm %s5926_s5, 2048 }
  0x5c   :  { %p5092_p12 = scmp.ne.s32.totalorder %s5926_s5, %s5091_s6  ;;  %p5095_p13 = scmp.lt.u32.totalorder %s5091_s6, %s5926_s5 }
  0x5e   :  { %p5097_p0 = pnand %p5095_p13, %p5092_p12 }
  0x60   :  { %5100 = shalt.err (!%p5097_p0)
}
  0x61   :  { %s5101_s2 = scalar_lea.vmem %s77_s27, 2048  ;;  %p5106_p2 = scmp.lt.s32.totalorder %s77_s27, %s77_s27 }
  0x62   :  { %p5102_p1 = scmp.ne.s32.totalorder %s77_s27, %s5101_s2  ;;  %p5107_p3 = scmp.lt.s32.totalorder %s5101_s2, %s5101_s2 }
  0x64   :  { %p5108_p4 = por %p5107_p3, %p5106_p2 }
  0x66   :  { %p5109_p5 = pnand %p5108_p4, %p5102_p1 }
  0x68   :  { %5112 = shalt.err (!%p5109_p5)
}
  0x69   :  { %82 = dma.hbm_to_vmem [thread:$0]  %s5926_s5, 2048, %s77_s27, [#allocation12], %s5168_s28, %s5168_s28, %s5169_s29  }
  0x6a   :  { %s5113_s21 = scalar_lea.hbm %s5928_s7, 512 }
  0x6b   :  { %p5114_p6 = scmp.ne.s32.totalorder %s5928_s7, %s5113_s21  ;;  %p5117_p7 = scmp.lt.u32.totalorder %s5113_s21, %s5928_s7 }
  0x6d   :  { %p5119_p8 = pnand %p5117_p7, %p5114_p6 }
  0x6f   :  { %5122 = shalt.err (!%p5119_p8)
}
  0x70   :  { %s5123_s26 = scalar_lea.vmem %s101_s30, 512  ;;  %p5128_p10 = scmp.lt.s32.totalorder %s101_s30, %s101_s30 }
  0x71   :  { %p5124_p9 = scmp.ne.s32.totalorder %s101_s30, %s5123_s26  ;;  %p5129_p11 = scmp.lt.s32.totalorder %s5123_s26, %s5123_s26 }
  0x73   :  { %p5130_p12 = por %p5129_p11, %p5128_p10 }
  0x75   :  { %p5131_p13 = pnand %p5130_p12, %p5124_p9 }
  0x77   :  { %5134 = shalt.err (!%p5131_p13)
}
  0x78   :  { %106 = dma.hbm_to_vmem [thread:$0]  %s5928_s7, 512, %s101_s30, [#allocation15], %s5172_s20, %s5172_s20, %s5173_s25  }
  0x79   :  { %5157 = dma.done.wait [#allocation6], 128  }
  0x7a   :  { %5158 = vsyncadd [#allocation6], 4294967168 }
  0x7b   :  { %5159 = dma.done.wait [#allocation9], 1536  }
  0x7c   :  { %5160 = vsyncadd [#allocation9], 4294965760 }
  0x7d   :  { %5161 = dma.done.wait [#allocation12], 2560  }
  0x7e   :  { %5162 = vsyncadd [#allocation12], 4294964736 }
  0x7f   :  { %5163 = dma.done.wait [#allocation15], 1024  }
  0x80   :  { %5164 = vsyncadd [#allocation15], 4294966272  ;;  %v5178_v1 = vmov 0.0   ;;  %v5179_v2 = vmov 0.0|0.0   ;;  %vm5180_vm0 = vmmov 0   ;;  %v136_v3 = vld [vmem:[#allocation8 + $0x8] sm:$0xff]  ;;  %v145_v28 = vlaneseq }
  0x81   :  { %223 = vmatprep.mubr.f32.mxu0 %v5178_v1  ;;  %4493 = vmatprep.subr.bf16.mxu1 %v5179_v2  ;;  %v138_v4 = vld [vmem:[#allocation8 + $0x18] sm:$0xff]  ;;  %v135_v5 = vld [vmem:[#allocation8] sm:$0xff]  ;;  %v137_v7 = vld [vmem:[#allocation8 + $0x10] sm:$0xff]  ;;  %vm155_vm1 = vcmask 261120   ;;  %s5182_s20 = smov 64   ;;  %vm439_vm2 = vcmask 253952  }
  0x82   :  { %4136 = vmatprep.mubr.msk.f32.mxu1 %vm5180_vm0, %v5178_v1  ;;  %v4485_v6 = vpack.c.bf16 %v138_v4, %v136_v3  ;;  %v140_v8 = vld [vmem:[#allocation8 + $0x28] sm:$0xff]  ;;  %v142_v9 = vld [vmem:[#allocation8 + $0x38] sm:$0xff]  ;;  %v4487_v10 = vpack.c.bf16 %v137_v7, %v135_v5  ;;  %v139_v12 = vld [vmem:[#allocation8 + $0x20] sm:$0xff]  ;;  %v5389_v29 = vshrl.u32 %v145_v28, 7  ;;  %s5183_s25 = smov 96   ;;  %vm445_vm3 = vcmask 516352  }
  0x83   :  { %v4489_v11 = vpack.c.bf16 %v142_v9, %v140_v8  ;;  %v141_v13 = vld [vmem:[#allocation8 + $0x30] sm:$0xff]  ;;  %v232_v14 = vld [vmem:[#allocation10] sm:$0xff]  ;;  %v233_v15 = vld [vmem:[#allocation10 + $0x8] sm:$0xff]  ;;  %vm1988_vm4 = vcmask 523264   ;;  %s5185_s12 = smov [#allocation17]   ;;  %vm3881_vm5 = vcmask 57344  }
  0x84   :  { %4486 = vmatprep.subr.bf16.mxu0 %v4485_v6  ;;  %v4491_v16 = vpack.c.bf16 %v141_v13, %v139_v12  ;;  %v5355_v17 = vpack.c.bf16 %v233_v15, %v232_v14  ;;  %v234_v18 = vld [vmem:[#allocation10 + $0x10] sm:$0xff]  ;;  %v235_v19 = vld [vmem:[#allocation10 + $0x18] sm:$0xff]  ;;  %v309_v20 = vld [vmem:[#allocation11] sm:$0xff]  ;;  %v5392_v30 = vsub.s32 0, %v5389_v29  ;;  %v151_v32 = vsub.s32 1, %v5389_v29  ;;  %s3889_s13 = sshll.u32 %s5185_s12, 4  ;;  %s3890_s13 = int_to_ptr.vmem [resolvable:$true] %s3889_s13 }
  0x85   :  { %4488 = vmatpush1.bf16.msra.mxu0 %v4487_v10  ;;  %v310_v21 = vld [vmem:[#allocation11 + $0x8] sm:$0xff]  ;;  %v5358_v22 = vpack.c.bf16 %v235_v19, %v234_v18  ;;  %v134_v23 = vld [vmem:[#allocation5] sm:$0xff]  ;;  %v311_v25 = vld [vmem:[#allocation11 + $0x10] sm:$0xff]  ;;  %s5139_s6 = scalar_lea.vmem %s3890_s13, 32  ;;  %p5140_p1 = scmp.lt.s32.totalorder %s3890_s13, %s3890_s13 }
  0x86   :  { %4490 = vmatprep.subr.bf16.mxu0 %v4489_v11  ;;  %4495 = vmatpush3.bf16.msra.mxu1 %v5355_v17  ;;  %v5361_v24 = vpack.c.bf16 %v310_v21, %v309_v20  ;;  %v312_v26 = vld [vmem:[#allocation11 + $0x18] sm:$0xff] }
  0x87   :  { %4496 = vmatprep.subr.bf16.mxu1 %v5179_v2  ;;  %v5368_v27 = vpack.c.bf16 %v312_v26, %v311_v25  ;;  %v143_v31 = vld [vmem:[%s5925_s4] sm:$0x3]  ;;  %s5181_s4 = smov 32  }
  0x88   :  { %v148_v33 = vrot.slane %v143_v31, %v5392_v30  ;;  %v152_v34 = vrot.slane %v143_v31, %v151_v32 }
  0x89   :  { %4492 = vmatpush1.bf16.msra.mxu0 %v4491_v16 }
  0x8a   :  { %4499 = vmatprep.subr.bf16.mxu0 %v5179_v2  ;;  %4498 = vmatpush3.bf16.msra.mxu1 %v5358_v22 }
  0x8b   :  { %4505 = vmatprep.subr.bf16.mxu1 %v5179_v2 }
  0x8c   :  { %3901 = vmatmul.mubr.msk.f32.vlgmr.msra.gmra.mrb[0].mxu0 %vm155_vm1, %v134_v23 }
  0x8d   :  { %4501 = vmatpush3.bf16.msra.mxu0 %v5361_v24  ;;  %4147 = vmatprep.mubr.msk.f32.mxu0 %vm5180_vm0, %v5178_v1 }
  0x8e   :  { %4502 = vmatprep.subr.bf16.mxu0 %v5179_v2  ;;  %4137 = vmatmul.mubr.f32.vlgmr.msra.gmra.mrb[0].mxu1 %v5178_v1 }
  0x8f   :  { %4507 = vmatpush3.bf16.msra.mxu1 %v5355_v17  ;;  %4158 = vmatprep.mubr.msk.f32.mxu1 %vm5180_vm0, %v5178_v1 }
  0x90   :  { %4508 = vmatprep.subr.bf16.mxu1 %v5179_v2 }
  0x91   :  { %4504 = vmatpush3.bf16.msra.mxu0 %v5368_v27 }
  0x92   :  { %4511 = vmatprep.subr.bf16.mxu0 %v5179_v2 }
  0x93   :  { %4510 = vmatpush3.bf16.msra.mxu1 %v5358_v22 }
  0x94   :  { %4148 = vmatmul.mubr.f32.vlgmr.msra.gmra.mrb[2].mxu0 %v5178_v1  ;;  %4517 = vmatprep.subr.bf16.mxu1 %v5179_v2 }
  0x95   :  { %4513 = vmatpush3.bf16.msra.mxu0 %v5361_v24  ;;  %4169 = vmatprep.mubr.msk.f32.mxu0 %vm5180_vm0, %v5178_v1 }
  0x96   :  { %4514 = vmatprep.subr.bf16.mxu0 %v5179_v2 }
  0x99   :  { %4516 = vmatpush3.bf16.msra.mxu0 %v5368_v27 }
  0x9a   :  { %4523 = vmatprep.subr.bf16.mxu0 %v5179_v2 }
 0x15f   :  { %v225_v35 = vpop.f32.mrb[0].mxu0 }
 0x160   :  { %v226_v36 = vadd.f32 %v225_v35, %v148_v33  ;;  %v227_v37 = vpop.f32.mrb[1].mxu0 }
 0x161   :  { %v228_v38 = vadd.f32 %v227_v37, %v152_v34  ;;  %v305_v39 = vpop.f32.mrb[0].mxu1 }
 0x162   :  { %230 = vst [vmem:[#allocation2] sm:$0xff] %v226_v36  ;;  %v4138_v40 = vpop.f32.mrb[1].mxu1 }
 0x163   :  { %231 = vst [vmem:[#allocation2 + $0x8] sm:$0xff] %v228_v38 }
 0x167   :  { %v379_v41 = vpop.f32.mrb[2].mxu0 }
 0x168   :  { %v4149_v42 = vpop.f32.mrb[3].mxu0 }
 0x169   :  { %v383_v43 = vld [vmem:[#allocation2] ss:$0 sm:$0xff]  ;;  %v601_v14 = vld [vmem:[#allocation2 + $0x1] ss:$0 sm:$0xff] }
 0x16a   :  { %v384_v44 = vadd.f32 %v383_v43, %v305_v39  ;;  %v385_v45 = vld [vmem:[#allocation2 + $0xf] ss:$0 sm:$0xff]  ;;  %v603_v19 = vld [vmem:[#allocation2 + $0xe] ss:$0 sm:$0xff] }
 0x16b   :  { %v386_v46 = vadd.f32 %v385_v45, %v379_v41 }
 0x16c   :  { %4721 = vtanh.f32 %v384_v44  ;;  %v3902_v49 = vmul.f32 -1.442695, %v384_v44 }
 0x16d   :  { %4723 = vtanh.f32 %v386_v46  ;;  %v3903_v50 = vmul.f32 -1.442695, %v386_v46 }
 0x16e   :  { %4725 = vpow2.f32 %v3902_v49 }
 0x16f   :  { %4727 = vpow2.f32 %v3903_v50 }
 0x176   :  { %v4722_v47 = vpop.eup %4721 }
 0x177   :  { %403 = vrot.lane.b32.xlu0 %v4722_v47, %s5181_s4  ;;  %v4724_v48 = vpop.eup %4723 }
 0x178   :  { %v4726_v51 = vpop.eup %4725 }
 0x179   :  { %v390_v52 = vadd.f32 1.0, %v4726_v51  ;;  %v4728_v53 = vpop.eup %4727 }
 0x17a   :  { %v397_v54 = vadd.f32 1.0, %v4728_v53 }
 0x17b   :  { %420 = vrot.lane.b32.xlu0 %v4724_v48, %s5181_s4  ;;  %4729 = vrcp.f32 %v390_v52 }
 0x17c   :  { %4731 = vrcp.f32 %v397_v54 }
 0x185   :  { %v4730_v55 = vpop.eup %4729 }
 0x186   :  { %v4732_v58 = vpop.eup %4731  ;;  %v401_v61 = vmul.f32 0.0, %v4730_v55 }
 0x187   :  { %v418_v0 = vmul.f32 0.0, %v4732_v58 }
 0x1e9   :  { %v404_v56 = vpop.permute.xlu0 %403 }
 0x1ea   :  { %v406_v57 = vmul.f32 %v4730_v55, %v404_v56 }
 0x1ec   :  { %408 = vrot.lane.b32.xlu1 %v406_v57, %s5181_s4  ;;  %v817_v57 = vld [vmem:[#allocation2 + $0x2] ss:$0 sm:$0xff] }
 0x1ed   :  { %v421_v59 = vpop.permute.xlu0 %420 }
 0x1ee   :  { %v423_v60 = vmul.f32 %v4732_v58, %v421_v59 }
 0x1f0   :  { %425 = vrot.lane.b32.xlu1 %v423_v60, %s5181_s4 }
 0x25e   :  { %v409_v62 = vpop.permute.xlu1 %408 }
 0x25f   :  { %v5405_v63 = vadd.f32 %v409_v62, %v401_v61  ;;  %v819_v61 = vld [vmem:[#allocation2 + $0xd] ss:$0 sm:$0xff] }
 0x261   :  { %4733 = vtanh.f32 %v5405_v63 }
 0x262   :  { %v426_v3 = vpop.permute.xlu1 %425 }
 0x263   :  { %v5408_v4 = vadd.f32 %v426_v3, %v418_v0 }
 0x265   :  { %4735 = vtanh.f32 %v5408_v4 }
 0x26b   :  { %v4734_v5 = vpop.eup %4733 }
 0x26c   :  { %414 = vrot.lane.b32.xlu0 %v4734_v5, %s5181_s4 }
 0x26f   :  { %v4736_v6 = vpop.eup %4735 }
 0x270   :  { %431 = vrot.lane.b32.xlu1 %v4736_v6, %s5181_s4 }
 0x2de   :  { %v415_v7 = vpop.permute.xlu0 %414 }
 0x2df   :  { %v417_v8 = vmul.f32 %v4730_v55, %v415_v7 }
 0x2e1   :  { %436 = vrot.lane.b32.xlu0 %v417_v8, %s5182_s20 }
 0x2e2   :  { %v432_v9 = vpop.permute.xlu1 %431 }
 0x2e3   :  { %v5414_v10 = vmul.f32 %v4732_v58, %v432_v9 }
 0x2e5   :  { %527 = vrot.lane.b32.xlu1 %v5414_v10, %s5182_s20 }
 0x353   :  { %v437_v11 = vpop.permute.xlu0 %436 }
 0x354   :  { %440 = vst.msk [vmem:[#allocation3] sm:$0x1] %vm439_vm2, %v437_v11  ;;  %4159 = vmatmul.mubr.msk.f32.vlgmr.msra.gmra.mrb[2].mxu1 %vm155_vm1, %v437_v11 }
 0x355   :  { %4519 = vmatpush3.bf16.msra.mxu1 %v5355_v17  ;;  %4180 = vmatprep.mubr.msk.f32.mxu1 %vm5180_vm0, %v5178_v1 }
 0x356   :  { %4520 = vmatprep.subr.bf16.mxu1 %v5179_v2 }
 0x357   :  { %v528_v12 = vpop.permute.xlu1 %527 }
 0x358   :  { %4170 = vmatmul.mubr.msk.f32.vlgmr.msra.gmra.mrb[4].mxu0 %vm155_vm1, %v528_v12 }
 0x359   :  { %4522 = vmatpush3.bf16.msra.mxu1 %v5358_v22  ;;  %4525 = vmatpush3.bf16.msra.mxu0 %v5361_v24 }
 0x35a   :  { %4526 = vmatprep.subr.bf16.mxu0 %v5179_v2  ;;  %4191 = vmatprep.mubr.msk.f32.mxu0 %vm5180_vm0, %v5178_v1 }
 0x35b   :  { %4529 = vmatprep.subr.bf16.mxu1 %v5179_v2 }
 0x35d   :  { %4528 = vmatpush3.bf16.msra.mxu0 %v5368_v27 }
 0x35e   :  { %4535 = vmatprep.subr.bf16.mxu0 %v5179_v2 }
 0x427   :  { %v519_v13 = vpop.f32.mrb[2].mxu1 }
 0x428   :  { %v602_v15 = vadd.f32 %v601_v14, %v519_v13  ;;  %v4160_v16 = vpop.f32.mrb[3].mxu1 }
 0x42a   :  { %4737 = vtanh.f32 %v602_v15  ;;  %v3906_v26 = vmul.f32 -1.442695, %v602_v15 }
 0x42b   :  { %v597_v18 = vpop.f32.mrb[4].mxu0 }
 0x42c   :  { %v604_v20 = vadd.f32 %v603_v19, %v597_v18  ;;  %v4171_v21 = vpop.f32.mrb[5].mxu0 }
 0x42e   :  { %4739 = vtanh.f32 %v604_v20  ;;  %v3907_v28 = vmul.f32 -1.442695, %v604_v20 }
 0x42f   :  { %4741 = vpow2.f32 %v3906_v26 }
 0x430   :  { %4743 = vpow2.f32 %v3907_v28 }
 0x434   :  { %v4738_v23 = vpop.eup %4737 }
 0x435   :  { %621 = vrot.lane.b32.xlu0 %v4738_v23, %s5181_s4 }
 0x438   :  { %v4740_v25 = vpop.eup %4739 }
 0x439   :  { %638 = vrot.lane.b32.xlu1 %v4740_v25, %s5181_s4  ;;  %v4742_v31 = vpop.eup %4741 }
 0x43a   :  { %v608_v33 = vadd.f32 1.0, %v4742_v31  ;;  %v4744_v34 = vpop.eup %4743 }
 0x43b   :  { %v615_v35 = vadd.f32 1.0, %v4744_v34 }
 0x43c   :  { %4745 = vrcp.f32 %v608_v33 }
 0x43d   :  { %4747 = vrcp.f32 %v615_v35 }
 0x446   :  { %v4746_v36 = vpop.eup %4745 }
 0x447   :  { %v4748_v39 = vpop.eup %4747  ;;  %v619_v42 = vmul.f32 %v4746_v36, %v5405_v63 }
 0x448   :  { %v636_v45 = vmul.f32 %v4748_v39, %v5408_v4 }
 0x4a7   :  { %v622_v37 = vpop.permute.xlu0 %621 }
 0x4a8   :  { %v624_v38 = vmul.f32 %v4746_v36, %v622_v37 }
 0x4aa   :  { %626 = vrot.lane.b32.xlu0 %v624_v38, %s5181_s4 }
 0x4ab   :  { %v639_v40 = vpop.permute.xlu1 %638 }
 0x4ac   :  { %v641_v41 = vmul.f32 %v4748_v39, %v639_v40 }
 0x4ae   :  { %643 = vrot.lane.b32.xlu1 %v641_v41, %s5181_s4 }
 0x51c   :  { %v627_v43 = vpop.permute.xlu0 %626 }
 0x51d   :  { %v5438_v44 = vadd.f32 %v627_v43, %v619_v42  ;;  %v1035_v43 = vld [vmem:[#allocation2 + $0xc] ss:$0 sm:$0xff] }
 0x51f   :  { %4749 = vtanh.f32 %v5438_v44 }
 0x520   :  { %v644_v46 = vpop.permute.xlu1 %643 }
 0x521   :  { %v5442_v47 = vadd.f32 %v644_v46, %v636_v45 }
 0x523   :  { %4751 = vtanh.f32 %v5442_v47 }
 0x529   :  { %v4750_v48 = vpop.eup %4749 }
 0x52a   :  { %632 = vrot.lane.b32.xlu0 %v4750_v48, %s5181_s4 }
 0x52d   :  { %v4752_v49 = vpop.eup %4751 }
 0x52e   :  { %649 = vrot.lane.b32.xlu1 %v4752_v49, %s5181_s4 }
 0x59c   :  { %v633_v50 = vpop.permute.xlu0 %632 }
 0x59d   :  { %v635_v51 = vmul.f32 %v4746_v36, %v633_v50 }
 0x59f   :  { %654 = vrot.lane.b32.xlu0 %v635_v51, %s5182_s20 }
 0x5a0   :  { %v650_v52 = vpop.permute.xlu1 %649 }
 0x5a1   :  { %v5448_v53 = vmul.f32 %v4748_v39, %v650_v52  ;;  %v1033_v39 = vld [vmem:[#allocation2 + $0x3] ss:$0 sm:$0xff] }
 0x5a3   :  { %743 = vrot.lane.b32.xlu1 %v5448_v53, %s5182_s20 }
 0x611   :  { %v655_v54 = vpop.permute.xlu0 %654 }
 0x612   :  { %657 = vst.msk [vmem:[#allocation3 + $0x1] sm:$0x1] %vm439_vm2, %v655_v54  ;;  %4181 = vmatmul.mubr.msk.f32.vlgmr.msra.gmra.mrb[4].mxu1 %vm155_vm1, %v655_v54 }
 0x613   :  { %4531 = vmatpush3.bf16.msra.mxu1 %v5355_v17  ;;  %4202 = vmatprep.mubr.msk.f32.mxu1 %vm5180_vm0, %v5178_v1 }
 0x614   :  { %4532 = vmatprep.subr.bf16.mxu1 %v5179_v2 }
 0x615   :  { %v744_v55 = vpop.permute.xlu1 %743 }
 0x616   :  { %4192 = vmatmul.mubr.msk.f32.vlgmr.msra.gmra.mrb[6].mxu0 %vm155_vm1, %v744_v55 }
 0x617   :  { %4534 = vmatpush3.bf16.msra.mxu1 %v5358_v22  ;;  %4537 = vmatpush3.bf16.msra.mxu0 %v5361_v24 }
 0x618   :  { %4538 = vmatprep.subr.bf16.mxu0 %v5179_v2  ;;  %4213 = vmatprep.mubr.msk.f32.mxu0 %vm5180_vm0, %v5178_v1 }
 0x619   :  { %4541 = vmatprep.subr.bf16.mxu1 %v5179_v2 }
 0x61b   :  { %4540 = vmatpush3.bf16.msra.mxu0 %v5368_v27 }
 0x61c   :  { %4547 = vmatprep.subr.bf16.mxu0 %v5179_v2 }
 0x6e5   :  { %v735_v56 = vpop.f32.mrb[4].mxu1 }
 0x6e6   :  { %v818_v58 = vadd.f32 %v817_v57, %v735_v56  ;;  %v4182_v59 = vpop.f32.mrb[5].mxu1 }
 0x6e8   :  { %4753 = vtanh.f32 %v818_v58  ;;  %v3910_v4 = vmul.f32 -1.442695, %v818_v58 }
 0x6e9   :  { %v813_v60 = vpop.f32.mrb[6].mxu0 }
 0x6ea   :  { %v820_v62 = vadd.f32 %v819_v61, %v813_v60  ;;  %v4193_v63 = vpop.f32.mrb[7].mxu0 }
 0x6ec   :  { %4755 = vtanh.f32 %v820_v62  ;;  %v3911_v5 = vmul.f32 -1.442695, %v820_v62 }
 0x6ed   :  { %4757 = vpow2.f32 %v3910_v4 }
 0x6ee   :  { %4759 = vpow2.f32 %v3911_v5 }
 0x6f2   :  { %v4754_v0 = vpop.eup %4753 }
 0x6f3   :  { %837 = vrot.lane.b32.xlu0 %v4754_v0, %s5181_s4 }
 0x6f6   :  { %v4756_v3 = vpop.eup %4755 }
 0x6f7   :  { %854 = vrot.lane.b32.xlu1 %v4756_v3, %s5181_s4  ;;  %v4758_v6 = vpop.eup %4757 }
 0x6f8   :  { %v824_v7 = vadd.f32 1.0, %v4758_v6  ;;  %v4760_v8 = vpop.eup %4759 }
 0x6f9   :  { %v831_v9 = vadd.f32 1.0, %v4760_v8 }
 0x6fa   :  { %4761 = vrcp.f32 %v824_v7 }
 0x6fb   :  { %4763 = vrcp.f32 %v831_v9 }
 0x704   :  { %v4762_v11 = vpop.eup %4761 }
 0x705   :  { %v4764_v14 = vpop.eup %4763  ;;  %v835_v18 = vmul.f32 %v4762_v11, %v5438_v44 }
 0x706   :  { %v852_v21 = vmul.f32 %v4764_v14, %v5442_v47 }
 0x765   :  { %v838_v12 = vpop.permute.xlu0 %837 }
 0x766   :  { %v840_v13 = vmul.f32 %v4762_v11, %v838_v12 }
 0x768   :  { %842 = vrot.lane.b32.xlu0 %v840_v13, %s5181_s4 }
 0x769   :  { %v855_v15 = vpop.permute.xlu1 %854 }
 0x76a   :  { %v857_v16 = vmul.f32 %v4764_v14, %v855_v15  ;;  %v1249_v15 = vld [vmem:[#allocation2 + $0x4] ss:$0 sm:$0xff] }
 0x76c   :  { %859 = vrot.lane.b32.xlu1 %v857_v16, %s5181_s4 }
 0x7da   :  { %v843_v19 = vpop.permute.xlu0 %842 }
 0x7db   :  { %v5472_v20 = vadd.f32 %v843_v19, %v835_v18 }
 0x7dd   :  { %4765 = vtanh.f32 %v5472_v20 }
 0x7de   :  { %v860_v23 = vpop.permute.xlu1 %859 }
 0x7df   :  { %v5476_v25 = vadd.f32 %v860_v23, %v852_v21 }
 0x7e1   :  { %4767 = vtanh.f32 %v5476_v25 }
 0x7e7   :  { %v4766_v26 = vpop.eup %4765 }
 0x7e8   :  { %848 = vrot.lane.b32.xlu0 %v4766_v26, %s5181_s4 }
 0x7eb   :  { %v4768_v28 = vpop.eup %4767 }
 0x7ec   :  { %865 = vrot.lane.b32.xlu1 %v4768_v28, %s5181_s4 }
 0x85a   :  { %v849_v31 = vpop.permute.xlu0 %848 }
 0x85b   :  { %v851_v33 = vmul.f32 %v4762_v11, %v849_v31 }
 0x85d   :  { %870 = vrot.lane.b32.xlu0 %v851_v33, %s5182_s20 }
 0x85e   :  { %v866_v34 = vpop.permute.xlu1 %865 }
 0x85f   :  { %v5482_v35 = vmul.f32 %v4764_v14, %v866_v34 }
 0x861   :  { %959 = vrot.lane.b32.xlu1 %v5482_v35, %s5182_s20 }
 0x8cf   :  { %v871_v36 = vpop.permute.xlu0 %870 }
 0x8d0   :  { %873 = vst.msk [vmem:[#allocation3 + $0x2] sm:$0x1] %vm439_vm2, %v871_v36  ;;  %4203 = vmatmul.mubr.msk.f32.vlgmr.msra.gmra.mrb[6].mxu1 %vm155_vm1, %v871_v36 }
 0x8d1   :  { %4543 = vmatpush3.bf16.msra.mxu1 %v5355_v17  ;;  %4224 = vmatprep.mubr.msk.f32.mxu1 %vm5180_vm0, %v5178_v1 }
 0x8d2   :  { %4544 = vmatprep.subr.bf16.mxu1 %v5179_v2 }
 0x8d3   :  { %v960_v37 = vpop.permute.xlu1 %959 }
 0x8d4   :  { %4214 = vmatmul.mubr.msk.f32.vlgmr.msra.gmra.mrb[8].mxu0 %vm155_vm1, %v960_v37 }
 0x8d5   :  { %4546 = vmatpush3.bf16.msra.mxu1 %v5358_v22  ;;  %4549 = vmatpush3.bf16.msra.mxu0 %v5361_v24 }
 0x8d6   :  { %4550 = vmatprep.subr.bf16.mxu0 %v5179_v2  ;;  %4235 = vmatprep.mubr.msk.f32.mxu0 %vm5180_vm0, %v5178_v1 }
 0x8d7   :  { %4553 = vmatprep.subr.bf16.mxu1 %v5179_v2 }
 0x8d9   :  { %4552 = vmatpush3.bf16.msra.mxu0 %v5368_v27 }
 0x8da   :  { %4559 = vmatprep.subr.bf16.mxu0 %v5179_v2 }
 0x9a3   :  { %v951_v38 = vpop.f32.mrb[6].mxu1 }
 0x9a4   :  { %v1034_v40 = vadd.f32 %v1033_v39, %v951_v38  ;;  %v4204_v41 = vpop.f32.mrb[7].mxu1 }
 0x9a6   :  { %4769 = vtanh.f32 %v1034_v40  ;;  %v3914_v48 = vmul.f32 -1.442695, %v1034_v40 }
 0x9a7   :  { %v1029_v42 = vpop.f32.mrb[8].mxu0 }
 0x9a8   :  { %v1036_v44 = vadd.f32 %v1035_v43, %v1029_v42  ;;  %v4215_v45 = vpop.f32.mrb[9].mxu0 }
 0x9aa   :  { %4771 = vtanh.f32 %v1036_v44  ;;  %v3915_v49 = vmul.f32 -1.442695, %v1036_v44 }
 0x9ab   :  { %4773 = vpow2.f32 %v3914_v48 }
 0x9ac   :  { %4775 = vpow2.f32 %v3915_v49 }
 0x9b0   :  { %v4770_v46 = vpop.eup %4769 }
 0x9b1   :  { %1053 = vrot.lane.b32.xlu0 %v4770_v46, %s5181_s4 }
 0x9b4   :  { %v4772_v47 = vpop.eup %4771 }
 0x9b5   :  { %1070 = vrot.lane.b32.xlu1 %v4772_v47, %s5181_s4  ;;  %v4774_v50 = vpop.eup %4773 }
 0x9b6   :  { %v1040_v51 = vadd.f32 1.0, %v4774_v50  ;;  %v4776_v52 = vpop.eup %4775 }
 0x9b7   :  { %v1047_v54 = vadd.f32 1.0, %v4776_v52 }
 0x9b8   :  { %4777 = vrcp.f32 %v1040_v51 }
 0x9b9   :  { %4779 = vrcp.f32 %v1047_v54 }
 0x9c2   :  { %v4778_v55 = vpop.eup %4777 }
 0x9c3   :  { %v4780_v58 = vpop.eup %4779  ;;  %v1051_v61 = vmul.f32 %v4778_v55, %v5472_v20  ;;  %v1251_v20 = vld [vmem:[#allocation2 + $0xb] ss:$0 sm:$0xff] }
 0x9c4   :  { %v1068_v0 = vmul.f32 %v4780_v58, %v5476_v25 }
 0xa23   :  { %v1054_v56 = vpop.permute.xlu0 %1053 }
 0xa24   :  { %v1056_v57 = vmul.f32 %v4778_v55, %v1054_v56 }
 0xa26   :  { %1058 = vrot.lane.b32.xlu0 %v1056_v57, %s5181_s4 }
 0xa27   :  { %v1071_v59 = vpop.permute.xlu1 %1070 }
 0xa28   :  { %v1073_v60 = vmul.f32 %v4780_v58, %v1071_v59 }
 0xa2a   :  { %1075 = vrot.lane.b32.xlu1 %v1073_v60, %s5181_s4  ;;  %v1465_v60 = vld [vmem:[#allocation2 + $0x5] ss:$0 sm:$0xff] }
 0xa98   :  { %v1059_v62 = vpop.permute.xlu0 %1058 }
 0xa99   :  { %v5506_v63 = vadd.f32 %v1059_v62, %v1051_v61 }
 0xa9b   :  { %4781 = vtanh.f32 %v5506_v63 }
 0xa9c   :  { %v1076_v3 = vpop.permute.xlu1 %1075 }
 0xa9d   :  { %v5510_v4 = vadd.f32 %v1076_v3, %v1068_v0  ;;  %v1467_v0 = vld [vmem:[#allocation2 + $0xa] ss:$0 sm:$0xff] }
 0xa9f   :  { %4783 = vtanh.f32 %v5510_v4 }
 0xaa5   :  { %v4782_v5 = vpop.eup %4781 }
 0xaa6   :  { %1064 = vrot.lane.b32.xlu0 %v4782_v5, %s5181_s4 }
 0xaa9   :  { %v4784_v6 = vpop.eup %4783 }
 0xaaa   :  { %1081 = vrot.lane.b32.xlu1 %v4784_v6, %s5181_s4 }
 0xb18   :  { %v1065_v7 = vpop.permute.xlu0 %1064 }
 0xb19   :  { %v1067_v8 = vmul.f32 %v4778_v55, %v1065_v7 }
 0xb1b   :  { %1086 = vrot.lane.b32.xlu0 %v1067_v8, %s5182_s20 }
 0xb1c   :  { %v1082_v9 = vpop.permute.xlu1 %1081 }
 0xb1d   :  { %v5516_v11 = vmul.f32 %v4780_v58, %v1082_v9 }
 0xb1f   :  { %1175 = vrot.lane.b32.xlu1 %v5516_v11, %s5182_s20 }
 0xb8d   :  { %v1087_v12 = vpop.permute.xlu0 %1086 }
 0xb8e   :  { %1089 = vst.msk [vmem:[#allocation3 + $0x3] sm:$0x1] %vm439_vm2, %v1087_v12  ;;  %4225 = vmatmul.mubr.msk.f32.vlgmr.msra.gmra.mrb[8].mxu1 %vm155_vm1, %v1087_v12 }
 0xb8f   :  { %4555 = vmatpush3.bf16.msra.mxu1 %v5355_v17  ;;  %4246 = vmatprep.mubr.msk.f32.mxu1 %vm5180_vm0, %v5178_v1 }
 0xb90   :  { %4556 = vmatprep.subr.bf16.mxu1 %v5179_v2 }
 0xb91   :  { %v1176_v13 = vpop.permute.xlu1 %1175 }
 0xb92   :  { %4236 = vmatmul.mubr.msk.f32.vlgmr.msra.gmra.mrb[10].mxu0 %vm155_vm1, %v1176_v13 }
 0xb93   :  { %4558 = vmatpush3.bf16.msra.mxu1 %v5358_v22  ;;  %4561 = vmatpush3.bf16.msra.mxu0 %v5361_v24 }
 0xb94   :  { %4562 = vmatprep.subr.bf16.mxu0 %v5179_v2  ;;  %4257 = vmatprep.mubr.msk.f32.mxu0 %vm5180_vm0, %v5178_v1 }
 0xb95   :  { %4565 = vmatprep.subr.bf16.mxu1 %v5179_v2 }
 0xb97   :  { %4564 = vmatpush3.bf16.msra.mxu0 %v5368_v27 }
 0xb98   :  { %4571 = vmatprep.subr.bf16.mxu0 %v5179_v2 }
 0xc61   :  { %v1167_v14 = vpop.f32.mrb[8].mxu1 }
 0xc62   :  { %v1250_v16 = vadd.f32 %v1249_v15, %v1167_v14  ;;  %v4226_v18 = vpop.f32.mrb[9].mxu1 }
 0xc64   :  { %4785 = vtanh.f32 %v1250_v16  ;;  %v3918_v28 = vmul.f32 -1.442695, %v1250_v16 }
 0xc65   :  { %v1245_v19 = vpop.f32.mrb[10].mxu0 }
 0xc66   :  { %v1252_v21 = vadd.f32 %v1251_v20, %v1245_v19  ;;  %v4237_v23 = vpop.f32.mrb[11].mxu0 }
 0xc68   :  { %4787 = vtanh.f32 %v1252_v21  ;;  %v3919_v31 = vmul.f32 -1.442695, %v1252_v21 }
 0xc69   :  { %4789 = vpow2.f32 %v3918_v28 }
 0xc6a   :  { %4791 = vpow2.f32 %v3919_v31 }
 0xc6e   :  { %v4786_v25 = vpop.eup %4785 }
 0xc6f   :  { %1269 = vrot.lane.b32.xlu0 %v4786_v25, %s5181_s4 }
 0xc72   :  { %v4788_v26 = vpop.eup %4787 }
 0xc73   :  { %1286 = vrot.lane.b32.xlu1 %v4788_v26, %s5181_s4  ;;  %v4790_v33 = vpop.eup %4789 }
 0xc74   :  { %v1256_v34 = vadd.f32 1.0, %v4790_v33  ;;  %v4792_v36 = vpop.eup %4791 }
 0xc75   :  { %v1263_v37 = vadd.f32 1.0, %v4792_v36 }
 0xc76   :  { %4793 = vrcp.f32 %v1256_v34 }
 0xc77   :  { %4795 = vrcp.f32 %v1263_v37 }
 0xc80   :  { %v4794_v38 = vpop.eup %4793 }
 0xc81   :  { %v4796_v41 = vpop.eup %4795  ;;  %v1267_v44 = vmul.f32 %v4794_v38, %v5506_v63 }
 0xc82   :  { %v1284_v47 = vmul.f32 %v4796_v41, %v5510_v4 }
 0xce1   :  { %v1270_v39 = vpop.permute.xlu0 %1269 }
 0xce2   :  { %v1272_v40 = vmul.f32 %v4794_v38, %v1270_v39 }
 0xce4   :  { %1274 = vrot.lane.b32.xlu0 %v1272_v40, %s5181_s4 }
 0xce5   :  { %v1287_v42 = vpop.permute.xlu1 %1286 }
 0xce6   :  { %v1289_v43 = vmul.f32 %v4796_v41, %v1287_v42 }
 0xce8   :  { %1291 = vrot.lane.b32.xlu1 %v1289_v43, %s5181_s4  ;;  %v1681_v43 = vld [vmem:[#allocation2 + $0x6] ss:$0 sm:$0xff] }
 0xd56   :  { %v1275_v45 = vpop.permute.xlu0 %1274 }
 0xd57   :  { %v1277_v46 = vadd.f32 %v1275_v45, %v1267_v44 }
 0xd59   :  { %4797 = vtanh.f32 %v1277_v46 }
 0xd5a   :  { %v1292_v48 = vpop.permute.xlu1 %1291 }
 0xd5b   :  { %v1294_v49 = vadd.f32 %v1292_v48, %v1284_v47  ;;  %v1683_v47 = vld [vmem:[#allocation2 + $0x9] ss:$0 sm:$0xff] }
 0xd5d   :  { %4799 = vtanh.f32 %v1294_v49 }
 0xd63   :  { %v4798_v50 = vpop.eup %4797 }
 0xd64   :  { %1280 = vrot.lane.b32.xlu0 %v4798_v50, %s5181_s4 }
 0xd67   :  { %v4800_v51 = vpop.eup %4799 }
 0xd68   :  { %1297 = vrot.lane.b32.xlu1 %v4800_v51, %s5181_s4 }
 0xdd6   :  { %v1281_v52 = vpop.permute.xlu0 %1280 }
 0xdd7   :  { %v1283_v54 = vmul.f32 %v4794_v38, %v1281_v52 }
 0xdd9   :  { %1302 = vrot.lane.b32.xlu0 %v1283_v54, %s5182_s20 }
 0xdda   :  { %v1298_v55 = vpop.permute.xlu1 %1297 }
 0xddb   :  { %v5544_v56 = vmul.f32 %v4796_v41, %v1298_v55 }
 0xddd   :  { %1391 = vrot.lane.b32.xlu1 %v5544_v56, %s5182_s20 }
 0xe4b   :  { %v5548_v57 = vpop.permute.xlu0 %1302 }
 0xe4c   :  { %4247 = vmatmul.mubr.msk.f32.vlgmr.msra.gmra.mrb[10].mxu1 %vm155_vm1, %v5548_v57 }
 0xe4d   :  { %4567 = vmatpush3.bf16.msra.mxu1 %v5355_v17  ;;  %4268 = vmatprep.mubr.msk.f32.mxu1 %vm5180_vm0, %v5178_v1 }
 0xe4e   :  { %4568 = vmatprep.subr.bf16.mxu1 %v5179_v2 }
 0xe4f   :  { %v1392_v58 = vpop.permute.xlu1 %1391 }
 0xe50   :  { %4258 = vmatmul.mubr.msk.f32.vlgmr.msra.gmra.mrb[12].mxu0 %vm155_vm1, %v1392_v58 }
 0xe51   :  { %4570 = vmatpush3.bf16.msra.mxu1 %v5358_v22  ;;  %4573 = vmatpush3.bf16.msra.mxu0 %v5361_v24 }
 0xe52   :  { %4574 = vmatprep.subr.bf16.mxu0 %v5179_v2  ;;  %4279 = vmatprep.mubr.msk.f32.mxu0 %vm5180_vm0, %v5178_v1 }
 0xe53   :  { %4577 = vmatprep.subr.bf16.mxu1 %v5179_v2 }
 0xe55   :  { %4576 = vmatpush3.bf16.msra.mxu0 %v5368_v27 }
 0xe56   :  { %4583 = vmatprep.subr.bf16.mxu0 %v5179_v2 }
 0xf1f   :  { %v1383_v59 = vpop.f32.mrb[10].mxu1 }
 0xf20   :  { %v1466_v61 = vadd.f32 %v1465_v60, %v1383_v59  ;;  %v4248_v62 = vpop.f32.mrb[11].mxu1 }
 0xf22   :  { %4801 = vtanh.f32 %v1466_v61  ;;  %v3922_v7 = vmul.f32 -1.442695, %v1466_v61 }
 0xf23   :  { %v1461_v63 = vpop.f32.mrb[12].mxu0 }
 0xf24   :  { %v1468_v3 = vadd.f32 %v1467_v0, %v1461_v63  ;;  %v4259_v4 = vpop.f32.mrb[13].mxu0 }
 0xf26   :  { %4803 = vtanh.f32 %v1468_v3  ;;  %v3923_v8 = vmul.f32 -1.442695, %v1468_v3 }
 0xf27   :  { %4805 = vpow2.f32 %v3922_v7 }
 0xf28   :  { %4807 = vpow2.f32 %v3923_v8 }
 0xf2c   :  { %v4802_v5 = vpop.eup %4801 }
 0xf2d   :  { %1485 = vrot.lane.b32.xlu0 %v4802_v5, %s5181_s4 }
 0xf30   :  { %v4804_v6 = vpop.eup %4803 }
 0xf31   :  { %1502 = vrot.lane.b32.xlu1 %v4804_v6, %s5181_s4  ;;  %v4806_v9 = vpop.eup %4805 }
 0xf32   :  { %v1472_v12 = vadd.f32 1.0, %v4806_v9  ;;  %v4808_v13 = vpop.eup %4807 }
 0xf33   :  { %v1479_v14 = vadd.f32 1.0, %v4808_v13 }
 0xf34   :  { %4809 = vrcp.f32 %v1472_v12 }
 0xf35   :  { %4811 = vrcp.f32 %v1479_v14 }
 0xf3e   :  { %v4810_v15 = vpop.eup %4809 }
 0xf3f   :  { %v4812_v19 = vpop.eup %4811  ;;  %v1483_v23 = vmul.f32 %v4810_v15, %v1277_v46 }
 0xf40   :  { %v1500_v28 = vmul.f32 %v4812_v19, %v1294_v49 }
 0xf9f   :  { %v1486_v16 = vpop.permute.xlu0 %1485 }
 0xfa0   :  { %v1488_v18 = vmul.f32 %v4810_v15, %v1486_v16 }
 0xfa2   :  { %1490 = vrot.lane.b32.xlu0 %v1488_v18, %s5181_s4 }
 0xfa3   :  { %v1503_v20 = vpop.permute.xlu1 %1502 }
 0xfa4   :  { %v1505_v21 = vmul.f32 %v4812_v19, %v1503_v20  ;;  %v1897_v20 = vld [vmem:[#allocation2 + $0x7] ss:$0 sm:$0xff] }
 0xfa6   :  { %1507 = vrot.lane.b32.xlu1 %v1505_v21, %s5181_s4 }
0x1014   :  { %v1491_v25 = vpop.permute.xlu0 %1490 }
0x1015   :  { %v1493_v26 = vadd.f32 %v1491_v25, %v1483_v23 }
0x1017   :  { %4813 = vtanh.f32 %v1493_v26 }
0x1018   :  { %v1508_v31 = vpop.permute.xlu1 %1507 }
0x1019   :  { %v1510_v33 = vadd.f32 %v1508_v31, %v1500_v28 }
0x101b   :  { %4815 = vtanh.f32 %v1510_v33 }
0x1021   :  { %v4814_v34 = vpop.eup %4813 }
0x1022   :  { %1496 = vrot.lane.b32.xlu0 %v4814_v34, %s5181_s4 }
0x1025   :  { %v4816_v36 = vpop.eup %4815 }
0x1026   :  { %1513 = vrot.lane.b32.xlu1 %v4816_v36, %s5181_s4 }
0x1094   :  { %v1497_v37 = vpop.permute.xlu0 %1496 }
0x1095   :  { %v1499_v38 = vmul.f32 %v4810_v15, %v1497_v37 }
0x1097   :  { %1518 = vrot.lane.b32.xlu0 %v1499_v38, %s5182_s20 }
0x1098   :  { %v1514_v39 = vpop.permute.xlu1 %1513 }
0x1099   :  { %v5572_v40 = vmul.f32 %v4812_v19, %v1514_v39 }
0x109b   :  { %1607 = vrot.lane.b32.xlu1 %v5572_v40, %s5182_s20 }
0x1109   :  { %v5576_v41 = vpop.permute.xlu0 %1518 }
0x110a   :  { %4269 = vmatmul.mubr.msk.f32.vlgmr.msra.gmra.mrb[12].mxu1 %vm155_vm1, %v5576_v41 }
0x110b   :  { %4579 = vmatpush3.bf16.msra.mxu1 %v5355_v17  ;;  %4290 = vmatprep.mubr.msk.f32.mxu1 %vm5180_vm0, %v5178_v1 }
0x110c   :  { %4580 = vmatprep.subr.bf16.mxu1 %v5179_v2 }
0x110d   :  { %v1608_v42 = vpop.permute.xlu1 %1607 }
0x110e   :  { %4280 = vmatmul.mubr.msk.f32.vlgmr.msra.gmra.mrb[14].mxu0 %vm155_vm1, %v1608_v42 }
0x110f   :  { %4582 = vmatpush3.bf16.msra.mxu1 %v5358_v22  ;;  %4585 = vmatpush3.bf16.msra.mxu0 %v5361_v24 }
0x1110   :  { %4586 = vmatprep.subr.bf16.mxu0 %v5179_v2  ;;  %4301 = vmatprep.mubr.msk.f32.mxu0 %vm5180_vm0, %v5178_v1 }
0x1113   :  { %4588 = vmatpush3.bf16.msra.mxu0 %v5368_v27 }
0x1114   :  { %4605 = vmatprep.subr.bf16.mxu0 %v5179_v2 }
0x11dd   :  { %v1599_v17 = vpop.f32.mrb[12].mxu1 }
0x11de   :  { %v1682_v44 = vadd.f32 %v1681_v43, %v1599_v17  ;;  %v4270_v45 = vpop.f32.mrb[13].mxu1 }
0x11e0   :  { %4817 = vtanh.f32 %v1682_v44  ;;  %v3926_v50 = vmul.f32 -1.442695, %v1682_v44 }
0x11e1   :  { %v1677_v46 = vpop.f32.mrb[14].mxu0 }
0x11e2   :  { %v1684_v48 = vadd.f32 %v1683_v47, %v1677_v46  ;;  %v4281_v22 = vpop.f32.mrb[15].mxu0 }
0x11e4   :  { %4819 = vtanh.f32 %v1684_v48  ;;  %v3927_v27 = vmul.f32 -1.442695, %v1684_v48 }
0x11e5   :  { %4821 = vpow2.f32 %v3926_v50 }
0x11e6   :  { %4823 = vpow2.f32 %v3927_v27 }
0x11ea   :  { %v4818_v24 = vpop.eup %4817 }
0x11eb   :  { %1701 = vrot.lane.b32.xlu0 %v4818_v24, %s5181_s4 }
0x11ee   :  { %v4820_v49 = vpop.eup %4819 }
0x11ef   :  { %1718 = vrot.lane.b32.xlu1 %v4820_v49, %s5181_s4  ;;  %v4822_v51 = vpop.eup %4821 }
0x11f0   :  { %v1688_v52 = vadd.f32 1.0, %v4822_v51  ;;  %v4824_v54 = vpop.eup %4823 }
0x11f1   :  { %v1695_v55 = vadd.f32 1.0, %v4824_v54 }
0x11f2   :  { %4825 = vrcp.f32 %v1688_v52 }
0x11f3   :  { %4827 = vrcp.f32 %v1695_v55  ;;  %v1961_v55 = vld [vmem:[#allocation13 + $0x8] sm:$0xff] }
0x11fc   :  { %v4826_v58 = vpop.eup %4825 }
0x11fd   :  { %v4828_v61 = vpop.eup %4827  ;;  %v1699_v0 = vmul.f32 %v4826_v58, %v1493_v26  ;;  %v1899_v26 = vld [vmem:[#allocation2 + $0x8] ss:$0 sm:$0xff] }
0x11fe   :  { %v1716_v5 = vmul.f32 %v4828_v61, %v1510_v33 }
0x125d   :  { %v1702_v59 = vpop.permute.xlu0 %1701 }
0x125e   :  { %v1704_v60 = vmul.f32 %v4826_v58, %v1702_v59  ;;  %v1960_v59 = vld [vmem:[#allocation13] sm:$0xff] }
0x1260   :  { %1706 = vrot.lane.b32.xlu0 %v1704_v60, %s5181_s4 }
0x1261   :  { %v1719_v62 = vpop.permute.xlu1 %1718 }
0x1262   :  { %v1721_v63 = vmul.f32 %v4828_v61, %v1719_v62 }
0x1264   :  { %1723 = vrot.lane.b32.xlu1 %v1721_v63, %s5181_s4  ;;  %v1967_v63 = vld [vmem:[#allocation13 + $0x38] sm:$0xff] }
0x12d2   :  { %v1707_v3 = vpop.permute.xlu0 %1706 }
0x12d3   :  { %v1709_v4 = vadd.f32 %v1707_v3, %v1699_v0  ;;  %v1964_v0 = vld [vmem:[#allocation13 + $0x20] sm:$0xff] }
0x12d5   :  { %4829 = vtanh.f32 %v1709_v4 }
0x12d6   :  { %v1724_v6 = vpop.permute.xlu1 %1723 }
0x12d7   :  { %v1726_v7 = vadd.f32 %v1724_v6, %v1716_v5  ;;  %v1971_v5 = vld [vmem:[#allocation13 + $0x58] sm:$0xff]  ;;  %v1968_v6 = vld [vmem:[#allocation13 + $0x40] sm:$0xff] }
0x12d9   :  { %4831 = vtanh.f32 %v1726_v7 }
0x12df   :  { %v4830_v8 = vpop.eup %4829 }
0x12e0   :  { %1712 = vrot.lane.b32.xlu0 %v4830_v8, %s5181_s4  ;;  %v2065_v8 = vld [vmem:[#allocation14] sm:$0xff] }
0x12e3   :  { %v4832_v9 = vpop.eup %4831 }
0x12e4   :  { %1729 = vrot.lane.b32.xlu1 %v4832_v9, %s5181_s4 }
0x1352   :  { %v1713_v12 = vpop.permute.xlu0 %1712 }
0x1353   :  { %v1715_v13 = vmul.f32 %v4826_v58, %v1713_v12  ;;  %v1963_v58 = vld [vmem:[#allocation13 + $0x18] sm:$0xff] }
0x1354   :  { %v4589_v60 = vpack.c.bf16 %v1963_v58, %v1961_v55 }
0x1355   :  { %1734 = vrot.lane.b32.xlu0 %v1715_v13, %s5182_s20  ;;  %v1973_v13 = vld [vmem:[#allocation13 + $0x68] sm:$0xff] }
0x1356   :  { %v1730_v14 = vpop.permute.xlu1 %1729  ;;  %4590 = vmatprep.subr.bf16.mxu1 %v4589_v60 }
0x1357   :  { %v5599_v15 = vmul.f32 %v4828_v61, %v1730_v14  ;;  %v1962_v61 = vld [vmem:[#allocation13 + $0x10] sm:$0xff]  ;;  %v1975_v14 = vld [vmem:[#allocation13 + $0x78] sm:$0xff] }
0x1358   :  { %v4591_v62 = vpack.c.bf16 %v1962_v61, %v1960_v59 }
0x1359   :  { %1823 = vrot.lane.b32.xlu1 %v5599_v15, %s5182_s20 }
0x13c7   :  { %v5603_v16 = vpop.permute.xlu0 %1734 }
0x13c8   :  { %4291 = vmatmul.mubr.msk.f32.vlgmr.msra.gmra.mrb[14].mxu1 %vm155_vm1, %v5603_v16 }
0x13c9   :  { %2056 = vmatprep.mubr.f32.mxu1 %v5178_v1  ;;  %4592 = vmatpush1.bf16.msra.mxu1 %v4591_v62 }
0x13cb   :  { %v1824_v18 = vpop.permute.xlu1 %1823 }
0x13cc   :  { %4302 = vmatmul.mubr.msk.f32.vlgmr.msra.gmra.mrb[16].mxu0 %vm155_vm1, %v1824_v18  ;;  %v4601_v18 = vpack.c.bf16 %v1975_v14, %v1973_v13 }
0x13cd   :  { %4312 = vmatprep.mubr.msk.f32.mxu0 %vm5180_vm0, %v5178_v1 }
0x149b   :  { %v1815_v19 = vpop.f32.mrb[14].mxu1 }
0x149c   :  { %v1898_v21 = vadd.f32 %v1897_v20, %v1815_v19  ;;  %v4292_v23 = vpop.f32.mrb[15].mxu1  ;;  %v1972_v19 = vld [vmem:[#allocation13 + $0x60] sm:$0xff]  ;;  %v1974_v20 = vld [vmem:[#allocation13 + $0x70] sm:$0xff] }
0x149d   :  { %v4603_v23 = vpack.c.bf16 %v1974_v20, %v1972_v19 }
0x149e   :  { %4833 = vtanh.f32 %v1898_v21  ;;  %v3930_v36 = vmul.f32 -1.442695, %v1898_v21  ;;  %v2067_v21 = vld [vmem:[#allocation14 + $0x10] sm:$0xff] }
0x149f   :  { %v1893_v25 = vpop.f32.mrb[16].mxu0 }
0x14a0   :  { %v1900_v28 = vadd.f32 %v1899_v26, %v1893_v25  ;;  %v4303_v31 = vpop.f32.mrb[17].mxu0  ;;  %v2068_v25 = vld [vmem:[#allocation14 + $0x18] sm:$0xff] }
0x14a1   :  { %v5639_v26 = vpack.c.bf16 %v2068_v25, %v2067_v21  ;;  %v2140_v31 = vld [vmem:[#allocation16 + $0x8] sm:$0xff] }
0x14a2   :  { %4835 = vtanh.f32 %v1900_v28  ;;  %v3931_v37 = vmul.f32 -1.442695, %v1900_v28  ;;  %v2139_v28 = vld [vmem:[#allocation16] sm:$0xff] }
0x14a3   :  { %4837 = vpow2.f32 %v3930_v36 }
0x14a4   :  { %4839 = vpow2.f32 %v3931_v37  ;;  %v5646_v37 = vpack.c.bf16 %v2140_v31, %v2139_v28 }
0x14a8   :  { %v4834_v33 = vpop.eup %4833 }
0x14a9   :  { %1917 = vrot.lane.b32.xlu0 %v4834_v33, %s5181_s4 }
0x14ac   :  { %v4836_v34 = vpop.eup %4835 }
0x14ad   :  { %1934 = vrot.lane.b32.xlu1 %v4836_v34, %s5181_s4  ;;  %v4838_v38 = vpop.eup %4837 }
0x14ae   :  { %v1904_v39 = vadd.f32 1.0, %v4838_v38  ;;  %v4840_v42 = vpop.eup %4839  ;;  %v2141_v38 = vld [vmem:[#allocation16 + $0x10] sm:$0xff] }
0x14af   :  { %v1911_v17 = vadd.f32 1.0, %v4840_v42 }
0x14b0   :  { %4841 = vrcp.f32 %v1904_v39  ;;  %v2142_v39 = vld [vmem:[#allocation16 + $0x18] sm:$0xff] }
0x14b1   :  { %4843 = vrcp.f32 %v1911_v17 }
0x14ba   :  { %v4842_v43 = vpop.eup %4841 }
0x14bb   :  { %v5614_v46 = vpop.eup %4843  ;;  %v1915_v22 = vmul.f32 %v4842_v43, %v1709_v4 }
0x14bc   :  { %v1932_v50 = vmul.f32 %v5614_v46, %v1726_v7  ;;  %v1970_v7 = vld [vmem:[#allocation13 + $0x50] sm:$0xff] }
0x151b   :  { %v1918_v44 = vpop.permute.xlu0 %1917 }
0x151c   :  { %v1920_v45 = vmul.f32 %v4842_v43, %v1918_v44 }
0x151e   :  { %1922 = vrot.lane.b32.xlu0 %v1920_v45, %s5181_s4 }
0x151f   :  { %v1935_v47 = vpop.permute.xlu1 %1934 }
0x1520   :  { %v1937_v48 = vmul.f32 %v5614_v46, %v1935_v47 }
0x1522   :  { %1939 = vrot.lane.b32.xlu1 %v1937_v48, %s5181_s4 }
0x1590   :  { %v1923_v24 = vpop.permute.xlu0 %1922 }
0x1591   :  { %v1925_v49 = vadd.f32 %v1923_v24, %v1915_v22 }
0x1593   :  { %4845 = vtanh.f32 %v1925_v49 }
0x1594   :  { %v1940_v27 = vpop.permute.xlu1 %1939 }
0x1595   :  { %v1942_v51 = vadd.f32 %v1940_v27, %v1932_v50  ;;  %v1976_v50 = vld [vmem:[%s5929_s8] sm:$0x3] }
0x1596   :  { %v1981_v27 = vrot.slane %v1976_v50, %v5392_v30 }
0x1597   :  { %4847 = vtanh.f32 %v1942_v51  ;;  %v1985_v51 = vrot.slane %v1976_v50, %v151_v32 }
0x159d   :  { %v4846_v52 = vpop.eup %4845 }
0x159e   :  { %1928 = vrot.lane.b32.xlu0 %v4846_v52, %s5181_s4 }
0x15a1   :  { %v4848_v54 = vpop.eup %4847 }
0x15a2   :  { %1945 = vrot.lane.b32.xlu1 %v4848_v54, %s5181_s4  ;;  %442 = vrot.lane.b32.xlu0 %v5414_v10, %s5183_s25  ;;  %v1965_v10 = vld [vmem:[#allocation13 + $0x28] sm:$0xff] }
0x15a3   :  { %v4593_v3 = vpack.c.bf16 %v1967_v63, %v1965_v10 }
0x15a5   :  { %4594 = vmatprep.subr.bf16.mxu1 %v4593_v3 }
0x15a6   :  { %659 = vrot.lane.b32.xlu1 %v5448_v53, %s5183_s25  ;;  %875 = vrot.lane.b32.xlu0 %v5482_v35, %s5183_s25  ;;  %v1966_v53 = vld [vmem:[#allocation13 + $0x30] sm:$0xff]  ;;  %v1969_v35 = vld [vmem:[#allocation13 + $0x48] sm:$0xff] }
0x15a7   :  { %v4595_v4 = vpack.c.bf16 %v1966_v53, %v1964_v0 }
0x15a9   :  { %4596 = vmatpush1.bf16.msra.mxu1 %v4595_v4 }
0x15aa   :  { %1091 = vrot.lane.b32.xlu1 %v5516_v11, %s5183_s25  ;;  %1307 = vrot.lane.b32.xlu0 %v5544_v56, %s5183_s25  ;;  %v4597_v11 = vpack.c.bf16 %v1971_v5, %v1969_v35  ;;  %v4599_v56 = vpack.c.bf16 %v1970_v7, %v1968_v6 }
0x15ac   :  { %4598 = vmatprep.subr.bf16.mxu1 %v4597_v11 }
0x15ad   :  { %4600 = vmatpush1.bf16.msra.mxu1 %v4599_v56 }
0x15ae   :  { %1523 = vrot.lane.b32.xlu1 %v5572_v40, %s5183_s25  ;;  %1739 = vrot.lane.b32.xlu0 %v5599_v15, %s5183_s25  ;;  %v2066_v40 = vld [vmem:[#allocation14 + $0x8] sm:$0xff] }
0x15af   :  { %v5635_v12 = vpack.c.bf16 %v2066_v40, %v2065_v8  ;;  %4602 = vmatprep.subr.bf16.mxu1 %v4601_v18 }
0x15b1   :  { %4607 = vmatpush3.bf16.msra.mxu0 %v5635_v12  ;;  %4604 = vmatpush1.bf16.msra.mxu1 %v4603_v23 }
0x15b2   :  { %4608 = vmatprep.subr.bf16.mxu0 %v5179_v2  ;;  %4617 = vmatprep.subr.bf16.mxu1 %v5179_v2 }
0x15b5   :  { %4610 = vmatpush3.bf16.msra.mxu0 %v5639_v26 }
0x15b6   :  { %4611 = vmatprep.subr.bf16.mxu0 %v5179_v2 }
0x15b8   :  { %4313 = vmatmul.mubr.f32.vlgmr.msra.gmra.mrb[18].mxu0 %v5178_v1 }
0x15b9   :  { %4613 = vmatpush3.bf16.msra.mxu0 %v5646_v37  ;;  %4323 = vmatprep.mubr.msk.f32.mxu0 %vm5180_vm0, %v5178_v1 }
0x15ba   :  { %4614 = vmatprep.subr.bf16.mxu0 %v5179_v2 }
0x1610   :  { %v1929_v9 = vpop.permute.xlu0 %1928 }
0x1611   :  { %v1931_v15 = vmul.f32 %v4842_v43, %v1929_v9  ;;  %v5658_v43 = vpack.c.bf16 %v2142_v39, %v2141_v38 }
0x1613   :  { %1950 = vrot.lane.b32.xlu1 %v1931_v15, %s5182_s20  ;;  %4616 = vmatpush3.bf16.msra.mxu0 %v5658_v43 }
0x1614   :  { %v1946_v33 = vpop.permute.xlu1 %1945  ;;  %v443_v34 = vpop.permute.xlu0 %442  ;;  %4623 = vmatprep.subr.bf16.mxu0 %v5179_v2 }
0x1615   :  { %v1948_v36 = vmul.f32 %v5614_v46, %v1946_v33  ;;  %446 = vst.msk [vmem:[#allocation3 + $0x7] sm:$0x1] %vm445_vm3, %v443_v34 }
0x1616   :  { %4324 = vmatmul.mubr.f32.vlgmr.msra.gmra.mrb[20].mxu0 %v5178_v1 }
0x1617   :  { %1955 = vrot.lane.b32.xlu0 %v1948_v36, %s5183_s25  ;;  %4625 = vmatpush3.bf16.msra.mxu0 %v5646_v37 }
0x1618   :  { %v660_v42 = vpop.permute.xlu1 %659  ;;  %v876_v17 = vpop.permute.xlu0 %875  ;;  %4345 = vmatprep.mubr.msk.f32.mxu0 %vm5180_vm0, %v5178_v1  ;;  %4626 = vmatprep.subr.bf16.mxu0 %v5179_v2 }
0x1619   :  { %662 = vst.msk [vmem:[#allocation3 + $0x6] sm:$0x1] %vm445_vm3, %v660_v42  ;;  %878 = vst.msk [vmem:[#allocation3 + $0x5] sm:$0x1] %vm445_vm3, %v876_v17 }
0x161a   :  { %1737 = vst.msk [vmem:[#allocation3 + $0x6] sm:$0x1] %vm439_vm2, %v5603_v16  ;;  %1521 = vst.msk [vmem:[#allocation3 + $0x5] sm:$0x1] %vm439_vm2, %v5576_v41 }
0x161b   :  { %4628 = vmatpush3.bf16.msra.mxu0 %v5658_v43 }
0x161c   :  { %v1092_v44 = vpop.permute.xlu1 %1091  ;;  %v1308_v45 = vpop.permute.xlu0 %1307  ;;  %4635 = vmatprep.subr.bf16.mxu0 %v5179_v2 }
0x161d   :  { %1094 = vst.msk [vmem:[#allocation3 + $0x4] sm:$0x1] %vm445_vm3, %v1092_v44  ;;  %1310 = vst.msk [vmem:[#allocation3 + $0x3] sm:$0x1] %vm445_vm3, %v1308_v45 }
0x161e   :  { %1305 = vst.msk [vmem:[#allocation3 + $0x4] sm:$0x1] %vm439_vm2, %v5548_v57 }
0x1620   :  { %v1524_v41 = vpop.permute.xlu1 %1523  ;;  %v1740_v16 = vpop.permute.xlu0 %1739 }
0x1621   :  { %1526 = vst.msk [vmem:[#allocation3 + $0x2] sm:$0x1] %vm445_vm3, %v1524_v41  ;;  %1742 = vst.msk [vmem:[#allocation3 + $0x1] sm:$0x1] %vm445_vm3, %v1740_v16 }
0x1685   :  { %v1951_v57 = vpop.permute.xlu1 %1950 }
0x1686   :  { %1953 = vst.msk [vmem:[#allocation3 + $0x7] sm:$0x1] %vm439_vm2, %v1951_v57 }
0x1689   :  { %v1956_v46 = vpop.permute.xlu0 %1955 }
0x168a   :  { %1958 = vst.msk [vmem:[#allocation3] sm:$0x1] %vm445_vm3, %v1956_v46 }
0x168b   :  { %v2135_v48 = vpop.f32.mrb[18].mxu0 }
0x168c   :  { %v4314_v22 = vpop.f32.mrb[19].mxu0 }
0x1691   :  { %v1959_v47 = vld [vmem:[#allocation3] sm:$0xff] }
0x1692   :  { %3932 = vmatmul.mubr.msk.f32.vlgmr.msra.gmra.mrb[16].mxu1 %vm1988_vm4, %v1959_v47 }
0x1693   :  { %4619 = vmatpush3.bf16.msra.mxu1 %v5635_v12  ;;  %4334 = vmatprep.mubr.msk.f32.mxu1 %vm5180_vm0, %v5178_v1 }
0x1694   :  { %4620 = vmatprep.subr.bf16.mxu1 %v5179_v2 }
0x1697   :  { %4622 = vmatpush3.bf16.msra.mxu1 %v5639_v26 }
0x1698   :  { %4629 = vmatprep.subr.bf16.mxu1 %v5179_v2 }
0x16e9   :  { %v2209_v24 = vpop.f32.mrb[20].mxu0 }
0x16ea   :  { %v4325_v49 = vpop.f32.mrb[21].mxu0 }
0x1765   :  { %v2058_v52 = vpop.f32.mrb[16].mxu1 }
0x1766   :  { %v2059_v54 = vadd.f32 %v2058_v52, %v1981_v27  ;;  %v2060_v55 = vpop.f32.mrb[17].mxu1 }
0x1767   :  { %v2061_v58 = vadd.f32 %v2060_v55, %v1985_v51 }
0x1768   :  { %2063 = vst [vmem:[#allocation2] sm:$0xff] %v2059_v54 }
0x1769   :  { %2064 = vst [vmem:[#allocation2 + $0x8] sm:$0xff] %v2061_v58 }
0x176f   :  { %v2213_v59 = vld [vmem:[#allocation2] ss:$0 sm:$0xff]  ;;  %v2429_v34 = vld [vmem:[#allocation2 + $0x1] ss:$0 sm:$0xff] }
0x1770   :  { %v2214_v60 = vadd.f32 %v2213_v59, %v2135_v48  ;;  %v2215_v61 = vld [vmem:[#allocation2 + $0xf] ss:$0 sm:$0xff]  ;;  %v2431_v42 = vld [vmem:[#allocation2 + $0xe] ss:$0 sm:$0xff] }
0x1771   :  { %v2216_v62 = vadd.f32 %v2215_v61, %v2209_v24 }
0x1772   :  { %4849 = vtanh.f32 %v2214_v60  ;;  %v3933_v29 = vmul.f32 -1.442695, %v2214_v60 }
0x1773   :  { %4851 = vtanh.f32 %v2216_v62  ;;  %v3934_v32 = vmul.f32 -1.442695, %v2216_v62 }
0x1774   :  { %4853 = vpow2.f32 %v3933_v29 }
0x1775   :  { %4855 = vpow2.f32 %v3934_v32 }
0x177c   :  { %v4850_v10 = vpop.eup %4849 }
0x177d   :  { %v4852_v63 = vpop.eup %4851  ;;  %2233 = vrot.lane.b32.xlu1 %v4850_v10, %s5181_s4 }
0x177e   :  { %2250 = vrot.lane.b32.xlu0 %v4852_v63, %s5181_s4  ;;  %v4854_v0 = vpop.eup %4853 }
0x177f   :  { %v4856_v3 = vpop.eup %4855  ;;  %v2220_v53 = vadd.f32 1.0, %v4854_v0 }
0x1780   :  { %v2227_v4 = vadd.f32 1.0, %v4856_v3 }
0x1781   :  { %4857 = vrcp.f32 %v2220_v53 }
0x1782   :  { %4859 = vrcp.f32 %v2227_v4 }
0x178b   :  { %v4858_v35 = vpop.eup %4857 }
0x178c   :  { %v4860_v11 = vpop.eup %4859  ;;  %v2231_v8 = vmul.f32 0.0, %v4858_v35 }
0x178d   :  { %v2248_v9 = vmul.f32 0.0, %v4860_v11 }
0x17ef   :  { %v2234_v5 = vpop.permute.xlu1 %2233 }
0x17f0   :  { %v2236_v6 = vmul.f32 %v4858_v35, %v2234_v5  ;;  %v2251_v7 = vpop.permute.xlu0 %2250 }
0x17f1   :  { %v2253_v56 = vmul.f32 %v4860_v11, %v2251_v7  ;;  %v2647_v7 = vld [vmem:[#allocation2 + $0xd] ss:$0 sm:$0xff] }
0x17f2   :  { %2238 = vrot.lane.b32.xlu1 %v2236_v6, %s5181_s4 }
0x17f3   :  { %2255 = vrot.lane.b32.xlu0 %v2253_v56, %s5181_s4 }
0x1864   :  { %v2239_v40 = vpop.permute.xlu1 %2238 }
0x1865   :  { %v2241_v13 = vadd.f32 %v2239_v40, %v2231_v8  ;;  %v2256_v14 = vpop.permute.xlu0 %2255 }
0x1866   :  { %v2258_v15 = vadd.f32 %v2256_v14, %v2248_v9 }
0x1867   :  { %4861 = vtanh.f32 %v2241_v13 }
0x1868   :  { %4863 = vtanh.f32 %v2258_v15 }
0x1871   :  { %v4862_v18 = vpop.eup %4861 }
0x1872   :  { %v4864_v19 = vpop.eup %4863  ;;  %2244 = vrot.lane.b32.xlu1 %v4862_v18, %s5181_s4 }
0x1873   :  { %2261 = vrot.lane.b32.xlu0 %v4864_v19, %s5181_s4 }
0x18e4   :  { %v2245_v20 = vpop.permute.xlu1 %2244 }
0x18e5   :  { %v2247_v21 = vmul.f32 %v4858_v35, %v2245_v20  ;;  %v2262_v23 = vpop.permute.xlu0 %2261  ;;  %v2645_v35 = vld [vmem:[#allocation2 + $0x2] ss:$0 sm:$0xff] }
0x18e6   :  { %v5699_v25 = vmul.f32 %v4860_v11, %v2262_v23 }
0x18e7   :  { %2266 = vrot.lane.b32.xlu1 %v2247_v21, %s5182_s20 }
0x18e8   :  { %2355 = vrot.lane.b32.xlu0 %v5699_v25, %s5182_s20 }
0x1959   :  { %v2267_v28 = vpop.permute.xlu1 %2266 }
0x195a   :  { %2269 = vst.msk [vmem:[#allocation3] sm:$0x1] %vm439_vm2, %v2267_v28  ;;  %v2356_v31 = vpop.permute.xlu0 %2355  ;;  %4335 = vmatmul.mubr.msk.f32.vlgmr.msra.gmra.mrb[18].mxu1 %vm155_vm1, %v2267_v28 }
0x195b   :  { %4346 = vmatmul.mubr.msk.f32.vlgmr.msra.gmra.mrb[22].mxu0 %vm155_vm1, %v2356_v31  ;;  %4631 = vmatpush3.bf16.msra.mxu1 %v5635_v12 }
0x195c   :  { %4637 = vmatpush3.bf16.msra.mxu0 %v5646_v37  ;;  %4632 = vmatprep.subr.bf16.mxu1 %v5179_v2 }
0x195d   :  { %4638 = vmatprep.subr.bf16.mxu0 %v5179_v2  ;;  %4356 = vmatprep.mubr.msk.f32.mxu1 %vm5180_vm0, %v5178_v1 }
0x195e   :  { %4367 = vmatprep.mubr.msk.f32.mxu0 %vm5180_vm0, %v5178_v1 }
0x195f   :  { %4634 = vmatpush3.bf16.msra.mxu1 %v5639_v26 }
0x1960   :  { %4640 = vmatpush3.bf16.msra.mxu0 %v5658_v43  ;;  %4641 = vmatprep.subr.bf16.mxu1 %v5179_v2 }
0x1961   :  { %4647 = vmatprep.subr.bf16.mxu0 %v5179_v2 }
0x1a2d   :  { %v2347_v33 = vpop.f32.mrb[18].mxu1 }
0x1a2e   :  { %v2430_v36 = vadd.f32 %v2429_v34, %v2347_v33  ;;  %v4336_v38 = vpop.f32.mrb[19].mxu1  ;;  %v2425_v39 = vpop.f32.mrb[22].mxu0 }
0x1a2f   :  { %v2432_v17 = vadd.f32 %v2431_v42, %v2425_v39  ;;  %v4347_v44 = vpop.f32.mrb[23].mxu0 }
0x1a30   :  { %4865 = vtanh.f32 %v2430_v36  ;;  %v3937_v16 = vmul.f32 -1.442695, %v2430_v36 }
0x1a31   :  { %4867 = vtanh.f32 %v2432_v17  ;;  %v3938_v57 = vmul.f32 -1.442695, %v2432_v17 }
0x1a32   :  { %4869 = vpow2.f32 %v3937_v16 }
0x1a33   :  { %4871 = vpow2.f32 %v3938_v57 }
0x1a3a   :  { %v4866_v45 = vpop.eup %4865 }
0x1a3b   :  { %v4868_v41 = vpop.eup %4867  ;;  %2449 = vrot.lane.b32.xlu1 %v4866_v45, %s5181_s4 }
0x1a3c   :  { %2466 = vrot.lane.b32.xlu0 %v4868_v41, %s5181_s4  ;;  %v4870_v46 = vpop.eup %4869 }
0x1a3d   :  { %v4872_v47 = vpop.eup %4871  ;;  %v2436_v48 = vadd.f32 1.0, %v4870_v46 }
0x1a3e   :  { %v2443_v22 = vadd.f32 1.0, %v4872_v47 }
0x1a3f   :  { %4873 = vrcp.f32 %v2436_v48 }
0x1a40   :  { %4875 = vrcp.f32 %v2443_v22 }
0x1a49   :  { %v4874_v24 = vpop.eup %4873 }
0x1a4a   :  { %v4876_v50 = vpop.eup %4875  ;;  %v2447_v54 = vmul.f32 %v4874_v24, %v2241_v13 }
0x1a4b   :  { %v2464_v58 = vmul.f32 %v4876_v50, %v2258_v15 }
0x1aad   :  { %v2450_v49 = vpop.permute.xlu1 %2449 }
0x1aae   :  { %v2452_v27 = vmul.f32 %v4874_v24, %v2450_v49  ;;  %v2467_v51 = vpop.permute.xlu0 %2466  ;;  %v2861_v49 = vld [vmem:[#allocation2 + $0x3] ss:$0 sm:$0xff] }
0x1aaf   :  { %v2469_v52 = vmul.f32 %v4876_v50, %v2467_v51 }
0x1ab0   :  { %2454 = vrot.lane.b32.xlu1 %v2452_v27, %s5181_s4 }
0x1ab1   :  { %2471 = vrot.lane.b32.xlu0 %v2469_v52, %s5181_s4  ;;  %v2863_v52 = vld [vmem:[#allocation2 + $0xc] ss:$0 sm:$0xff] }
0x1b22   :  { %v2455_v55 = vpop.permute.xlu1 %2454 }
0x1b23   :  { %v2457_v59 = vadd.f32 %v2455_v55, %v2447_v54  ;;  %v2472_v60 = vpop.permute.xlu0 %2471 }
0x1b24   :  { %v2474_v61 = vadd.f32 %v2472_v60, %v2464_v58 }
0x1b25   :  { %4877 = vtanh.f32 %v2457_v59 }
0x1b26   :  { %4879 = vtanh.f32 %v2474_v61 }
0x1b2f   :  { %v4878_v62 = vpop.eup %4877 }
0x1b30   :  { %v4880_v10 = vpop.eup %4879  ;;  %2460 = vrot.lane.b32.xlu1 %v4878_v62, %s5181_s4 }
0x1b31   :  { %2477 = vrot.lane.b32.xlu0 %v4880_v10, %s5181_s4 }
0x1ba2   :  { %v2461_v63 = vpop.permute.xlu1 %2460 }
0x1ba3   :  { %v2463_v29 = vmul.f32 %v4874_v24, %v2461_v63  ;;  %v2478_v32 = vpop.permute.xlu0 %2477 }
0x1ba4   :  { %v5725_v0 = vmul.f32 %v4876_v50, %v2478_v32 }
0x1ba5   :  { %2482 = vrot.lane.b32.xlu1 %v2463_v29, %s5182_s20 }
0x1ba6   :  { %2571 = vrot.lane.b32.xlu0 %v5725_v0, %s5182_s20 }
0x1c17   :  { %v2483_v3 = vpop.permute.xlu1 %2482 }
0x1c18   :  { %2485 = vst.msk [vmem:[#allocation3 + $0x1] sm:$0x1] %vm439_vm2, %v2483_v3  ;;  %v2572_v53 = vpop.permute.xlu0 %2571  ;;  %4357 = vmatmul.mubr.msk.f32.vlgmr.msra.gmra.mrb[20].mxu1 %vm155_vm1, %v2483_v3 }
0x1c19   :  { %4368 = vmatmul.mubr.msk.f32.vlgmr.msra.gmra.mrb[24].mxu0 %vm155_vm1, %v2572_v53  ;;  %4643 = vmatpush3.bf16.msra.mxu1 %v5635_v12 }
0x1c1a   :  { %4649 = vmatpush3.bf16.msra.mxu0 %v5646_v37  ;;  %4644 = vmatprep.subr.bf16.mxu1 %v5179_v2 }
0x1c1b   :  { %4650 = vmatprep.subr.bf16.mxu0 %v5179_v2  ;;  %4378 = vmatprep.mubr.msk.f32.mxu1 %vm5180_vm0, %v5178_v1 }
0x1c1c   :  { %4389 = vmatprep.mubr.msk.f32.mxu0 %vm5180_vm0, %v5178_v1 }
0x1c1d   :  { %4646 = vmatpush3.bf16.msra.mxu1 %v5639_v26 }
0x1c1e   :  { %4652 = vmatpush3.bf16.msra.mxu0 %v5658_v43  ;;  %4653 = vmatprep.subr.bf16.mxu1 %v5179_v2 }
0x1c1f   :  { %4659 = vmatprep.subr.bf16.mxu0 %v5179_v2 }
0x1ceb   :  { %v2563_v4 = vpop.f32.mrb[20].mxu1 }
0x1cec   :  { %v2646_v5 = vadd.f32 %v2645_v35, %v2563_v4  ;;  %v4358_v11 = vpop.f32.mrb[21].mxu1  ;;  %v2641_v6 = vpop.f32.mrb[24].mxu0 }
0x1ced   :  { %v2648_v56 = vadd.f32 %v2647_v7, %v2641_v6  ;;  %v4369_v8 = vpop.f32.mrb[25].mxu0 }
0x1cee   :  { %4881 = vtanh.f32 %v2646_v5  ;;  %v3941_v13 = vmul.f32 -1.442695, %v2646_v5 }
0x1cef   :  { %4883 = vtanh.f32 %v2648_v56  ;;  %v3942_v14 = vmul.f32 -1.442695, %v2648_v56 }
0x1cf0   :  { %4885 = vpow2.f32 %v3941_v13 }
0x1cf1   :  { %4887 = vpow2.f32 %v3942_v14 }
0x1cf8   :  { %v4882_v40 = vpop.eup %4881 }
0x1cf9   :  { %v4884_v9 = vpop.eup %4883  ;;  %2665 = vrot.lane.b32.xlu1 %v4882_v40, %s5181_s4 }
0x1cfa   :  { %2682 = vrot.lane.b32.xlu0 %v4884_v9, %s5181_s4  ;;  %v4886_v15 = vpop.eup %4885 }
0x1cfb   :  { %v4888_v18 = vpop.eup %4887  ;;  %v2652_v19 = vadd.f32 1.0, %v4886_v15 }
0x1cfc   :  { %v2659_v20 = vadd.f32 1.0, %v4888_v18 }
0x1cfd   :  { %4889 = vrcp.f32 %v2652_v19 }
0x1cfe   :  { %4891 = vrcp.f32 %v2659_v20 }
0x1d07   :  { %v4890_v21 = vpop.eup %4889 }
0x1d08   :  { %v4892_v28 = vpop.eup %4891  ;;  %v2663_v36 = vmul.f32 %v4890_v21, %v2457_v59 }
0x1d09   :  { %v2680_v39 = vmul.f32 %v4892_v28, %v2474_v61 }
0x1d6b   :  { %v2666_v23 = vpop.permute.xlu1 %2665 }
0x1d6c   :  { %v2668_v31 = vmul.f32 %v4890_v21, %v2666_v23  ;;  %v2683_v33 = vpop.permute.xlu0 %2682 }
0x1d6d   :  { %v2685_v34 = vmul.f32 %v4892_v28, %v2683_v33 }
0x1d6e   :  { %2670 = vrot.lane.b32.xlu1 %v2668_v31, %s5181_s4 }
0x1d6f   :  { %2687 = vrot.lane.b32.xlu0 %v2685_v34, %s5181_s4 }
0x1de0   :  { %v2671_v38 = vpop.permute.xlu1 %2670 }
0x1de1   :  { %v2673_v42 = vadd.f32 %v2671_v38, %v2663_v36  ;;  %v2688_v17 = vpop.permute.xlu0 %2687  ;;  %v3079_v36 = vld [vmem:[#allocation2 + $0xb] ss:$0 sm:$0xff] }
0x1de2   :  { %v2690_v44 = vadd.f32 %v2688_v17, %v2680_v39 }
0x1de3   :  { %4893 = vtanh.f32 %v2673_v42 }
0x1de4   :  { %4895 = vtanh.f32 %v2690_v44 }
0x1ded   :  { %v4894_v45 = vpop.eup %4893 }
0x1dee   :  { %v4896_v41 = vpop.eup %4895  ;;  %2676 = vrot.lane.b32.xlu1 %v4894_v45, %s5181_s4 }
0x1def   :  { %2693 = vrot.lane.b32.xlu0 %v4896_v41, %s5181_s4 }
0x1e60   :  { %v2677_v16 = vpop.permute.xlu1 %2676 }
0x1e61   :  { %v2679_v57 = vmul.f32 %v4890_v21, %v2677_v16  ;;  %v2694_v46 = vpop.permute.xlu0 %2693 }
0x1e62   :  { %v5751_v47 = vmul.f32 %v4892_v28, %v2694_v46  ;;  %v3077_v28 = vld [vmem:[#allocation2 + $0x4] ss:$0 sm:$0xff] }
0x1e63   :  { %2698 = vrot.lane.b32.xlu1 %v2679_v57, %s5182_s20 }
0x1e64   :  { %2787 = vrot.lane.b32.xlu0 %v5751_v47, %s5182_s20 }
0x1ed5   :  { %v2699_v48 = vpop.permute.xlu1 %2698 }
0x1ed6   :  { %2701 = vst.msk [vmem:[#allocation3 + $0x2] sm:$0x1] %vm439_vm2, %v2699_v48  ;;  %v2788_v22 = vpop.permute.xlu0 %2787  ;;  %4379 = vmatmul.mubr.msk.f32.vlgmr.msra.gmra.mrb[22].mxu1 %vm155_vm1, %v2699_v48 }
0x1ed7   :  { %4390 = vmatmul.mubr.msk.f32.vlgmr.msra.gmra.mrb[26].mxu0 %vm155_vm1, %v2788_v22  ;;  %4655 = vmatpush3.bf16.msra.mxu1 %v5635_v12 }
0x1ed8   :  { %4661 = vmatpush3.bf16.msra.mxu0 %v5646_v37  ;;  %4656 = vmatprep.subr.bf16.mxu1 %v5179_v2 }
0x1ed9   :  { %4662 = vmatprep.subr.bf16.mxu0 %v5179_v2  ;;  %4400 = vmatprep.mubr.msk.f32.mxu1 %vm5180_vm0, %v5178_v1 }
0x1eda   :  { %4411 = vmatprep.mubr.msk.f32.mxu0 %vm5180_vm0, %v5178_v1 }
0x1edb   :  { %4658 = vmatpush3.bf16.msra.mxu1 %v5639_v26 }
0x1edc   :  { %4664 = vmatpush3.bf16.msra.mxu0 %v5658_v43  ;;  %4665 = vmatprep.subr.bf16.mxu1 %v5179_v2 }
0x1edd   :  { %4671 = vmatprep.subr.bf16.mxu0 %v5179_v2 }
0x1fa9   :  { %v2779_v24 = vpop.f32.mrb[22].mxu1 }
0x1faa   :  { %v2862_v50 = vadd.f32 %v2861_v49, %v2779_v24  ;;  %v4380_v27 = vpop.f32.mrb[23].mxu1  ;;  %v2857_v51 = vpop.f32.mrb[26].mxu0 }
0x1fab   :  { %v2864_v54 = vadd.f32 %v2863_v52, %v2857_v51  ;;  %v4391_v55 = vpop.f32.mrb[27].mxu0 }
0x1fac   :  { %4897 = vtanh.f32 %v2862_v50  ;;  %v3945_v60 = vmul.f32 -1.442695, %v2862_v50 }
0x1fad   :  { %4899 = vtanh.f32 %v2864_v54  ;;  %v3946_v61 = vmul.f32 -1.442695, %v2864_v54 }
0x1fae   :  { %4901 = vpow2.f32 %v3945_v60 }
0x1faf   :  { %4903 = vpow2.f32 %v3946_v61 }
0x1fb6   :  { %v4898_v58 = vpop.eup %4897 }
0x1fb7   :  { %v4900_v59 = vpop.eup %4899  ;;  %2881 = vrot.lane.b32.xlu1 %v4898_v58, %s5181_s4 }
0x1fb8   :  { %2898 = vrot.lane.b32.xlu0 %v4900_v59, %s5181_s4  ;;  %v4902_v62 = vpop.eup %4901 }
0x1fb9   :  { %v4904_v10 = vpop.eup %4903  ;;  %v2868_v63 = vadd.f32 1.0, %v4902_v62 }
0x1fba   :  { %v2875_v29 = vadd.f32 1.0, %v4904_v10 }
0x1fbb   :  { %4905 = vrcp.f32 %v2868_v63 }
0x1fbc   :  { %4907 = vrcp.f32 %v2875_v29 }
0x1fc5   :  { %v4906_v32 = vpop.eup %4905 }
0x1fc6   :  { %v4908_v53 = vpop.eup %4907  ;;  %v2879_v11 = vmul.f32 %v4906_v32, %v2673_v42 }
0x1fc7   :  { %v2896_v7 = vmul.f32 %v4908_v53, %v2690_v44 }
0x2029   :  { %v2882_v3 = vpop.permute.xlu1 %2881 }
0x202a   :  { %v2884_v4 = vmul.f32 %v4906_v32, %v2882_v3  ;;  %v2899_v35 = vpop.permute.xlu0 %2898 }
0x202b   :  { %v2901_v5 = vmul.f32 %v4908_v53, %v2899_v35 }
0x202c   :  { %2886 = vrot.lane.b32.xlu1 %v2884_v4, %s5181_s4  ;;  %v3293_v4 = vld [vmem:[#allocation2 + $0x5] ss:$0 sm:$0xff] }
0x202d   :  { %2903 = vrot.lane.b32.xlu0 %v2901_v5, %s5181_s4 }
0x209e   :  { %v2887_v6 = vpop.permute.xlu1 %2886 }
0x209f   :  { %v2889_v56 = vadd.f32 %v2887_v6, %v2879_v11  ;;  %v2904_v8 = vpop.permute.xlu0 %2903  ;;  %v3295_v6 = vld [vmem:[#allocation2 + $0xa] ss:$0 sm:$0xff] }
0x20a0   :  { %v2906_v40 = vadd.f32 %v2904_v8, %v2896_v7 }
0x20a1   :  { %4909 = vtanh.f32 %v2889_v56 }
0x20a2   :  { %4911 = vtanh.f32 %v2906_v40 }
0x20ab   :  { %v4910_v9 = vpop.eup %4909 }
0x20ac   :  { %v4912_v13 = vpop.eup %4911  ;;  %2892 = vrot.lane.b32.xlu1 %v4910_v9, %s5181_s4 }
0x20ad   :  { %2909 = vrot.lane.b32.xlu0 %v4912_v13, %s5181_s4 }
0x211e   :  { %v2893_v14 = vpop.permute.xlu1 %2892 }
0x211f   :  { %v2895_v15 = vmul.f32 %v4906_v32, %v2893_v14  ;;  %v2910_v18 = vpop.permute.xlu0 %2909 }
0x2120   :  { %v5777_v19 = vmul.f32 %v4908_v53, %v2910_v18 }
0x2121   :  { %2914 = vrot.lane.b32.xlu1 %v2895_v15, %s5182_s20 }
0x2122   :  { %3003 = vrot.lane.b32.xlu0 %v5777_v19, %s5182_s20 }
0x2193   :  { %v2915_v20 = vpop.permute.xlu1 %2914 }
0x2194   :  { %2917 = vst.msk [vmem:[#allocation3 + $0x3] sm:$0x1] %vm439_vm2, %v2915_v20  ;;  %v3004_v21 = vpop.permute.xlu0 %3003  ;;  %4401 = vmatmul.mubr.msk.f32.vlgmr.msra.gmra.mrb[24].mxu1 %vm155_vm1, %v2915_v20 }
0x2195   :  { %4412 = vmatmul.mubr.msk.f32.vlgmr.msra.gmra.mrb[28].mxu0 %vm155_vm1, %v3004_v21  ;;  %4667 = vmatpush3.bf16.msra.mxu1 %v5635_v12 }
0x2196   :  { %4673 = vmatpush3.bf16.msra.mxu0 %v5646_v37  ;;  %4668 = vmatprep.subr.bf16.mxu1 %v5179_v2 }
0x2197   :  { %4674 = vmatprep.subr.bf16.mxu0 %v5179_v2  ;;  %4422 = vmatprep.mubr.msk.f32.mxu1 %vm5180_vm0, %v5178_v1 }
0x2198   :  { %4433 = vmatprep.mubr.msk.f32.mxu0 %vm5180_vm0, %v5178_v1 }
0x2199   :  { %4670 = vmatpush3.bf16.msra.mxu1 %v5639_v26 }
0x219a   :  { %4676 = vmatpush3.bf16.msra.mxu0 %v5658_v43  ;;  %4677 = vmatprep.subr.bf16.mxu1 %v5179_v2 }
0x219b   :  { %4683 = vmatprep.subr.bf16.mxu0 %v5179_v2 }
0x2267   :  { %v2995_v23 = vpop.f32.mrb[24].mxu1 }
0x2268   :  { %v3078_v31 = vadd.f32 %v3077_v28, %v2995_v23  ;;  %v4402_v33 = vpop.f32.mrb[25].mxu1  ;;  %v3073_v34 = vpop.f32.mrb[28].mxu0 }
0x2269   :  { %v3080_v38 = vadd.f32 %v3079_v36, %v3073_v34  ;;  %v4413_v39 = vpop.f32.mrb[29].mxu0 }
0x226a   :  { %4913 = vtanh.f32 %v3078_v31  ;;  %v3949_v44 = vmul.f32 -1.442695, %v3078_v31 }
0x226b   :  { %4915 = vtanh.f32 %v3080_v38  ;;  %v3950_v45 = vmul.f32 -1.442695, %v3080_v38 }
0x226c   :  { %4917 = vpow2.f32 %v3949_v44 }
0x226d   :  { %4919 = vpow2.f32 %v3950_v45 }
0x2274   :  { %v4914_v42 = vpop.eup %4913 }
0x2275   :  { %v4916_v17 = vpop.eup %4915  ;;  %3097 = vrot.lane.b32.xlu1 %v4914_v42, %s5181_s4 }
0x2276   :  { %3114 = vrot.lane.b32.xlu0 %v4916_v17, %s5181_s4  ;;  %v4918_v41 = vpop.eup %4917 }
0x2277   :  { %v4920_v16 = vpop.eup %4919  ;;  %v3084_v57 = vadd.f32 1.0, %v4918_v41 }
0x2278   :  { %v3091_v46 = vadd.f32 1.0, %v4920_v16 }
0x2279   :  { %4921 = vrcp.f32 %v3084_v57 }
0x227a   :  { %4923 = vrcp.f32 %v3091_v46 }
0x2283   :  { %v4922_v48 = vpop.eup %4921 }
0x2284   :  { %v4924_v24 = vpop.eup %4923  ;;  %v3095_v51 = vmul.f32 %v4922_v48, %v2889_v56 }
0x2285   :  { %v3112_v54 = vmul.f32 %v4924_v24, %v2906_v40 }
0x22e7   :  { %v3098_v22 = vpop.permute.xlu1 %3097 }
0x22e8   :  { %v3100_v49 = vmul.f32 %v4922_v48, %v3098_v22  ;;  %v3115_v50 = vpop.permute.xlu0 %3114 }
0x22e9   :  { %v3117_v27 = vmul.f32 %v4924_v24, %v3115_v50 }
0x22ea   :  { %3102 = vrot.lane.b32.xlu1 %v3100_v49, %s5181_s4 }
0x22eb   :  { %3119 = vrot.lane.b32.xlu0 %v3117_v27, %s5181_s4 }
0x235c   :  { %v3103_v52 = vpop.permute.xlu1 %3102 }
0x235d   :  { %v3105_v55 = vadd.f32 %v3103_v52, %v3095_v51  ;;  %v3120_v58 = vpop.permute.xlu0 %3119  ;;  %v3511_v51 = vld [vmem:[#allocation2 + $0x9] ss:$0 sm:$0xff] }
0x235e   :  { %v3122_v59 = vadd.f32 %v3120_v58, %v3112_v54 }
0x235f   :  { %4925 = vtanh.f32 %v3105_v55 }
0x2360   :  { %4927 = vtanh.f32 %v3122_v59 }
0x2369   :  { %v4926_v60 = vpop.eup %4925 }
0x236a   :  { %v4928_v61 = vpop.eup %4927  ;;  %3108 = vrot.lane.b32.xlu1 %v4926_v60, %s5181_s4 }
0x236b   :  { %3125 = vrot.lane.b32.xlu0 %v4928_v61, %s5181_s4 }
0x23dc   :  { %v3109_v62 = vpop.permute.xlu1 %3108 }
0x23dd   :  { %v3111_v10 = vmul.f32 %v4922_v48, %v3109_v62  ;;  %v3126_v63 = vpop.permute.xlu0 %3125 }
0x23de   :  { %v5803_v29 = vmul.f32 %v4924_v24, %v3126_v63 }
0x23df   :  { %3130 = vrot.lane.b32.xlu1 %v3111_v10, %s5182_s20 }
0x23e0   :  { %3219 = vrot.lane.b32.xlu0 %v5803_v29, %s5182_s20 }
0x2451   :  { %v5808_v32 = vpop.permute.xlu1 %3130 }
0x2452   :  { %v3220_v3 = vpop.permute.xlu0 %3219  ;;  %4423 = vmatmul.mubr.msk.f32.vlgmr.msra.gmra.mrb[26].mxu1 %vm155_vm1, %v5808_v32 }
0x2453   :  { %4434 = vmatmul.mubr.msk.f32.vlgmr.msra.gmra.mrb[30].mxu0 %vm155_vm1, %v3220_v3  ;;  %4679 = vmatpush3.bf16.msra.mxu1 %v5635_v12 }
0x2454   :  { %4685 = vmatpush3.bf16.msra.mxu0 %v5646_v37  ;;  %4680 = vmatprep.subr.bf16.mxu1 %v5179_v2 }
0x2455   :  { %4686 = vmatprep.subr.bf16.mxu0 %v5179_v2  ;;  %4444 = vmatprep.mubr.msk.f32.mxu1 %vm5180_vm0, %v5178_v1 }
0x2456   :  { %4455 = vmatprep.mubr.msk.f32.mxu0 %vm5180_vm0, %v5178_v1 }
0x2457   :  { %4682 = vmatpush3.bf16.msra.mxu1 %v5639_v26 }
0x2458   :  { %4688 = vmatpush3.bf16.msra.mxu0 %v5658_v43  ;;  %4689 = vmatprep.subr.bf16.mxu1 %v5179_v2 }
0x2459   :  { %4695 = vmatprep.subr.bf16.mxu0 %v5179_v2 }
0x2525   :  { %v3211_v53 = vpop.f32.mrb[26].mxu1 }
0x2526   :  { %v3294_v35 = vadd.f32 %v3293_v4, %v3211_v53  ;;  %v4424_v5 = vpop.f32.mrb[27].mxu1  ;;  %v3289_v11 = vpop.f32.mrb[30].mxu0 }
0x2527   :  { %v3296_v7 = vadd.f32 %v3295_v6, %v3289_v11  ;;  %v4435_v56 = vpop.f32.mrb[31].mxu0 }
0x2528   :  { %4929 = vtanh.f32 %v3294_v35  ;;  %v3953_v9 = vmul.f32 -1.442695, %v3294_v35 }
0x2529   :  { %4931 = vtanh.f32 %v3296_v7  ;;  %v3954_v13 = vmul.f32 -1.442695, %v3296_v7 }
0x252a   :  { %4933 = vpow2.f32 %v3953_v9 }
0x252b   :  { %4935 = vpow2.f32 %v3954_v13 }
0x2532   :  { %v4930_v8 = vpop.eup %4929 }
0x2533   :  { %v4932_v40 = vpop.eup %4931  ;;  %3313 = vrot.lane.b32.xlu1 %v4930_v8, %s5181_s4 }
0x2534   :  { %3330 = vrot.lane.b32.xlu0 %v4932_v40, %s5181_s4  ;;  %v4934_v14 = vpop.eup %4933 }
0x2535   :  { %v4936_v15 = vpop.eup %4935  ;;  %v3300_v18 = vadd.f32 1.0, %v4934_v14 }
0x2536   :  { %v3307_v20 = vadd.f32 1.0, %v4936_v15 }
0x2537   :  { %4937 = vrcp.f32 %v3300_v18 }
0x2538   :  { %4939 = vrcp.f32 %v3307_v20 }
0x2541   :  { %v4938_v21 = vpop.eup %4937 }
0x2542   :  { %v4940_v28 = vpop.eup %4939  ;;  %v3311_v36 = vmul.f32 %v4938_v21, %v3105_v55 }
0x2543   :  { %v3328_v39 = vmul.f32 %v4940_v28, %v3122_v59 }
0x25a5   :  { %v3314_v23 = vpop.permute.xlu1 %3313 }
0x25a6   :  { %v3316_v31 = vmul.f32 %v4938_v21, %v3314_v23  ;;  %v3331_v33 = vpop.permute.xlu0 %3330  ;;  %v3725_v23 = vld [vmem:[#allocation2 + $0x7] ss:$0 sm:$0xff] }
0x25a7   :  { %v3333_v34 = vmul.f32 %v4940_v28, %v3331_v33 }
0x25a8   :  { %3318 = vrot.lane.b32.xlu1 %v3316_v31, %s5181_s4 }
0x25a9   :  { %3335 = vrot.lane.b32.xlu0 %v3333_v34, %s5181_s4  ;;  %v3727_v34 = vld [vmem:[#allocation2 + $0x8] ss:$0 sm:$0xff] }
0x261a   :  { %v3319_v38 = vpop.permute.xlu1 %3318 }
0x261b   :  { %v3321_v42 = vadd.f32 %v3319_v38, %v3311_v36  ;;  %v3336_v17 = vpop.permute.xlu0 %3335 }
0x261c   :  { %v3338_v44 = vadd.f32 %v3336_v17, %v3328_v39 }
0x261d   :  { %4941 = vtanh.f32 %v3321_v42 }
0x261e   :  { %4943 = vtanh.f32 %v3338_v44 }
0x2627   :  { %v4942_v45 = vpop.eup %4941 }
0x2628   :  { %v4944_v41 = vpop.eup %4943  ;;  %3324 = vrot.lane.b32.xlu1 %v4942_v45, %s5181_s4 }
0x2629   :  { %3341 = vrot.lane.b32.xlu0 %v4944_v41, %s5181_s4 }
0x269a   :  { %v3325_v16 = vpop.permute.xlu1 %3324 }
0x269b   :  { %v3327_v57 = vmul.f32 %v4938_v21, %v3325_v16  ;;  %v3342_v46 = vpop.permute.xlu0 %3341 }
0x269c   :  { %v5831_v48 = vmul.f32 %v4940_v28, %v3342_v46 }
0x269d   :  { %3346 = vrot.lane.b32.xlu1 %v3327_v57, %s5182_s20 }
0x269e   :  { %3435 = vrot.lane.b32.xlu0 %v5831_v48, %s5182_s20 }
0x270f   :  { %v5836_v22 = vpop.permute.xlu1 %3346 }
0x2710   :  { %v3436_v24 = vpop.permute.xlu0 %3435  ;;  %4445 = vmatmul.mubr.msk.f32.vlgmr.msra.gmra.mrb[28].mxu1 %vm155_vm1, %v5836_v22 }
0x2711   :  { %4456 = vmatmul.mubr.msk.f32.vlgmr.msra.gmra.mrb[32].mxu0 %vm155_vm1, %v3436_v24  ;;  %4691 = vmatpush3.bf16.msra.mxu1 %v5635_v12  ;;  %v3509_v12 = vld [vmem:[#allocation2 + $0x6] ss:$0 sm:$0xff] }
0x2712   :  { %4697 = vmatpush3.bf16.msra.mxu0 %v5646_v37  ;;  %4692 = vmatprep.subr.bf16.mxu1 %v5179_v2 }
0x2713   :  { %4698 = vmatprep.subr.bf16.mxu0 %v5179_v2  ;;  %4466 = vmatprep.mubr.msk.f32.mxu1 %vm5180_vm0, %v5178_v1 }
0x2714   :  { %4477 = vmatprep.mubr.msk.f32.mxu0 %vm5180_vm0, %v5178_v1 }
0x2715   :  { %4694 = vmatpush3.bf16.msra.mxu1 %v5639_v26 }
0x2716   :  { %4700 = vmatpush3.bf16.msra.mxu0 %v5658_v43  ;;  %4480 = vmatprep.subr.mxu1 %v5178_v1 }
0x27e3   :  { %v3427_v49 = vpop.f32.mrb[28].mxu1 }
0x27e4   :  { %v3510_v50 = vadd.f32 %v3509_v12, %v3427_v49  ;;  %v4446_v37 = vpop.f32.mrb[29].mxu1  ;;  %v3505_v27 = vpop.f32.mrb[32].mxu0 }
0x27e5   :  { %v3512_v52 = vadd.f32 %v3511_v51, %v3505_v27  ;;  %v4457_v2 = vpop.f32.mrb[33].mxu0 }
0x27e6   :  { %4945 = vtanh.f32 %v3510_v50  ;;  %v3957_v26 = vmul.f32 -1.442695, %v3510_v50 }
0x27e7   :  { %4947 = vtanh.f32 %v3512_v52  ;;  %v3958_v43 = vmul.f32 -1.442695, %v3512_v52 }
0x27e8   :  { %4949 = vpow2.f32 %v3957_v26 }
0x27e9   :  { %4951 = vpow2.f32 %v3958_v43 }
0x27f0   :  { %v4946_v54 = vpop.eup %4945 }
0x27f1   :  { %v4948_v55 = vpop.eup %4947  ;;  %3529 = vrot.lane.b32.xlu1 %v4946_v54, %s5181_s4 }
0x27f2   :  { %3546 = vrot.lane.b32.xlu0 %v4948_v55, %s5181_s4  ;;  %v4950_v58 = vpop.eup %4949 }
0x27f3   :  { %v4952_v59 = vpop.eup %4951  ;;  %v3516_v60 = vadd.f32 1.0, %v4950_v58 }
0x27f4   :  { %v3523_v61 = vadd.f32 1.0, %v4952_v59 }
0x27f5   :  { %4953 = vrcp.f32 %v3516_v60 }
0x27f6   :  { %4955 = vrcp.f32 %v3523_v61 }
0x27ff   :  { %v4954_v62 = vpop.eup %4953 }
0x2800   :  { %v4956_v63 = vpop.eup %4955  ;;  %v3527_v35 = vmul.f32 %v4954_v62, %v3321_v42 }
0x2801   :  { %v3544_v11 = vmul.f32 %v4956_v63, %v3338_v44 }
0x2863   :  { %v3530_v10 = vpop.permute.xlu1 %3529 }
0x2864   :  { %v3532_v3 = vmul.f32 %v4954_v62, %v3530_v10  ;;  %v3547_v53 = vpop.permute.xlu0 %3546 }
0x2865   :  { %v3549_v4 = vmul.f32 %v4956_v63, %v3547_v53 }
0x2866   :  { %3534 = vrot.lane.b32.xlu1 %v3532_v3, %s5181_s4 }
0x2867   :  { %3551 = vrot.lane.b32.xlu0 %v3549_v4, %s5181_s4 }
0x28d8   :  { %v3535_v5 = vpop.permute.xlu1 %3534 }
0x28d9   :  { %v3537_v6 = vadd.f32 %v3535_v5, %v3527_v35  ;;  %v3552_v7 = vpop.permute.xlu0 %3551 }
0x28da   :  { %v3554_v56 = vadd.f32 %v3552_v7, %v3544_v11 }
0x28db   :  { %4957 = vtanh.f32 %v3537_v6 }
0x28dc   :  { %4959 = vtanh.f32 %v3554_v56 }
0x28e5   :  { %v4958_v8 = vpop.eup %4957 }
0x28e6   :  { %v4960_v40 = vpop.eup %4959  ;;  %3540 = vrot.lane.b32.xlu1 %v4958_v8, %s5181_s4 }
0x28e7   :  { %3557 = vrot.lane.b32.xlu0 %v4960_v40, %s5181_s4 }
0x2958   :  { %v3541_v9 = vpop.permute.xlu1 %3540 }
0x2959   :  { %v3543_v13 = vmul.f32 %v4954_v62, %v3541_v9  ;;  %v3558_v14 = vpop.permute.xlu0 %3557 }
0x295a   :  { %v3560_v15 = vmul.f32 %v4956_v63, %v3558_v14 }
0x295b   :  { %3562 = vrot.lane.b32.xlu1 %v3543_v13, %s5182_s20 }
0x295c   :  { %3651 = vrot.lane.b32.xlu0 %v3560_v15, %s5182_s20 }
0x29cd   :  { %v5860_v18 = vpop.permute.xlu1 %3562 }
0x29ce   :  { %v3652_v20 = vpop.permute.xlu0 %3651  ;;  %4467 = vmatmul.mubr.msk.f32.vlgmr.msra.gmra.mrb[30].mxu1 %vm155_vm1, %v5860_v18 }
0x29cf   :  { %4478 = vmatmul.mubr.msk.f32.vlgmr.msra.gmra.mrb[34].mxu0 %vm155_vm1, %v3652_v20  ;;  %4482 = vmatprep.mubr.msk.f32.mxu1 %vm5180_vm0, %v5178_v1 }
0x2aa1   :  { %v3643_v21 = vpop.f32.mrb[30].mxu1 }
0x2aa2   :  { %v3726_v28 = vadd.f32 %v3725_v23, %v3643_v21  ;;  %v4468_v31 = vpop.f32.mrb[31].mxu1  ;;  %v3721_v33 = vpop.f32.mrb[34].mxu0 }
0x2aa3   :  { %v3728_v36 = vadd.f32 %v3727_v34, %v3721_v33  ;;  %v4479_v38 = vpop.f32.mrb[35].mxu0 }
0x2aa4   :  { %4961 = vtanh.f32 %v3726_v28  ;;  %v3961_v17 = vmul.f32 -1.442695, %v3726_v28 }
0x2aa5   :  { %4963 = vtanh.f32 %v3728_v36  ;;  %v3962_v44 = vmul.f32 -1.442695, %v3728_v36 }
0x2aa6   :  { %4965 = vpow2.f32 %v3961_v17 }
0x2aa7   :  { %4967 = vpow2.f32 %v3962_v44 }
0x2aae   :  { %v4962_v39 = vpop.eup %4961 }
0x2aaf   :  { %v4964_v42 = vpop.eup %4963  ;;  %3745 = vrot.lane.b32.xlu1 %v4962_v39, %s5181_s4 }
0x2ab0   :  { %3762 = vrot.lane.b32.xlu0 %v4964_v42, %s5181_s4  ;;  %v4966_v1 = vpop.eup %4965 }
0x2ab1   :  { %v4968_v45 = vpop.eup %4967  ;;  %v3732_v41 = vadd.f32 1.0, %v4966_v1 }
0x2ab2   :  { %v3739_v16 = vadd.f32 1.0, %v4968_v45 }
0x2ab3   :  { %4969 = vrcp.f32 %v3732_v41 }
0x2ab4   :  { %4971 = vrcp.f32 %v3739_v16 }
0x2abd   :  { %v4970_v57 = vpop.eup %4969 }
0x2abe   :  { %v4972_v24 = vpop.eup %4971  ;;  %v3743_v37 = vmul.f32 %v4970_v57, %v3537_v6 }
0x2abf   :  { %v3760_v51 = vmul.f32 %v4972_v24, %v3554_v56 }
0x2b21   :  { %v3746_v46 = vpop.permute.xlu1 %3745 }
0x2b22   :  { %v3748_v49 = vmul.f32 %v4970_v57, %v3746_v46  ;;  %v3763_v12 = vpop.permute.xlu0 %3762 }
0x2b23   :  { %v3765_v50 = vmul.f32 %v4972_v24, %v3763_v12 }
0x2b24   :  { %3750 = vrot.lane.b32.xlu1 %v3748_v49, %s5181_s4 }
0x2b25   :  { %3767 = vrot.lane.b32.xlu0 %v3765_v50, %s5181_s4 }
0x2b96   :  { %v3751_v27 = vpop.permute.xlu1 %3750 }
0x2b97   :  { %v3753_v52 = vadd.f32 %v3751_v27, %v3743_v37  ;;  %v3768_v2 = vpop.permute.xlu0 %3767 }
0x2b98   :  { %v3770_v54 = vadd.f32 %v3768_v2, %v3760_v51 }
0x2b99   :  { %4973 = vtanh.f32 %v3753_v52 }
0x2b9a   :  { %4975 = vtanh.f32 %v3770_v54 }
0x2ba3   :  { %v4974_v55 = vpop.eup %4973 }
0x2ba4   :  { %v4976_v26 = vpop.eup %4975  ;;  %3756 = vrot.lane.b32.xlu1 %v4974_v55, %s5181_s4 }
0x2ba5   :  { %3773 = vrot.lane.b32.xlu0 %v4976_v26, %s5181_s4 }
0x2ba8   :  { %2271 = vrot.lane.b32.xlu1 %v5699_v25, %s5183_s25 }
0x2ba9   :  { %2487 = vrot.lane.b32.xlu0 %v5725_v0, %s5183_s25 }
0x2bac   :  { %2703 = vrot.lane.b32.xlu1 %v5751_v47, %s5183_s25  ;;  %v5184_v47 = vmov 0  }
0x2bad   :  { %2919 = vrot.lane.b32.xlu0 %v5777_v19, %s5183_s25  ;;  %v3789_v19 = vld [vmem:[#allocation4] sm:$0x1] }
0x2bae   :  { %4720 = vset.pattern.permute.xlu0 %v5184_v47 }
0x2bb0   :  { %3135 = vrot.lane.b32.xlu1 %v5803_v29, %s5183_s25 }
0x2bb1   :  { %3351 = vrot.lane.b32.xlu0 %v5831_v48, %s5183_s25 }
0x2bb4   :  { %3567 = vrot.lane.b32.xlu1 %v3560_v15, %s5183_s25 }
0x2c16   :  { %v3757_v43 = vpop.permute.xlu1 %3756 }
0x2c17   :  { %v3759_v58 = vmul.f32 %v4970_v57, %v3757_v43  ;;  %v3774_v25 = vpop.permute.xlu0 %3773 }
0x2c18   :  { %v3776_v59 = vmul.f32 %v4972_v24, %v3774_v25 }
0x2c19   :  { %3778 = vrot.lane.b32.xlu0 %v3759_v58, %s5182_s20 }
0x2c1a   :  { %3783 = vrot.lane.b32.xlu1 %v3776_v59, %s5183_s25  ;;  %v2272_v0 = vpop.permute.xlu1 %2271 }
0x2c1b   :  { %2274 = vst.msk [vmem:[#allocation3 + $0x7] sm:$0x1] %vm445_vm3, %v2272_v0  ;;  %v2488_v29 = vpop.permute.xlu0 %2487 }
0x2c1c   :  { %2490 = vst.msk [vmem:[#allocation3 + $0x6] sm:$0x1] %vm445_vm3, %v2488_v29 }
0x2c1d   :  { %3565 = vst.msk [vmem:[#allocation3 + $0x6] sm:$0x1] %vm439_vm2, %v5860_v18  ;;  %3792 = vperm.xlu0 %4720, %v3789_v19  }
0x2c1e   :  { %v2704_v48 = vpop.permute.xlu1 %2703 }
0x2c1f   :  { %2706 = vst.msk [vmem:[#allocation3 + $0x5] sm:$0x1] %vm445_vm3, %v2704_v48  ;;  %v2920_v60 = vpop.permute.xlu0 %2919 }
0x2c20   :  { %3349 = vst.msk [vmem:[#allocation3 + $0x5] sm:$0x1] %vm439_vm2, %v5836_v22 }
0x2c21   :  { %2922 = vst.msk [vmem:[#allocation3 + $0x4] sm:$0x1] %vm445_vm3, %v2920_v60 }
0x2c22   :  { %3133 = vst.msk [vmem:[#allocation3 + $0x4] sm:$0x1] %vm439_vm2, %v5808_v32  ;;  %v3136_v61 = vpop.permute.xlu1 %3135  ;;  %v3787_v32 = vld [vmem:[%s5930_s9] sm:$0x1]  ;;  %s5135_s9 = scalar_lea.vmem %s3890_s13, 16 }
0x2c23   :  { %3138 = vst.msk [vmem:[#allocation3 + $0x3] sm:$0x1] %vm445_vm3, %v3136_v61  ;;  %v3352_v62 = vpop.permute.xlu0 %3351  ;;  %p5136_p0 = scmp.ne.s32.totalorder %s3890_s13, %s5135_s9  ;;  %p5141_p2 = scmp.lt.s32.totalorder %s5139_s6, %s5135_s9 }
0x2c24   :  { %3354 = vst.msk [vmem:[#allocation3 + $0x2] sm:$0x1] %vm445_vm3, %v3352_v62 }
0x2c25   :  { %p5142_p3 = por %p5141_p2, %p5140_p1 }
0x2c26   :  { %v3568_v10 = vpop.permute.xlu1 %3567 }
0x2c27   :  { %3570 = vst.msk [vmem:[#allocation3 + $0x1] sm:$0x1] %vm445_vm3, %v3568_v10  ;;  %p5143_p4 = pnand %p5142_p3, %p5136_p0 }
0x2c8b   :  { %v3779_v63 = vpop.permute.xlu0 %3778 }
0x2c8c   :  { %3781 = vst.msk [vmem:[#allocation3 + $0x7] sm:$0x1] %vm439_vm2, %v3779_v63  ;;  %v3784_v3 = vpop.permute.xlu1 %3783 }
0x2c8d   :  { %3786 = vst.msk [vmem:[#allocation3] sm:$0x1] %vm445_vm3, %v3784_v3 }
0x2c94   :  { %v3788_v22 = vld [vmem:[#allocation3] sm:$0xff] }
0x2c95   :  { %4481 = vmatpush3.xpose.msk.msra.mxu1 %vm1988_vm4, %v3788_v22 }
0x2c98   :  { %4483 = vmatmul.mubr.msk.f32.vlgmr.msra.gmra.mrb[32].mxu1 %vm1988_vm4, %v3787_v32 }
0x2c9c   :  { %v3793_v53 = vpop.permute.xlu0 %3792 }
0x2c9d   :  { %v3798_v4 = vrot.slane %v3793_v53, %v5392_v30 }
0x2d6b   :  { %v3871_v35 = vpop.f32.mrb[32].mxu1 }
0x2d6c   :  { %v3872_v5 = vadd.f32 %v3871_v35, %v3798_v4  ;;  %v4484_v11 = vpop.f32.mrb[33].mxu1 }
0x2d6e   :  { %v3965_v6 = vmul.f32 -1.442695, %v3872_v5 }
0x2d70   :  { %4977 = vpow2.f32 %v3965_v6 }
0x2d7a   :  { %v4978_v7 = vpop.eup %4977 }
0x2d7b   :  { %v3878_v56 = vadd.f32 1.0, %v4978_v7 }
0x2d7d   :  { %4979 = vrcp.f32 %v3878_v56 }
0x2d87   :  { %v4980_v8 = vpop.eup %4979 }
0x2d88   :  { %3882 = vst.msk [vmem:[#allocation17] sm:$0x1] %vm3881_vm5, %v4980_v8 }
0x2d89   :  { %5146 = shalt.err (!%p5143_p4)
}
0x2d8a   :  { %s5147_s17 = scalar_lea.hbm %s5932_s11, 16 }
0x2d8b   :  { %p5148_p5 = scmp.ne.s32.totalorder %s5932_s11, %s5147_s17  ;;  %p5151_p6 = scmp.lt.u32.totalorder %s5147_s17, %s5932_s11 }
0x2d8d   :  { %p5153_p7 = pnand %p5151_p6, %p5148_p5 }
0x2d8f   :  { %5156 = shalt.err (!%p5153_p7)
}
0x2d90   :  { %3892 = dma.vmem_to_hbm [thread:$0]  %s3890_s13, 16, %s5932_s11, [#allocation7]  }
0x2d91   :  { %5165 = dma.done.wait [#allocation7], 16  }
0x2d92   :  { %5166 = vsyncadd [#allocation7], 4294967280 }
0x2d93   :  { %3896 = vsyncpa [#allocation6], 1 }
0x2d94   :  { %3897 = vsyncpa [#allocation9], 1 }
0x2d95   :  { %3898 = vsyncpa [#allocation12], 1 }
0x2d96   :  { %3899 = vsyncpa [#allocation15], 1 }
0x2d97   :  { %3900 = vsyncpa [#allocation7], 1 }

</bundles_post_ra>
